<compile_context>
chip_gen: v6e
topology: v6e:2x2x1
jax: 0.10.0
libtpu: 0.0.40
codegen_flags: <defaults>
</compile_context>

<pallas_src>
import functools

import jax
import jax.numpy as jnp
from jax.experimental import pallas as pl
from jax.experimental.pallas import tpu as pltpu

_VMEM_LIMIT_BYTES = 40 * 1024 * 1024  # > v5e 16MiB default, < v7x 64MiB phys.


def _round_up(x, m):
    return (x + m - 1) // m * m


def _pick_block(dim, prefs):
    """Largest preferred block that divides `dim`, else the full dim."""
    for p in prefs:
        if dim % p == 0:
            return p
    return dim


def _maybe_pad_rows(m):
    """Pad large non-128-multiple M so block selection never falls back to a
    huge full-dim block (v7x VMEM guard)."""
    if m > 128 and m % 128 != 0:
        return _round_up(m, 128)
    return m


# ------------------------------------------------------------------
# Kernel 1a: tiled matmul + fused BN batch-statistics epilogue.
#   grid = (i over M blocks, j over Cout blocks, k over K blocks)
#   outputs: y (bf16) and PER-M-BLOCK partial sum / sum-of-squares (f32,
#   shape (num_i, 1, Cout)); the wrapper does the tiny final reduction, so
#   both i and j grid axes are "parallel" (megacore friendly).
# ------------------------------------------------------------------
def _mm_stats_kernel(x_ref, w_ref, y_ref, s_ref, ss_ref, acc_ref):
    k = pl.program_id(2)

    @pl.when(k == 0)
    def _():
        acc_ref[...] = jnp.zeros_like(acc_ref)

    acc_ref[...] += jnp.dot(x_ref[...], w_ref[...],
                            preferred_element_type=jnp.float32)

    @pl.when(k == pl.num_programs(2) - 1)
    def _():
        acc = acc_ref[...]
        y_ref[...] = acc.astype(y_ref.dtype)
        s_ref[...] = jnp.sum(acc, axis=0, keepdims=True)[None]
        ss_ref[...] = jnp.sum(acc * acc, axis=0, keepdims=True)[None]


@functools.lru_cache(maxsize=None)
def _mm_stats_fn(M, K, N):
    bm = _pick_block(M, (1024, 512, 256, 128))
    bn = _pick_block(N, (512, 256, 128))
    bk = _pick_block(K, (1024, 512, 384, 256, 128))
    num_i = M // bm
    grid = (num_i, N // bn, K // bk)
    return pl.pallas_call(
        _mm_stats_kernel,
        out_shape=(jax.ShapeDtypeStruct((M, N), jnp.bfloat16),
                   jax.ShapeDtypeStruct((num_i, 1, N), jnp.float32),
                   jax.ShapeDtypeStruct((num_i, 1, N), jnp.float32)),
        grid_spec=pltpu.PrefetchScalarGridSpec(
            num_scalar_prefetch=0,
            grid=grid,
            in_specs=[
                pl.BlockSpec((bm, bk), lambda i, j, k: (i, k)),
                pl.BlockSpec((bk, bn), lambda i, j, k: (k, j)),
            ],
            out_specs=[
                pl.BlockSpec((bm, bn), lambda i, j, k: (i, j)),
                pl.BlockSpec((1, 1, bn), lambda i, j, k: (i, 0, j)),
                pl.BlockSpec((1, 1, bn), lambda i, j, k: (i, 0, j)),
            ],
            scratch_shapes=[pltpu.VMEM((bm, bn), jnp.float32)]),
        compiler_params=pltpu.CompilerParams(
            dimension_semantics=("parallel", "parallel", "arbitrary"),
            vmem_limit_bytes=_VMEM_LIMIT_BYTES),
        cost_estimate=pl.CostEstimate(
            flops=2 * M * N * K, transcendentals=0,
            bytes_accessed=2 * (M * K + K * N + M * N) + 8 * N * num_i),
    )


# ------------------------------------------------------------------
# Kernel 1b: DUAL-input 1x1 matmul + fused BN stats (route-concat fusion).
# y = x1 @ w1 + x2 @ w2 with full-K blocks per input -> the channel concat of
# (upsampled, skip feature) is never materialized in HBM.
# ------------------------------------------------------------------
def _mm2_stats_kernel(x1_ref, x2_ref, w1_ref, w2_ref, y_ref, s_ref, ss_ref,
                      acc_ref):
    acc_ref[...] = jnp.dot(x1_ref[...], w1_ref[...],
                           preferred_element_type=jnp.float32)
    acc_ref[...] += jnp.dot(x2_ref[...], w2_ref[...],
                            preferred_element_type=jnp.float32)
    acc = acc_ref[...]
    y_ref[...] = acc.astype(y_ref.dtype)
    s_ref[...] = jnp.sum(acc, axis=0, keepdims=True)[None]
    ss_ref[...] = jnp.sum(acc * acc, axis=0, keepdims=True)[None]


@functools.lru_cache(maxsize=None)
def _mm2_stats_fn(M, K1, K2, N):
    bm = _pick_block(M, (1024, 512, 256, 128))
    bn = _pick_block(N, (512, 256, 128))
    num_i = M // bm
    grid = (num_i, N // bn)
    return pl.pallas_call(
        _mm2_stats_kernel,
        out_shape=(jax.ShapeDtypeStruct((M, N), jnp.bfloat16),
                   jax.ShapeDtypeStruct((num_i, 1, N), jnp.float32),
                   jax.ShapeDtypeStruct((num_i, 1, N), jnp.float32)),
        grid_spec=pltpu.PrefetchScalarGridSpec(
            num_scalar_prefetch=0,
            grid=grid,
            in_specs=[
                pl.BlockSpec((bm, K1), lambda i, j: (i, 0)),
                pl.BlockSpec((bm, K2), lambda i, j: (i, 0)),
                pl.BlockSpec((K1, bn), lambda i, j: (0, j)),
                pl.BlockSpec((K2, bn), lambda i, j: (0, j)),
            ],
            out_specs=[
                pl.BlockSpec((bm, bn), lambda i, j: (i, j)),
                pl.BlockSpec((1, 1, bn), lambda i, j: (i, 0, j)),
                pl.BlockSpec((1, 1, bn), lambda i, j: (i, 0, j)),
            ],
            scratch_shapes=[pltpu.VMEM((bm, bn), jnp.float32)]),
        compiler_params=pltpu.CompilerParams(
            dimension_semantics=("parallel", "parallel"),
            vmem_limit_bytes=_VMEM_LIMIT_BYTES),
        cost_estimate=pl.CostEstimate(
            flops=2 * M * N * (K1 + K2), transcendentals=0,
            bytes_accessed=2 * (M * (K1 + K2) + (K1 + K2) * N + M * N)),
    )


# ------------------------------------------------------------------
# Kernel 1c: tiled matmul + fused bias (prediction heads, no BN/act).
# ------------------------------------------------------------------
def _mm_bias_kernel(x_ref, w_ref, b_ref, o_ref, acc_ref):
    k = pl.program_id(2)

    @pl.when(k == 0)
    def _():
        acc_ref[...] = jnp.zeros_like(acc_ref)

    acc_ref[...] += jnp.dot(x_ref[...], w_ref[...],
                            preferred_element_type=jnp.float32)

    @pl.when(k == pl.num_programs(2) - 1)
    def _():
        o_ref[...] = (acc_ref[...] + b_ref[...]).astype(o_ref.dtype)


@functools.lru_cache(maxsize=None)
def _mm_bias_fn(M, K, N):
    bm = _pick_block(M, (1024, 512, 256, 128))
    bn = _pick_block(N, (512, 256, 128))
    bk = _pick_block(K, (1024, 512, 384, 256, 128))
    grid = (M // bm, N // bn, K // bk)
    return pl.pallas_call(
        _mm_bias_kernel,
        out_shape=jax.ShapeDtypeStruct((M, N), jnp.float32),
        grid_spec=pltpu.PrefetchScalarGridSpec(
            num_scalar_prefetch=0,
            grid=grid,
            in_specs=[
                pl.BlockSpec((bm, bk), lambda i, j, k: (i, k)),
                pl.BlockSpec((bk, bn), lambda i, j, k: (k, j)),
                pl.BlockSpec((1, bn), lambda i, j, k: (0, j)),
            ],
            out_specs=pl.BlockSpec((bm, bn), lambda i, j, k: (i, j)),
            scratch_shapes=[pltpu.VMEM((bm, bn), jnp.float32)]),
        compiler_params=pltpu.CompilerParams(
            dimension_semantics=("parallel", "parallel", "arbitrary"),
            vmem_limit_bytes=_VMEM_LIMIT_BYTES),
        cost_estimate=pl.CostEstimate(
            flops=2 * M * N * K, transcendentals=0,
            bytes_accessed=2 * (M * K + K * N) + 4 * (M * N + N)),
    )


# ------------------------------------------------------------------
# Kernel 2: per-channel scale/shift (BN) + LeakyReLU(0.1), optionally with a
# fused residual skip-add.  f32 math, bf16 in/out.
# ------------------------------------------------------------------
def _bn_leaky_kernel(y_ref, s_ref, b_ref, o_ref):
    y = y_ref[...].astype(jnp.float32) * s_ref[...] + b_ref[...]
    o_ref[...] = jnp.maximum(y, 0.1 * y).astype(o_ref.dtype)


def _bn_leaky_skip_kernel(y_ref, s_ref, b_ref, k_ref, o_ref):
    y = y_ref[...].astype(jnp.float32) * s_ref[...] + b_ref[...]
    a = jnp.maximum(y, 0.1 * y)
    o_ref[...] = (a + k_ref[...].astype(jnp.float32)).astype(o_ref.dtype)


@functools.lru_cache(maxsize=None)
def _bn_leaky_fn(M, C, with_skip=False):
    bm = _pick_block(M, (1024, 512, 256, 128))
    in_specs = [
        pl.BlockSpec((bm, C), lambda i: (i, 0)),
        pl.BlockSpec((1, C), lambda i: (0, 0)),
        pl.BlockSpec((1, C), lambda i: (0, 0)),
    ]
    if with_skip:
        in_specs.append(pl.BlockSpec((bm, C), lambda i: (i, 0)))
    kern = _bn_leaky_skip_kernel if with_skip else _bn_leaky_kernel
    return pl.pallas_call(
        kern,
        out_shape=jax.ShapeDtypeStruct((M, C), jnp.bfloat16),
        grid=(M // bm,),
        in_specs=in_specs,
        out_specs=pl.BlockSpec((bm, C), lambda i: (i, 0)),
        compiler_params=pltpu.CompilerParams(
            dimension_semantics=("parallel",),
            vmem_limit_bytes=_VMEM_LIMIT_BYTES),
    )


# ------------------------------------------------------------------
# im2col glue (plain JAX, bf16).  Patch row order is (kh, kw, cin), matching
# the weight layout built below (equivalent to PyTorch [Cout,Cin,kH,kW]).
# TODO(synk): replace with an in-kernel shifted-window DMA (see header).
# ------------------------------------------------------------------
def _im2col(x, ksize, stride, pad):
    N, H, W, C = x.shape
    if ksize == 1 and stride == 1 and pad == 0:
        return x.reshape(N * H * W, C), H, W
    xp = jnp.pad(x, ((0, 0), (pad, pad), (pad, pad), (0, 0)))
    Ho = (H + 2 * pad - ksize) // stride + 1
    Wo = (W + 2 * pad - ksize) // stride + 1
    cols = []
    for kh in range(ksize):
        for kw in range(ksize):
            cols.append(xp[:, kh:kh + stride * (Ho - 1) + 1:stride,
                            kw:kw + stride * (Wo - 1) + 1:stride, :])
    patches = jnp.concatenate(cols, axis=-1)
    return patches.reshape(N * Ho * Wo, ksize * ksize * C), Ho, Wo


# ------------------------------------------------------------------
# Shared BN math on the fused per-block partial statistics.
# NOTE: var = E[x^2] - E[x]^2 accumulated in f32; acceptable for the synthetic
# weights here (|mean| ~ std) but can cancel for |mean| >> std.
# ------------------------------------------------------------------
def _bn_coeffs(s, ss, gamma, beta, m_true):
    s_sum = jnp.sum(s, axis=(0, 1))
    ss_sum = jnp.sum(ss, axis=(0, 1))
    mean = s_sum / m_true
    var = jnp.maximum(ss_sum / m_true - mean * mean, 0.0)
    scale = gamma * jax.lax.rsqrt(var + 1e-5)
    shift = beta - mean * scale
    return scale[None, :], shift[None, :]


# ------------------------------------------------------------------
# Layer forwards (jitted per static conv config).
# ------------------------------------------------------------------
@functools.partial(jax.jit, static_argnames=("ksize", "stride", "pad"))
def _conv_bn_leaky(x, w, gamma, beta, skip, *, ksize, stride, pad):
    """Conv2d(bias=False) + BatchNorm2d(batch stats) + LeakyReLU(0.1),
    optionally with a fused residual skip-add (skip is None or NHWC)."""
    N = x.shape[0]
    cols, Ho, Wo = _im2col(x, ksize, stride, pad)
    M, K = cols.shape
    Mp = _maybe_pad_rows(M)
    if Mp != M:
        cols = jnp.pad(cols, ((0, Mp - M), (0, 0)))
    Cout = w.shape[1]
    y, s, ss = _mm_stats_fn(Mp, K, Cout)(cols, w)
    scale, shift = _bn_coeffs(s, ss, gamma, beta, M)
    if skip is None:
        out = _bn_leaky_fn(Mp, Cout, False)(y, scale, shift)
    else:
        sk = skip.reshape(-1, Cout)
        if Mp != M:
            sk = jnp.pad(sk, ((0, Mp - M), (0, 0)))
        out = _bn_leaky_fn(Mp, Cout, True)(y, scale, shift, sk)
    return out[:M].reshape(N, Ho, Wo, Cout)


@jax.jit
def _route_conv_bn_leaky(x_up, x_feat, w, gamma, beta):
    """First 1x1 conv of a ConvolutionalSet applied to the (virtual) channel
    concat of (upsampled, skip-feature) without materializing the concat."""
    N, H, W, C1 = x_up.shape
    C2 = x_feat.shape[-1]
    Cout = w.shape[1]
    a = x_up.reshape(-1, C1)
    b = x_feat.reshape(-1, C2)
    M = a.shape[0]
    Mp = _maybe_pad_rows(M)
    if Mp != M:
        a = jnp.pad(a, ((0, Mp - M), (0, 0)))
        b = jnp.pad(b, ((0, Mp - M), (0, 0)))
    y, s, ss = _mm2_stats_fn(Mp, C1, C2, Cout)(a, b, w[:C1], w[C1:])
    scale, shift = _bn_coeffs(s, ss, gamma, beta, M)
    out = _bn_leaky_fn(Mp, Cout, False)(y, scale, shift)
    return out[:M].reshape(N, H, W, Cout)


@functools.partial(jax.jit, static_argnames=("ksize", "stride", "pad"))
def _conv_bias(x, w, b, *, ksize, stride, pad):
    """Plain nn.Conv2d (bias=True), no BN / activation (prediction heads)."""
    N = x.shape[0]
    cols, Ho, Wo = _im2col(x, ksize, stride, pad)
    M, K = cols.shape
    Mp = _maybe_pad_rows(M)
    if Mp != M:
        cols = jnp.pad(cols, ((0, Mp - M), (0, 0)))
    Cout = w.shape[1]
    y = _mm_bias_fn(Mp, K, Cout)(cols, w, b)
    return y[:M].reshape(N, Ho, Wo, Cout)


@jax.jit
def _upsample2x(x):
    # Nearest-neighbour 2x in one broadcast+reshape (single materialization).
    # TODO(synk): fuse the duplicated read directly into the route conv.
    N, H, W, C = x.shape
    return jnp.broadcast_to(x[:, :, None, :, None, :],
                            (N, H, 2, W, 2, C)).reshape(N, 2 * H, 2 * W, C)


def run_block(x, blk):
    kind = blk["kind"]
    if kind == "cbl":
        return _conv_bn_leaky(x, blk["w"], blk["gamma"], blk["beta"], None,
                              ksize=blk["ksize"], stride=blk["stride"],
                              pad=blk["pad"])
    if kind == "conv":
        return _conv_bias(x, blk["w"], blk["b"],
                          ksize=blk["ksize"], stride=blk["stride"],
                          pad=blk["pad"])
    if kind == "res":
        l1, l2 = blk["layers"]
        y = _conv_bn_leaky(x, l1["w"], l1["gamma"], l1["beta"], None,
                           ksize=l1["ksize"], stride=l1["stride"],
                           pad=l1["pad"])
        # second conv: residual add fused into the BN/LeakyReLU kernel
        return _conv_bn_leaky(y, l2["w"], l2["gamma"], l2["beta"], x,
                              ksize=l2["ksize"], stride=l2["stride"],
                              pad=l2["pad"])
    if kind == "up":
        return _upsample2x(x)
    raise ValueError(kind)


def run_seq(x, blocks):
    for b in blocks:
        x = run_block(x, b)
    return x


# ------------------------------------------------------------------
# Parameter construction (deterministic synthetic init)
# ------------------------------------------------------------------
class _PG:
    def __init__(self, key):
        self.key = key

    def next(self):
        self.key, sub = jax.random.split(self.key)
        return sub


def _cbl(pg, cin, cout, k, s, p):
    w = (jax.random.normal(pg.next(), (k * k * cin, cout), jnp.float32)
         * 0.05).astype(jnp.bfloat16)
    return dict(kind="cbl", w=w,
                gamma=jnp.ones((cout,), jnp.float32),   # PyTorch BN defaults
                beta=jnp.zeros((cout,), jnp.float32),
                ksize=k, stride=s, pad=p)


def _head_conv(pg, cin, cout, k, s, p):
    """nn.Conv2d(bias=True); Cout padded to 128-multiple for lane-dense stores."""
    cout_p = _round_up(cout, 128)
    w = jnp.zeros((k * k * cin, cout_p), jnp.float32)
    w = w.at[:, :cout].set(
        jax.random.normal(pg.next(), (k * k * cin, cout), jnp.float32) * 0.05)
    b = jnp.zeros((1, cout_p), jnp.float32)
    b = b.at[0, :cout].set(
        jax.random.normal(pg.next(), (cout,), jnp.float32) * 0.01)
    return dict(kind="conv", w=w.astype(jnp.bfloat16), b=b,
                ksize=k, stride=s, pad=p)


def _residual(pg, cin):
    return dict(kind="res", layers=[_cbl(pg, cin, cin // 2, 1, 1, 0),
                                    _cbl(pg, cin // 2, cin, 3, 1, 1)])


def _downsample(pg, cin, cout):
    return [_cbl(pg, cin, cout, 3, 2, 1)]


def _conv_set(pg, cin, cout):
    t = cout * 2
    return [_cbl(pg, cin, cout, 1, 1, 0),
            _cbl(pg, cout, t, 3, 1, 1),
            _cbl(pg, t, cout, 1, 1, 0),
            _cbl(pg, cout, t, 3, 1, 1),
            _cbl(pg, t, cout, 1, 1, 0)]


def build_darknet(key, cls=80):
    pg = _PG(key)
    oc = 3 * (5 + cls)
    params = {"out_channels": oc}
    params["trunk52"] = ([_cbl(pg, 3, 32, 3, 1, 1)]
                         + _downsample(pg, 32, 64) + [_residual(pg, 64)]
                         + _downsample(pg, 64, 128)
                         + [_residual(pg, 128) for _ in range(2)]
                         + _downsample(pg, 128, 256)
                         + [_residual(pg, 256) for _ in range(8)])
    params["trunk26"] = (_downsample(pg, 256, 512)
                         + [_residual(pg, 512) for _ in range(8)])
    params["trunk13"] = (_downsample(pg, 512, 1024)
                         + [_residual(pg, 1024) for _ in range(4)])
    params["con_set13"] = _conv_set(pg, 1024, 512)
    params["predict_one"] = [_cbl(pg, 512, 1024, 3, 1, 1),
                             _head_conv(pg, 1024, oc, 1, 1, 0)]
    params["up_to_26"] = [_cbl(pg, 512, 256, 1, 1, 0), dict(kind="up")]
    params["con_set26"] = _conv_set(pg, 768, 256)
    params["predict_two"] = [_cbl(pg, 256, 512, 3, 1, 1),
                             _head_conv(pg, 512, oc, 1, 1, 0)]
    params["up_to_52"] = [_cbl(pg, 256, 128, 1, 1, 0), dict(kind="up")]
    params["con_set52"] = _conv_set(pg, 384, 128)
    params["predict_three"] = [_cbl(pg, 128, 256, 3, 1, 1),
                               _head_conv(pg, 256, oc, 1, 1, 0)]
    return params


# ------------------------------------------------------------------
# Darknet forward (mirrors Darknet.forward); NCHW in/out, NHWC bf16 inside.
# The torch.cat((up, feature)) routes are replaced by the dual-input route
# kernel consuming the first 1x1 conv of the following ConvolutionalSet.
# ------------------------------------------------------------------
def darknet_forward(x_nchw, params):
    oc = params["out_channels"]
    x = jnp.transpose(x_nchw, (0, 2, 3, 1)).astype(jnp.bfloat16)

    feature_52 = run_seq(x, params["trunk52"])
    feature_26 = run_seq(feature_52, params["trunk26"])
    feature_13 = run_seq(feature_26, params["trunk13"])

    con_set_13 = run_seq(feature_13, params["con_set13"])
    det_13 = run_seq(con_set_13, params["predict_one"])

    up_26 = run_seq(con_set_13, params["up_to_26"])
    cs26 = params["con_set26"]
    x26 = _route_conv_bn_leaky(up_26, feature_26, cs26[0]["w"],
                               cs26[0]["gamma"], cs26[0]["beta"])
    con_set_26 = run_seq(x26, cs26[1:])
    det_26 = run_seq(con_set_26, params["predict_two"])

    up_52 = run_seq(con_set_26, params["up_to_52"])
    cs52 = params["con_set52"]
    x52 = _route_conv_bn_leaky(up_52, feature_52, cs52[0]["w"],
                               cs52[0]["gamma"], cs52[0]["beta"])
    con_set_52 = run_seq(x52, cs52[1:])
    det_52 = run_seq(con_set_52, params["predict_three"])

    def finish(t):  # strip head channel padding, NHWC -> NCHW
        return jnp.transpose(t[..., :oc], (0, 3, 1, 2))

    return finish(det_13), finish(det_26), finish(det_52)


# ------------------------------------------------------------------
if __name__ == "__main__":
    key = jax.random.PRNGKey(0)
    pkey, xkey = jax.random.split(key)

    params = build_darknet(pkey, cls=80)

    # Small input consistent with the module (full net downsamples by 32).
    N, C, H, W = 2, 3, 64, 64
    x = jax.random.normal(xkey, (N, C, H, W), jnp.float32)

    d13, d26, d52 = darknet_forward(x, params)
    d13, d26, d52 = jax.block_until_ready((d13, d26, d52))

    oc = 3 * (5 + 80)
    assert d13.shape == (N, oc, H // 32, W // 32), d13.shape
    assert d26.shape == (N, oc, H // 16, W // 16), d26.shape
    assert d52.shape == (N, oc, H // 8, W // 8), d52.shape
    assert bool(jnp.isfinite(d13).all() & jnp.isfinite(d26).all()
                & jnp.isfinite(d52).all())

    print("KERNEL_OK")
</pallas_src>

<mosaic_0001>
module attributes {stable_mosaic.version = 11 : i64} {
  func.func @_mm_stats_kernel(%arg0: i32, %arg1: i32, %arg2: i32, %arg3: memref<1024x27xbf16, #tpu.memory_space<vmem>>, %arg4: memref<27x32xbf16, #tpu.memory_space<vmem>>, %arg5: memref<1024x32xbf16, #tpu.memory_space<vmem>>, %arg6: memref<1x1x32xf32, #tpu.memory_space<vmem>>, %arg7: memref<1x1x32xf32, #tpu.memory_space<vmem>>, %arg8: memref<1024x32xf32, #tpu.memory_space<vmem>>) attributes {dimension_semantics = [#tpu.dimension_semantics<parallel>, #tpu.dimension_semantics<parallel>, #tpu.dimension_semantics<arbitrary>], iteration_bounds = array<i64: 8, 1, 1>, scalar_prefetch = 0 : i64, scratch_operands = 1 : i64, tpu.core_type = #tpu.core_type<tc>, window_params = [{transform_indices = @transform_0, window_bounds = array<i64: 1024, 27>}, {transform_indices = @transform_1, window_bounds = array<i64: 27, 32>}, {transform_indices = @transform_2, window_bounds = array<i64: 1024, 32>}, {transform_indices = @transform_3, window_bounds = array<i64: 1, 1, 32>}, {transform_indices = @transform_4, window_bounds = array<i64: 1, 1, 32>}]} {
    %c0_i32 = arith.constant 0 : i32
    %0 = arith.cmpi eq, %arg2, %c0_i32 : i32
    %1 = arith.extui %0 : i1 to i32
    %c0_i32_0 = arith.constant 0 : i32
    %2 = arith.cmpi ne, %1, %c0_i32_0 : i32
    scf.if %2 {
      %cst_10 = arith.constant 0.000000e+00 : f32
      %12 = vector.broadcast %cst_10 : f32 to vector<1024x32xf32>
      %c0_11 = arith.constant 0 : index
      %c0_12 = arith.constant 0 : index
      %13 = vector.load %arg8[%c0_11, %c0_12] : memref<1024x32xf32, #tpu.memory_space<vmem>>, vector<1024x32xf32>
      tpu.vector_store %arg8[%c0_11, %c0_12], %12 {strides = array<i32>} : memref<1024x32xf32, #tpu.memory_space<vmem>>, vector<1024x32xf32>,
    } else {
    }
    %c0 = arith.constant 0 : index
    %c0_1 = arith.constant 0 : index
    %3 = vector.load %arg8[%c0, %c0_1] : memref<1024x32xf32, #tpu.memory_space<vmem>>, vector<1024x32xf32>
    %c0_2 = arith.constant 0 : index
    %c0_3 = arith.constant 0 : index
    %4 = vector.load %arg3[%c0_2, %c0_3] : memref<1024x27xbf16, #tpu.memory_space<vmem>>, vector<1024x27xbf16>
    %c0_4 = arith.constant 0 : index
    %c0_5 = arith.constant 0 : index
    %5 = vector.load %arg4[%c0_4, %c0_5] : memref<27x32xbf16, #tpu.memory_space<vmem>>, vector<27x32xbf16>
    %cst = arith.constant dense<0.000000e+00> : vector<1024x32xf32>
    %6 = tpu.matmul %4, %5, %cst {dimension_numbers = #tpu.dot_dimension_numbers<[1], [0], [0], [1], [0, 0, 1, 1], [], []>} : vector<1024x27xbf16>, vector<27x32xbf16>, vector<1024x32xf32> -> vector<1024x32xf32>
    %7 = arith.addf %3, %6 : vector<1024x32xf32>
    %c0_6 = arith.constant 0 : index
    %c0_7 = arith.constant 0 : index
    %8 = vector.load %arg8[%c0_6, %c0_7] : memref<1024x32xf32, #tpu.memory_space<vmem>>, vector<1024x32xf32>
    tpu.vector_store %arg8[%c0_6, %c0_7], %7 {strides = array<i32>} : memref<1024x32xf32, #tpu.memory_space<vmem>>, vector<1024x32xf32>,
    %c0_i32_8 = arith.constant 0 : i32
    %9 = arith.cmpi eq, %arg2, %c0_i32_8 : i32
    %10 = arith.extui %9 : i1 to i32
    %c0_i32_9 = arith.constant 0 : i32
    %11 = arith.cmpi ne, %10, %c0_i32_9 : i32
    scf.if %11 {
      %c0_10 = arith.constant 0 : index
      %c0_11 = arith.constant 0 : index
      %12 = vector.load %arg8[%c0_10, %c0_11] : memref<1024x32xf32, #tpu.memory_space<vmem>>, vector<1024x32xf32>
      %13 = arith.truncf %12 : vector<1024x32xf32> to vector<1024x32xbf16>
      %c0_12 = arith.constant 0 : index
      %c0_13 = arith.constant 0 : index
      %14 = vector.load %arg5[%c0_12, %c0_13] : memref<1024x32xbf16, #tpu.memory_space<vmem>>, vector<1024x32xbf16>
      tpu.vector_store %arg5[%c0_12, %c0_13], %13 {strides = array<i32>} : memref<1024x32xbf16, #tpu.memory_space<vmem>>, vector<1024x32xbf16>,
      %cst_14 = arith.constant dense<0.000000e+00> : vector<32xf32>
      %15 = vector.multi_reduction <add>, %12, %cst_14 [0] : vector<1024x32xf32> to vector<32xf32>
      %16 = vector.shape_cast %15 : vector<32xf32> to vector<1x32xf32>
      %17 = vector.shape_cast %16 : vector<1x32xf32> to vector<1x1x32xf32>
      %c0_15 = arith.constant 0 : index
      %c0_16 = arith.constant 0 : index
      %c0_17 = arith.constant 0 : index
      %18 = vector.load %arg6[%c0_15, %c0_16, %c0_17] : memref<1x1x32xf32, #tpu.memory_space<vmem>>, vector<1x1x32xf32>
      tpu.vector_store %arg6[%c0_15, %c0_16, %c0_17], %17 {strides = array<i32>} : memref<1x1x32xf32, #tpu.memory_space<vmem>>, vector<1x1x32xf32>,
      %19 = arith.mulf %12, %12 : vector<1024x32xf32>
      %cst_18 = arith.constant dense<0.000000e+00> : vector<32xf32>
      %20 = vector.multi_reduction <add>, %19, %cst_18 [0] : vector<1024x32xf32> to vector<32xf32>
      %21 = vector.shape_cast %20 : vector<32xf32> to vector<1x32xf32>
      %22 = vector.shape_cast %21 : vector<1x32xf32> to vector<1x1x32xf32>
      %c0_19 = arith.constant 0 : index
      %c0_20 = arith.constant 0 : index
      %c0_21 = arith.constant 0 : index
      %23 = vector.load %arg7[%c0_19, %c0_20, %c0_21] : memref<1x1x32xf32, #tpu.memory_space<vmem>>, vector<1x1x32xf32>
      tpu.vector_store %arg7[%c0_19, %c0_20, %c0_21], %22 {strides = array<i32>} : memref<1x1x32xf32, #tpu.memory_space<vmem>>, vector<1x1x32xf32>,
    } else {
    }
    return
  }
  func.func @transform_0(%arg0: i32, %arg1: i32, %arg2: i32) -> (i32, i32) {
    %c0_i32 = arith.constant 0 : i32
    return %arg0, %arg2 : i32, i32
  }
  func.func @transform_1(%arg0: i32, %arg1: i32, %arg2: i32) -> (i32, i32) {
    %c0_i32 = arith.constant 0 : i32
    return %arg2, %arg1 : i32, i32
  }
  func.func @transform_2(%arg0: i32, %arg1: i32, %arg2: i32) -> (i32, i32) {
    %c0_i32 = arith.constant 0 : i32
    return %arg0, %arg1 : i32, i32
  }
  func.func @transform_3(%arg0: i32, %arg1: i32, %arg2: i32) -> (i32, i32, i32) {
    %c0_i32 = arith.constant 0 : i32
    %c0_i32_0 = arith.constant 0 : i32
    return %arg0, %c0_i32, %arg1 : i32, i32, i32
  }
  func.func @transform_4(%arg0: i32, %arg1: i32, %arg2: i32) -> (i32, i32, i32) {
    %c0_i32 = arith.constant 0 : i32
    %c0_i32_0 = arith.constant 0 : i32
    return %arg0, %c0_i32, %arg1 : i32, i32, i32
  }
}

module attributes {stable_mosaic.version = 11 : i64} {
  func.func @_bn_leaky_kernel(%arg0: i32, %arg1: memref<1024x32xbf16, #tpu.memory_space<vmem>>, %arg2: memref<1x32xf32, #tpu.memory_space<vmem>>, %arg3: memref<1x32xf32, #tpu.memory_space<vmem>>, %arg4: memref<1024x32xbf16, #tpu.memory_space<vmem>>) attributes {dimension_semantics = [#tpu.dimension_semantics<parallel>], iteration_bounds = array<i64: 8>, scalar_prefetch = 0 : i64, scratch_operands = 0 : i64, tpu.core_type = #tpu.core_type<tc>, window_params = [{transform_indices = @transform_0, window_bounds = array<i64: 1024, 32>}, {pipeline_mode = #tpu.pipeline_mode<synchronous>, transform_indices = @transform_1, window_bounds = array<i64: 1, 32>}, {pipeline_mode = #tpu.pipeline_mode<synchronous>, transform_indices = @transform_2, window_bounds = array<i64: 1, 32>}, {transform_indices = @transform_3, window_bounds = array<i64: 1024, 32>}]} {
    %c0 = arith.constant 0 : index
    %c0_0 = arith.constant 0 : index
    %0 = vector.load %arg1[%c0, %c0_0] : memref<1024x32xbf16, #tpu.memory_space<vmem>>, vector<1024x32xbf16>
    %1 = arith.extf %0 : vector<1024x32xbf16> to vector<1024x32xf32>
    %c0_1 = arith.constant 0 : index
    %c0_2 = arith.constant 0 : index
    %2 = vector.load %arg2[%c0_1, %c0_2] : memref<1x32xf32, #tpu.memory_space<vmem>>, vector<1x32xf32>
    %3 = vector.broadcast %2 : vector<1x32xf32> to vector<1024x32xf32>
    %4 = arith.mulf %1, %3 : vector<1024x32xf32>
    %c0_3 = arith.constant 0 : index
    %c0_4 = arith.constant 0 : index
    %5 = vector.load %arg3[%c0_3, %c0_4] : memref<1x32xf32, #tpu.memory_space<vmem>>, vector<1x32xf32>
    %6 = vector.broadcast %5 : vector<1x32xf32> to vector<1024x32xf32>
    %7 = arith.addf %4, %6 : vector<1024x32xf32>
    %cst = arith.constant 1.000000e-01 : f32
    %8 = vector.broadcast %cst : f32 to vector<1024x32xf32>
    %9 = arith.mulf %8, %7 : vector<1024x32xf32>
    %10 = arith.maximumf %7, %9 : vector<1024x32xf32>
    %11 = arith.truncf %10 : vector<1024x32xf32> to vector<1024x32xbf16>
    %c0_5 = arith.constant 0 : index
    %c0_6 = arith.constant 0 : index
    %12 = vector.load %arg4[%c0_5, %c0_6] : memref<1024x32xbf16, #tpu.memory_space<vmem>>, vector<1024x32xbf16>
    tpu.vector_store %arg4[%c0_5, %c0_6], %11 {strides = array<i32>} : memref<1024x32xbf16, #tpu.memory_space<vmem>>, vector<1024x32xbf16>,
    return
  }
  func.func @transform_0(%arg0: i32) -> (i32, i32) {
    %c0_i32 = arith.constant 0 : i32
    %c0_i32_0 = arith.constant 0 : i32
    return %arg0, %c0_i32 : i32, i32
  }
  func.func @transform_1(%arg0: i32) -> (i32, i32) {
    %c0_i32 = arith.constant 0 : i32
    %c0_i32_0 = arith.constant 0 : i32
    %c0_i32_1 = arith.constant 0 : i32
    return %c0_i32, %c0_i32_0 : i32, i32
  }
  func.func @transform_2(%arg0: i32) -> (i32, i32) {
    %c0_i32 = arith.constant 0 : i32
    %c0_i32_0 = arith.constant 0 : i32
    %c0_i32_1 = arith.constant 0 : i32
    return %c0_i32, %c0_i32_0 : i32, i32
  }
  func.func @transform_3(%arg0: i32) -> (i32, i32) {
    %c0_i32 = arith.constant 0 : i32
    %c0_i32_0 = arith.constant 0 : i32
    return %arg0, %c0_i32 : i32, i32
  }
}

</mosaic_0001>

<bundles_post_ra>
// kernel: _conv_bn_leaky.3
= control target key start
LH: loop header
LB: loop body
LE: loop exit
PB: predicated region body
PF: predicated region fallthrough
CT: control target
= control target key end

     0   :  { %s2279_s12 = smov 0   ;;  %s2903_s0 = inlined_call_operand.vmem [shape: bf16[8192,32], index: 0, kind: input, shape index: {}]   ;;  %s2904_s1 = inlined_call_operand.vmem [shape: f32[1,32], index: 1, kind: input, shape index: {}]   ;;  %s2905_s2 = inlined_call_operand.vmem [shape: f32[1,32], index: 2, kind: input, shape index: {}]   ;;  %s2906_s3 = inlined_call_operand.vmem [shape: bf16[8192,32], index: 3, kind: output, shape index: {}]  }
   0x1 LB: > { %s1653_s13 = sadd.s32 4294967295, %s2257_s12   ;;  %p1657_p0 = scmp.ge.s32.totalorder %s2257_s12, 1  ;;  %s2257_s12 = sphi %s2279_s12, %s13_s12  }
   0x2   : > { %p138_p1 = scmp.lt.s32.totalorder %s2257_s12, 9 }
   0x4   : > { %p139_p2 = pnand %p1657_p0, %p138_p1 }
   0x5   : > { %s1658_s14 = sshll.u32 (!%p139_p2), %s1653_s13, 7 }
   0x6   : > { %142 = sbr.rel (%p139_p2) target bundleno = 211 (0xd3), region = 32  ;;  %p163_p3 = scmp.lt.s32.totalorder (!%p139_p2), %s1658_s14, 1023 }
   0xb   : > { %s2908_s14 = smov (!%p163_p3, %s1658_s14), 1023  ;;  %v2300_v0 = vld [vmem:[%s2904_s1] ss:$0 sm:$0xff]  ;;  %vm1468_vm0 = vcmask 257024  }
   0xc   : > { %s1659_s15 = sshll.u32 %s2908_s14, 2  ;;  %v2309_v9 = vld [vmem:[%s2905_s2] ss:$0 sm:$0xff] }
   0xd   : > { %s2295_s18 = scalar_lea.vmem %s2903_s0, %s1659_s15  ;;  %s2333_s25 = scalar_lea.vmem %s2906_s3, %s1659_s15 }
   0xe   : > { %v1923_v1 = vld [vmem:[%s2295_s18] sm:$0xff]   ;;  %v2178_v2 = vld [vmem:[%s2295_s18 + $0x8] sm:$0xff]   ;;  %v2179_v3 = vld [vmem:[%s2295_s18 + $0x10] sm:$0xff]  }
   0xf   : > { %v1924_v4 = vunpack.c.l.bf16 %v1923_v1  ;;  %v1925_v5 = vunpack.c.h.bf16 %v1923_v1  ;;  %v1928_v6 = vunpack.c.l.bf16 %v2178_v2  ;;  %v1929_v7 = vunpack.c.h.bf16 %v2178_v2  ;;  %v2180_v8 = vld [vmem:[%s2295_s18 + $0x18] sm:$0xff]   ;;  %v2181_v22 = vld [vmem:[%s2295_s18 + $0x20] sm:$0xff]   ;;  %v2182_v47 = vld [vmem:[%s2295_s18 + $0x28] sm:$0xff]  }
  0x10   : > { %v1932_v10 = vunpack.c.l.bf16 %v2179_v3  ;;  %v1933_v11 = vunpack.c.h.bf16 %v2179_v3  ;;  %v1936_v12 = vunpack.c.l.bf16 %v2180_v8  ;;  %v1937_v13 = vunpack.c.h.bf16 %v2180_v8  ;;  %v2183_v52 = vld [vmem:[%s2295_s18 + $0x30] sm:$0xff]   ;;  %v2184_v57 = vld [vmem:[%s2295_s18 + $0x38] sm:$0xff]  }
  0x11   : > { %v437_v14 = vmul.f32 %v1924_v4, %v2300_v0  ;;  %v438_v15 = vmul.f32 %v1925_v5, %v2300_v0  ;;  %v439_v16 = vmul.f32 %v1928_v6, %v2300_v0  ;;  %v440_v17 = vmul.f32 %v1929_v7, %v2300_v0 }
  0x12   : > { %v441_v18 = vmul.f32 %v1932_v10, %v2300_v0  ;;  %v442_v19 = vmul.f32 %v1933_v11, %v2300_v0  ;;  %v443_v20 = vmul.f32 %v1936_v12, %v2300_v0  ;;  %v444_v21 = vmul.f32 %v1937_v13, %v2300_v0 }
  0x13   : > { %v572_v23 = vadd.f32 %v2309_v9, %v437_v14  ;;  %v573_v24 = vadd.f32 %v2309_v9, %v438_v15  ;;  %v574_v25 = vadd.f32 %v2309_v9, %v439_v16  ;;  %v575_v26 = vadd.f32 %v2309_v9, %v440_v17 }
  0x14   : > { %v576_v27 = vadd.f32 %v2309_v9, %v441_v18  ;;  %v577_v28 = vadd.f32 %v2309_v9, %v442_v19  ;;  %v578_v29 = vadd.f32 %v2309_v9, %v443_v20  ;;  %v579_v30 = vadd.f32 %v2309_v9, %v444_v21 }
  0x15   : > { %v700_v31 = vmul.f32 0.1, %v572_v23  ;;  %v701_v32 = vmul.f32 0.1, %v573_v24  ;;  %v702_v33 = vmul.f32 0.1, %v574_v25  ;;  %v1940_v34 = vunpack.c.l.bf16 %v2181_v22 }
  0x16   : > { %v703_v35 = vmul.f32 0.1, %v575_v26  ;;  %v704_v36 = vmul.f32 0.1, %v576_v27  ;;  %v705_v37 = vmul.f32 0.1, %v577_v28  ;;  %v1941_v38 = vunpack.c.h.bf16 %v2181_v22 }
  0x17   : > { %v828_v39 = vmax.f32 %v572_v23, %v700_v31  ;;  %v829_v40 = vmax.f32 %v573_v24, %v701_v32  ;;  %v830_v41 = vmax.f32 %v574_v25, %v702_v33  ;;  %v706_v42 = vmul.f32 0.1, %v578_v29  ;;  %v2185_v24 = vld [vmem:[%s2295_s18 + $0x40] sm:$0xff]  }
  0x18   : > { %v831_v43 = vmax.f32 %v575_v26, %v703_v35  ;;  %v832_v44 = vmax.f32 %v576_v27, %v704_v36  ;;  %v833_v45 = vmax.f32 %v577_v28, %v705_v37  ;;  %v707_v46 = vmul.f32 0.1, %v579_v30  ;;  %v2186_v37 = vld [vmem:[%s2295_s18 + $0x48] sm:$0xff]  }
  0x19   : > { %v1794_v48 = vpack.c.bf16 %v828_v39, %v828_v39  ;;  %v1795_v49 = vpack.c.bf16 %v829_v40, %v829_v40  ;;  %v1796_v50 = vpack.c.bf16 %v830_v41, %v830_v41  ;;  %v834_v51 = vmax.f32 %v578_v29, %v706_v42  ;;  %v2187_v42 = vld [vmem:[%s2295_s18 + $0x50] sm:$0xff]  }
  0x1a   : > { %v1797_v53 = vpack.c.bf16 %v831_v43, %v831_v43  ;;  %v1798_v54 = vpack.c.bf16 %v832_v44, %v832_v44  ;;  %v1799_v55 = vpack.c.bf16 %v833_v45, %v833_v45  ;;  %v835_v56 = vmax.f32 %v579_v30, %v707_v46 }
  0x1b   : > { %1469 = vst.msk [vmem:[%s2333_s25] sm:$0xf] %vm1468_vm0, %v1794_v48  ;;  %1470 = vst.msk [vmem:[%s2333_s25 + $0x4] sm:$0xf] %vm1468_vm0, %v1795_v49  ;;  %v1800_v58 = vpack.c.bf16 %v834_v51, %v834_v51  ;;  %v445_v59 = vmul.f32 %v1940_v34, %v2300_v0  ;;  %v446_v60 = vmul.f32 %v1941_v38, %v2300_v0  ;;  %v1944_v61 = vunpack.c.l.bf16 %v2182_v47 }
  0x1c   : > { %1471 = vst.msk [vmem:[%s2333_s25 + $0x8] sm:$0xf] %vm1468_vm0, %v1796_v50  ;;  %1472 = vst.msk [vmem:[%s2333_s25 + $0xc] sm:$0xf] %vm1468_vm0, %v1797_v53  ;;  %v1801_v62 = vpack.c.bf16 %v835_v56, %v835_v56  ;;  %v1945_v63 = vunpack.c.h.bf16 %v2182_v47  ;;  %v1948_v1 = vunpack.c.l.bf16 %v2183_v52  ;;  %v1949_v2 = vunpack.c.h.bf16 %v2183_v52  ;;  %v2188_v47 = vld [vmem:[%s2295_s18 + $0x58] sm:$0xff]  }
  0x1d   : > { %1473 = vst.msk [vmem:[%s2333_s25 + $0x10] sm:$0xf] %vm1468_vm0, %v1798_v54  ;;  %1474 = vst.msk [vmem:[%s2333_s25 + $0x14] sm:$0xf] %vm1468_vm0, %v1799_v55  ;;  %v580_v3 = vadd.f32 %v2309_v9, %v445_v59  ;;  %v581_v4 = vadd.f32 %v2309_v9, %v446_v60  ;;  %v447_v5 = vmul.f32 %v1944_v61, %v2300_v0  ;;  %v1952_v6 = vunpack.c.l.bf16 %v2184_v57 }
  0x1e   : > { %1475 = vst.msk [vmem:[%s2333_s25 + $0x18] sm:$0xf] %vm1468_vm0, %v1800_v58  ;;  %1476 = vst.msk [vmem:[%s2333_s25 + $0x1c] sm:$0xf] %vm1468_vm0, %v1801_v62  ;;  %v448_v7 = vmul.f32 %v1945_v63, %v2300_v0  ;;  %v449_v8 = vmul.f32 %v1948_v1, %v2300_v0  ;;  %v450_v10 = vmul.f32 %v1949_v2, %v2300_v0  ;;  %v1953_v11 = vunpack.c.h.bf16 %v2184_v57 }
  0x1f   : > { %v708_v12 = vmul.f32 0.1, %v580_v3  ;;  %v709_v13 = vmul.f32 0.1, %v581_v4  ;;  %v582_v14 = vadd.f32 %v2309_v9, %v447_v5  ;;  %v451_v15 = vmul.f32 %v1952_v6, %v2300_v0 }
  0x20   : > { %v583_v16 = vadd.f32 %v2309_v9, %v448_v7  ;;  %v584_v17 = vadd.f32 %v2309_v9, %v449_v8  ;;  %v585_v18 = vadd.f32 %v2309_v9, %v450_v10  ;;  %v452_v19 = vmul.f32 %v1953_v11, %v2300_v0 }
  0x21   : > { %v836_v20 = vmax.f32 %v580_v3, %v708_v12  ;;  %v837_v21 = vmax.f32 %v581_v4, %v709_v13  ;;  %v710_v22 = vmul.f32 0.1, %v582_v14  ;;  %v586_v23 = vadd.f32 %v2309_v9, %v451_v15 }
  0x22   : > { %v711_v25 = vmul.f32 0.1, %v583_v16  ;;  %v712_v26 = vmul.f32 0.1, %v584_v17  ;;  %v713_v27 = vmul.f32 0.1, %v585_v18  ;;  %v587_v28 = vadd.f32 %v2309_v9, %v452_v19 }
  0x23   : > { %v1802_v29 = vpack.c.bf16 %v836_v20, %v836_v20  ;;  %v1803_v30 = vpack.c.bf16 %v837_v21, %v837_v21  ;;  %v838_v31 = vmax.f32 %v582_v14, %v710_v22  ;;  %v714_v32 = vmul.f32 0.1, %v586_v23  ;;  %v2189_v14 = vld [vmem:[%s2295_s18 + $0x60] sm:$0xff]  }
  0x24   : > { %v839_v33 = vmax.f32 %v583_v16, %v711_v25  ;;  %v840_v34 = vmax.f32 %v584_v17, %v712_v26  ;;  %v841_v35 = vmax.f32 %v585_v18, %v713_v27  ;;  %v715_v36 = vmul.f32 0.1, %v587_v28  ;;  %v2190_v27 = vld [vmem:[%s2295_s18 + $0x68] sm:$0xff]  }
  0x25   : > { %1477 = vst.msk [vmem:[%s2333_s25 + $0x20] sm:$0xf] %vm1468_vm0, %v1802_v29  ;;  %1478 = vst.msk [vmem:[%s2333_s25 + $0x24] sm:$0xf] %vm1468_vm0, %v1803_v30  ;;  %v1804_v38 = vpack.c.bf16 %v838_v31, %v838_v31  ;;  %v842_v39 = vmax.f32 %v586_v23, %v714_v32  ;;  %v1956_v40 = vunpack.c.l.bf16 %v2185_v24  ;;  %v1957_v41 = vunpack.c.h.bf16 %v2185_v24  ;;  %v2191_v32 = vld [vmem:[%s2295_s18 + $0x70] sm:$0xff]  }
  0x26   : > { %v1805_v43 = vpack.c.bf16 %v839_v33, %v839_v33  ;;  %v1806_v44 = vpack.c.bf16 %v840_v34, %v840_v34  ;;  %v1807_v45 = vpack.c.bf16 %v841_v35, %v841_v35  ;;  %v843_v46 = vmax.f32 %v587_v28, %v715_v36 }
  0x27   : > { %1479 = vst.msk [vmem:[%s2333_s25 + $0x28] sm:$0xf] %vm1468_vm0, %v1804_v38  ;;  %v1808_v48 = vpack.c.bf16 %v842_v39, %v842_v39  ;;  %v453_v49 = vmul.f32 %v1956_v40, %v2300_v0  ;;  %v454_v50 = vmul.f32 %v1957_v41, %v2300_v0  ;;  %v1960_v51 = vunpack.c.l.bf16 %v2186_v37 }
  0x28   : > { %1480 = vst.msk [vmem:[%s2333_s25 + $0x2c] sm:$0xf] %vm1468_vm0, %v1805_v43  ;;  %1481 = vst.msk [vmem:[%s2333_s25 + $0x30] sm:$0xf] %vm1468_vm0, %v1806_v44  ;;  %v1809_v52 = vpack.c.bf16 %v843_v46, %v843_v46  ;;  %v1961_v53 = vunpack.c.h.bf16 %v2186_v37  ;;  %v1964_v54 = vunpack.c.l.bf16 %v2187_v42  ;;  %v1965_v55 = vunpack.c.h.bf16 %v2187_v42  ;;  %v2192_v37 = vld [vmem:[%s2295_s18 + $0x78] sm:$0xff]  }
  0x29   : > { %1482 = vst.msk [vmem:[%s2333_s25 + $0x34] sm:$0xf] %vm1468_vm0, %v1807_v45  ;;  %1483 = vst.msk [vmem:[%s2333_s25 + $0x38] sm:$0xf] %vm1468_vm0, %v1808_v48  ;;  %v588_v56 = vadd.f32 %v2309_v9, %v453_v49  ;;  %v589_v57 = vadd.f32 %v2309_v9, %v454_v50  ;;  %v455_v58 = vmul.f32 %v1960_v51, %v2300_v0  ;;  %v1968_v59 = vunpack.c.l.bf16 %v2188_v47 }
  0x2a   : > { %1484 = vst.msk [vmem:[%s2333_s25 + $0x3c] sm:$0xf] %vm1468_vm0, %v1809_v52  ;;  %v456_v60 = vmul.f32 %v1961_v53, %v2300_v0  ;;  %v457_v61 = vmul.f32 %v1964_v54, %v2300_v0  ;;  %v458_v62 = vmul.f32 %v1965_v55, %v2300_v0  ;;  %v1969_v63 = vunpack.c.h.bf16 %v2188_v47 }
  0x2b   : > { %v716_v1 = vmul.f32 0.1, %v588_v56  ;;  %v717_v2 = vmul.f32 0.1, %v589_v57  ;;  %v590_v3 = vadd.f32 %v2309_v9, %v455_v58  ;;  %v459_v4 = vmul.f32 %v1968_v59, %v2300_v0 }
  0x2c   : > { %v591_v5 = vadd.f32 %v2309_v9, %v456_v60  ;;  %v592_v6 = vadd.f32 %v2309_v9, %v457_v61  ;;  %v593_v7 = vadd.f32 %v2309_v9, %v458_v62  ;;  %v460_v8 = vmul.f32 %v1969_v63, %v2300_v0 }
  0x2d   : > { %v844_v10 = vmax.f32 %v588_v56, %v716_v1  ;;  %v845_v11 = vmax.f32 %v589_v57, %v717_v2  ;;  %v718_v12 = vmul.f32 0.1, %v590_v3  ;;  %v594_v13 = vadd.f32 %v2309_v9, %v459_v4 }
  0x2e   : > { %v719_v15 = vmul.f32 0.1, %v591_v5  ;;  %v720_v16 = vmul.f32 0.1, %v592_v6  ;;  %v721_v17 = vmul.f32 0.1, %v593_v7  ;;  %v595_v18 = vadd.f32 %v2309_v9, %v460_v8 }
  0x2f   : > { %v1810_v19 = vpack.c.bf16 %v844_v10, %v844_v10  ;;  %v1811_v20 = vpack.c.bf16 %v845_v11, %v845_v11  ;;  %v846_v21 = vmax.f32 %v590_v3, %v718_v12  ;;  %v722_v22 = vmul.f32 0.1, %v594_v13  ;;  %v2193_v3 = vld [vmem:[%s2295_s18 + $0x80] sm:$0xff]  }
  0x30   : > { %v847_v23 = vmax.f32 %v591_v5, %v719_v15  ;;  %v848_v24 = vmax.f32 %v592_v6, %v720_v16  ;;  %v849_v25 = vmax.f32 %v593_v7, %v721_v17  ;;  %v723_v26 = vmul.f32 0.1, %v595_v18  ;;  %v2194_v17 = vld [vmem:[%s2295_s18 + $0x88] sm:$0xff]  }
  0x31   : > { %1485 = vst.msk [vmem:[%s2333_s25 + $0x40] sm:$0xf] %vm1468_vm0, %v1810_v19  ;;  %1486 = vst.msk [vmem:[%s2333_s25 + $0x44] sm:$0xf] %vm1468_vm0, %v1811_v20  ;;  %v1812_v28 = vpack.c.bf16 %v846_v21, %v846_v21  ;;  %v850_v29 = vmax.f32 %v594_v13, %v722_v22  ;;  %v1972_v30 = vunpack.c.l.bf16 %v2189_v14  ;;  %v1973_v31 = vunpack.c.h.bf16 %v2189_v14  ;;  %v2195_v22 = vld [vmem:[%s2295_s18 + $0x90] sm:$0xff]  }
  0x32   : > { %v1813_v33 = vpack.c.bf16 %v847_v23, %v847_v23  ;;  %v1814_v34 = vpack.c.bf16 %v848_v24, %v848_v24  ;;  %v1815_v35 = vpack.c.bf16 %v849_v25, %v849_v25  ;;  %v851_v36 = vmax.f32 %v595_v18, %v723_v26 }
  0x33   : > { %1487 = vst.msk [vmem:[%s2333_s25 + $0x48] sm:$0xf] %vm1468_vm0, %v1812_v28  ;;  %v1816_v38 = vpack.c.bf16 %v850_v29, %v850_v29  ;;  %v461_v39 = vmul.f32 %v1972_v30, %v2300_v0  ;;  %v462_v40 = vmul.f32 %v1973_v31, %v2300_v0  ;;  %v1976_v41 = vunpack.c.l.bf16 %v2190_v27 }
  0x34   : > { %1488 = vst.msk [vmem:[%s2333_s25 + $0x4c] sm:$0xf] %vm1468_vm0, %v1813_v33  ;;  %1489 = vst.msk [vmem:[%s2333_s25 + $0x50] sm:$0xf] %vm1468_vm0, %v1814_v34  ;;  %v1817_v42 = vpack.c.bf16 %v851_v36, %v851_v36  ;;  %v1977_v43 = vunpack.c.h.bf16 %v2190_v27  ;;  %v1980_v44 = vunpack.c.l.bf16 %v2191_v32  ;;  %v1981_v45 = vunpack.c.h.bf16 %v2191_v32  ;;  %v2196_v27 = vld [vmem:[%s2295_s18 + $0x98] sm:$0xff]  }
  0x35   : > { %1490 = vst.msk [vmem:[%s2333_s25 + $0x54] sm:$0xf] %vm1468_vm0, %v1815_v35  ;;  %1491 = vst.msk [vmem:[%s2333_s25 + $0x58] sm:$0xf] %vm1468_vm0, %v1816_v38  ;;  %v596_v46 = vadd.f32 %v2309_v9, %v461_v39  ;;  %v597_v47 = vadd.f32 %v2309_v9, %v462_v40  ;;  %v463_v48 = vmul.f32 %v1976_v41, %v2300_v0  ;;  %v1984_v49 = vunpack.c.l.bf16 %v2192_v37 }
  0x36   : > { %1492 = vst.msk [vmem:[%s2333_s25 + $0x5c] sm:$0xf] %vm1468_vm0, %v1817_v42  ;;  %v464_v50 = vmul.f32 %v1977_v43, %v2300_v0  ;;  %v465_v51 = vmul.f32 %v1980_v44, %v2300_v0  ;;  %v466_v52 = vmul.f32 %v1981_v45, %v2300_v0  ;;  %v1985_v53 = vunpack.c.h.bf16 %v2192_v37 }
  0x37   : > { %v724_v54 = vmul.f32 0.1, %v596_v46  ;;  %v725_v55 = vmul.f32 0.1, %v597_v47  ;;  %v598_v56 = vadd.f32 %v2309_v9, %v463_v48  ;;  %v467_v57 = vmul.f32 %v1984_v49, %v2300_v0 }
  0x38   : > { %v599_v58 = vadd.f32 %v2309_v9, %v464_v50  ;;  %v600_v59 = vadd.f32 %v2309_v9, %v465_v51  ;;  %v601_v60 = vadd.f32 %v2309_v9, %v466_v52  ;;  %v468_v61 = vmul.f32 %v1985_v53, %v2300_v0 }
  0x39   : > { %v852_v62 = vmax.f32 %v596_v46, %v724_v54  ;;  %v853_v63 = vmax.f32 %v597_v47, %v725_v55  ;;  %v726_v1 = vmul.f32 0.1, %v598_v56  ;;  %v602_v2 = vadd.f32 %v2309_v9, %v467_v57 }
  0x3a   : > { %v727_v4 = vmul.f32 0.1, %v599_v58  ;;  %v728_v5 = vmul.f32 0.1, %v600_v59  ;;  %v729_v6 = vmul.f32 0.1, %v601_v60  ;;  %v603_v7 = vadd.f32 %v2309_v9, %v468_v61 }
  0x3b   : > { %v1818_v8 = vpack.c.bf16 %v852_v62, %v852_v62  ;;  %v1819_v10 = vpack.c.bf16 %v853_v63, %v853_v63  ;;  %v854_v11 = vmax.f32 %v598_v56, %v726_v1  ;;  %v730_v12 = vmul.f32 0.1, %v602_v2  ;;  %v2197_v56 = vld [vmem:[%s2295_s18 + $0xa0] sm:$0xff]  }
  0x3c   : > { %v855_v13 = vmax.f32 %v599_v58, %v727_v4  ;;  %v856_v14 = vmax.f32 %v600_v59, %v728_v5  ;;  %v857_v15 = vmax.f32 %v601_v60, %v729_v6  ;;  %v731_v16 = vmul.f32 0.1, %v603_v7  ;;  %v2198_v6 = vld [vmem:[%s2295_s18 + $0xa8] sm:$0xff]  }
  0x3d   : > { %1493 = vst.msk [vmem:[%s2333_s25 + $0x60] sm:$0xf] %vm1468_vm0, %v1818_v8  ;;  %1494 = vst.msk [vmem:[%s2333_s25 + $0x64] sm:$0xf] %vm1468_vm0, %v1819_v10  ;;  %v1820_v18 = vpack.c.bf16 %v854_v11, %v854_v11  ;;  %v858_v19 = vmax.f32 %v602_v2, %v730_v12  ;;  %v1988_v20 = vunpack.c.l.bf16 %v2193_v3  ;;  %v1989_v21 = vunpack.c.h.bf16 %v2193_v3  ;;  %v2199_v12 = vld [vmem:[%s2295_s18 + $0xb0] sm:$0xff]  }
  0x3e   : > { %v1821_v23 = vpack.c.bf16 %v855_v13, %v855_v13  ;;  %v1822_v24 = vpack.c.bf16 %v856_v14, %v856_v14  ;;  %v1823_v25 = vpack.c.bf16 %v857_v15, %v857_v15  ;;  %v859_v26 = vmax.f32 %v603_v7, %v731_v16 }
  0x3f   : > { %1495 = vst.msk [vmem:[%s2333_s25 + $0x68] sm:$0xf] %vm1468_vm0, %v1820_v18  ;;  %v1824_v28 = vpack.c.bf16 %v858_v19, %v858_v19  ;;  %v469_v29 = vmul.f32 %v1988_v20, %v2300_v0  ;;  %v470_v30 = vmul.f32 %v1989_v21, %v2300_v0  ;;  %v1992_v31 = vunpack.c.l.bf16 %v2194_v17 }
  0x40   : > { %1496 = vst.msk [vmem:[%s2333_s25 + $0x6c] sm:$0xf] %vm1468_vm0, %v1821_v23  ;;  %1497 = vst.msk [vmem:[%s2333_s25 + $0x70] sm:$0xf] %vm1468_vm0, %v1822_v24  ;;  %v1825_v32 = vpack.c.bf16 %v859_v26, %v859_v26  ;;  %v1993_v33 = vunpack.c.h.bf16 %v2194_v17  ;;  %v1996_v34 = vunpack.c.l.bf16 %v2195_v22  ;;  %v1997_v35 = vunpack.c.h.bf16 %v2195_v22  ;;  %v2200_v17 = vld [vmem:[%s2295_s18 + $0xb8] sm:$0xff]  }
  0x41   : > { %1498 = vst.msk [vmem:[%s2333_s25 + $0x74] sm:$0xf] %vm1468_vm0, %v1823_v25  ;;  %1499 = vst.msk [vmem:[%s2333_s25 + $0x78] sm:$0xf] %vm1468_vm0, %v1824_v28  ;;  %v604_v36 = vadd.f32 %v2309_v9, %v469_v29  ;;  %v605_v37 = vadd.f32 %v2309_v9, %v470_v30  ;;  %v471_v38 = vmul.f32 %v1992_v31, %v2300_v0  ;;  %v2000_v39 = vunpack.c.l.bf16 %v2196_v27 }
  0x42   : > { %1500 = vst.msk [vmem:[%s2333_s25 + $0x7c] sm:$0xf] %vm1468_vm0, %v1825_v32  ;;  %v472_v40 = vmul.f32 %v1993_v33, %v2300_v0  ;;  %v473_v41 = vmul.f32 %v1996_v34, %v2300_v0  ;;  %v474_v42 = vmul.f32 %v1997_v35, %v2300_v0  ;;  %v2001_v43 = vunpack.c.h.bf16 %v2196_v27 }
  0x43   : > { %v732_v44 = vmul.f32 0.1, %v604_v36  ;;  %v733_v45 = vmul.f32 0.1, %v605_v37  ;;  %v606_v46 = vadd.f32 %v2309_v9, %v471_v38  ;;  %v475_v47 = vmul.f32 %v2000_v39, %v2300_v0 }
  0x44   : > { %v607_v48 = vadd.f32 %v2309_v9, %v472_v40  ;;  %v608_v49 = vadd.f32 %v2309_v9, %v473_v41  ;;  %v609_v50 = vadd.f32 %v2309_v9, %v474_v42  ;;  %v476_v51 = vmul.f32 %v2001_v43, %v2300_v0 }
  0x45   : > { %v860_v52 = vmax.f32 %v604_v36, %v732_v44  ;;  %v861_v53 = vmax.f32 %v605_v37, %v733_v45  ;;  %v734_v54 = vmul.f32 0.1, %v606_v46  ;;  %v610_v55 = vadd.f32 %v2309_v9, %v475_v47 }
  0x46   : > { %v735_v57 = vmul.f32 0.1, %v607_v48  ;;  %v736_v58 = vmul.f32 0.1, %v608_v49  ;;  %v737_v59 = vmul.f32 0.1, %v609_v50  ;;  %v611_v60 = vadd.f32 %v2309_v9, %v476_v51 }
  0x47   : > { %v1826_v61 = vpack.c.bf16 %v860_v52, %v860_v52  ;;  %v1827_v62 = vpack.c.bf16 %v861_v53, %v861_v53  ;;  %v862_v63 = vmax.f32 %v606_v46, %v734_v54  ;;  %v738_v1 = vmul.f32 0.1, %v610_v55  ;;  %v2201_v46 = vld [vmem:[%s2295_s18 + $0xc0] sm:$0xff]  }
  0x48   : > { %v863_v2 = vmax.f32 %v607_v48, %v735_v57  ;;  %v864_v3 = vmax.f32 %v608_v49, %v736_v58  ;;  %v865_v4 = vmax.f32 %v609_v50, %v737_v59  ;;  %v739_v5 = vmul.f32 0.1, %v611_v60  ;;  %v2202_v59 = vld [vmem:[%s2295_s18 + $0xc8] sm:$0xff]  }
  0x49   : > { %1501 = vst.msk [vmem:[%s2333_s25 + $0x80] sm:$0xf] %vm1468_vm0, %v1826_v61  ;;  %1502 = vst.msk [vmem:[%s2333_s25 + $0x84] sm:$0xf] %vm1468_vm0, %v1827_v62  ;;  %v1828_v7 = vpack.c.bf16 %v862_v63, %v862_v63  ;;  %v866_v8 = vmax.f32 %v610_v55, %v738_v1  ;;  %v2004_v10 = vunpack.c.l.bf16 %v2197_v56  ;;  %v2005_v11 = vunpack.c.h.bf16 %v2197_v56  ;;  %v2203_v1 = vld [vmem:[%s2295_s18 + $0xd0] sm:$0xff]  }
  0x4a   : > { %v1829_v13 = vpack.c.bf16 %v863_v2, %v863_v2  ;;  %v1830_v14 = vpack.c.bf16 %v864_v3, %v864_v3  ;;  %v1831_v15 = vpack.c.bf16 %v865_v4, %v865_v4  ;;  %v867_v16 = vmax.f32 %v611_v60, %v739_v5 }
  0x4b   : > { %1503 = vst.msk [vmem:[%s2333_s25 + $0x88] sm:$0xf] %vm1468_vm0, %v1828_v7  ;;  %v1832_v18 = vpack.c.bf16 %v866_v8, %v866_v8  ;;  %v477_v19 = vmul.f32 %v2004_v10, %v2300_v0  ;;  %v478_v20 = vmul.f32 %v2005_v11, %v2300_v0  ;;  %v2008_v21 = vunpack.c.l.bf16 %v2198_v6 }
  0x4c   : > { %1504 = vst.msk [vmem:[%s2333_s25 + $0x8c] sm:$0xf] %vm1468_vm0, %v1829_v13  ;;  %1505 = vst.msk [vmem:[%s2333_s25 + $0x90] sm:$0xf] %vm1468_vm0, %v1830_v14  ;;  %v1833_v22 = vpack.c.bf16 %v867_v16, %v867_v16  ;;  %v2009_v23 = vunpack.c.h.bf16 %v2198_v6  ;;  %v2012_v24 = vunpack.c.l.bf16 %v2199_v12  ;;  %v2013_v25 = vunpack.c.h.bf16 %v2199_v12  ;;  %v2204_v6 = vld [vmem:[%s2295_s18 + $0xd8] sm:$0xff]  }
  0x4d   : > { %1506 = vst.msk [vmem:[%s2333_s25 + $0x94] sm:$0xf] %vm1468_vm0, %v1831_v15  ;;  %1507 = vst.msk [vmem:[%s2333_s25 + $0x98] sm:$0xf] %vm1468_vm0, %v1832_v18  ;;  %v612_v26 = vadd.f32 %v2309_v9, %v477_v19  ;;  %v613_v27 = vadd.f32 %v2309_v9, %v478_v20  ;;  %v479_v28 = vmul.f32 %v2008_v21, %v2300_v0  ;;  %v2016_v29 = vunpack.c.l.bf16 %v2200_v17 }
  0x4e   : > { %1508 = vst.msk [vmem:[%s2333_s25 + $0x9c] sm:$0xf] %vm1468_vm0, %v1833_v22  ;;  %v480_v30 = vmul.f32 %v2009_v23, %v2300_v0  ;;  %v481_v31 = vmul.f32 %v2012_v24, %v2300_v0  ;;  %v482_v32 = vmul.f32 %v2013_v25, %v2300_v0  ;;  %v2017_v33 = vunpack.c.h.bf16 %v2200_v17 }
  0x4f   : > { %v740_v34 = vmul.f32 0.1, %v612_v26  ;;  %v741_v35 = vmul.f32 0.1, %v613_v27  ;;  %v614_v36 = vadd.f32 %v2309_v9, %v479_v28  ;;  %v483_v37 = vmul.f32 %v2016_v29, %v2300_v0 }
  0x50   : > { %v615_v38 = vadd.f32 %v2309_v9, %v480_v30  ;;  %v616_v39 = vadd.f32 %v2309_v9, %v481_v31  ;;  %v617_v40 = vadd.f32 %v2309_v9, %v482_v32  ;;  %v484_v41 = vmul.f32 %v2017_v33, %v2300_v0 }
  0x51   : > { %v868_v42 = vmax.f32 %v612_v26, %v740_v34  ;;  %v869_v43 = vmax.f32 %v613_v27, %v741_v35  ;;  %v742_v44 = vmul.f32 0.1, %v614_v36  ;;  %v618_v45 = vadd.f32 %v2309_v9, %v483_v37 }
  0x52   : > { %v743_v47 = vmul.f32 0.1, %v615_v38  ;;  %v744_v48 = vmul.f32 0.1, %v616_v39  ;;  %v745_v49 = vmul.f32 0.1, %v617_v40  ;;  %v619_v50 = vadd.f32 %v2309_v9, %v484_v41 }
  0x53   : > { %v1834_v51 = vpack.c.bf16 %v868_v42, %v868_v42  ;;  %v1835_v52 = vpack.c.bf16 %v869_v43, %v869_v43  ;;  %v870_v53 = vmax.f32 %v614_v36, %v742_v44  ;;  %v746_v54 = vmul.f32 0.1, %v618_v45  ;;  %v2205_v36 = vld [vmem:[%s2295_s18 + $0xe0] sm:$0xff]  }
  0x54   : > { %v871_v55 = vmax.f32 %v615_v38, %v743_v47  ;;  %v872_v56 = vmax.f32 %v616_v39, %v744_v48  ;;  %v873_v57 = vmax.f32 %v617_v40, %v745_v49  ;;  %v747_v58 = vmul.f32 0.1, %v619_v50  ;;  %v2206_v49 = vld [vmem:[%s2295_s18 + $0xe8] sm:$0xff]  }
  0x55   : > { %1509 = vst.msk [vmem:[%s2333_s25 + $0xa0] sm:$0xf] %vm1468_vm0, %v1834_v51  ;;  %1510 = vst.msk [vmem:[%s2333_s25 + $0xa4] sm:$0xf] %vm1468_vm0, %v1835_v52  ;;  %v1836_v60 = vpack.c.bf16 %v870_v53, %v870_v53  ;;  %v874_v61 = vmax.f32 %v618_v45, %v746_v54  ;;  %v2020_v62 = vunpack.c.l.bf16 %v2201_v46  ;;  %v2021_v63 = vunpack.c.h.bf16 %v2201_v46  ;;  %v2207_v54 = vld [vmem:[%s2295_s18 + $0xf0] sm:$0xff]  }
  0x56   : > { %v1837_v2 = vpack.c.bf16 %v871_v55, %v871_v55  ;;  %v1838_v3 = vpack.c.bf16 %v872_v56, %v872_v56  ;;  %v1839_v4 = vpack.c.bf16 %v873_v57, %v873_v57  ;;  %v875_v5 = vmax.f32 %v619_v50, %v747_v58 }
  0x57   : > { %1511 = vst.msk [vmem:[%s2333_s25 + $0xa8] sm:$0xf] %vm1468_vm0, %v1836_v60  ;;  %v1840_v7 = vpack.c.bf16 %v874_v61, %v874_v61  ;;  %v485_v8 = vmul.f32 %v2020_v62, %v2300_v0  ;;  %v486_v10 = vmul.f32 %v2021_v63, %v2300_v0  ;;  %v2024_v11 = vunpack.c.l.bf16 %v2202_v59 }
  0x58   : > { %1512 = vst.msk [vmem:[%s2333_s25 + $0xac] sm:$0xf] %vm1468_vm0, %v1837_v2  ;;  %1513 = vst.msk [vmem:[%s2333_s25 + $0xb0] sm:$0xf] %vm1468_vm0, %v1838_v3  ;;  %v1841_v12 = vpack.c.bf16 %v875_v5, %v875_v5  ;;  %v2025_v13 = vunpack.c.h.bf16 %v2202_v59  ;;  %v2028_v14 = vunpack.c.l.bf16 %v2203_v1  ;;  %v2029_v15 = vunpack.c.h.bf16 %v2203_v1  ;;  %v2208_v59 = vld [vmem:[%s2295_s18 + $0xf8] sm:$0xff]  }
  0x59   : > { %1514 = vst.msk [vmem:[%s2333_s25 + $0xb4] sm:$0xf] %vm1468_vm0, %v1839_v4  ;;  %1515 = vst.msk [vmem:[%s2333_s25 + $0xb8] sm:$0xf] %vm1468_vm0, %v1840_v7  ;;  %v620_v16 = vadd.f32 %v2309_v9, %v485_v8  ;;  %v621_v17 = vadd.f32 %v2309_v9, %v486_v10  ;;  %v487_v18 = vmul.f32 %v2024_v11, %v2300_v0  ;;  %v2032_v19 = vunpack.c.l.bf16 %v2204_v6 }
  0x5a   : > { %1516 = vst.msk [vmem:[%s2333_s25 + $0xbc] sm:$0xf] %vm1468_vm0, %v1841_v12  ;;  %v488_v20 = vmul.f32 %v2025_v13, %v2300_v0  ;;  %v489_v21 = vmul.f32 %v2028_v14, %v2300_v0  ;;  %v490_v22 = vmul.f32 %v2029_v15, %v2300_v0  ;;  %v2033_v23 = vunpack.c.h.bf16 %v2204_v6 }
  0x5b   : > { %v748_v24 = vmul.f32 0.1, %v620_v16  ;;  %v749_v25 = vmul.f32 0.1, %v621_v17  ;;  %v622_v26 = vadd.f32 %v2309_v9, %v487_v18  ;;  %v491_v27 = vmul.f32 %v2032_v19, %v2300_v0 }
  0x5c   : > { %v623_v28 = vadd.f32 %v2309_v9, %v488_v20  ;;  %v624_v29 = vadd.f32 %v2309_v9, %v489_v21  ;;  %v625_v30 = vadd.f32 %v2309_v9, %v490_v22  ;;  %v492_v31 = vmul.f32 %v2033_v23, %v2300_v0 }
  0x5d   : > { %v876_v32 = vmax.f32 %v620_v16, %v748_v24  ;;  %v877_v33 = vmax.f32 %v621_v17, %v749_v25  ;;  %v750_v34 = vmul.f32 0.1, %v622_v26  ;;  %v626_v35 = vadd.f32 %v2309_v9, %v491_v27 }
  0x5e   : > { %v751_v37 = vmul.f32 0.1, %v623_v28  ;;  %v752_v38 = vmul.f32 0.1, %v624_v29  ;;  %v753_v39 = vmul.f32 0.1, %v625_v30  ;;  %v627_v40 = vadd.f32 %v2309_v9, %v492_v31 }
  0x5f   : > { %v1842_v41 = vpack.c.bf16 %v876_v32, %v876_v32  ;;  %v1843_v42 = vpack.c.bf16 %v877_v33, %v877_v33  ;;  %v878_v43 = vmax.f32 %v622_v26, %v750_v34  ;;  %v754_v44 = vmul.f32 0.1, %v626_v35  ;;  %v2209_v26 = vld [vmem:[%s2295_s18 + $0x100] sm:$0xff]  }
  0x60   : > { %v879_v45 = vmax.f32 %v623_v28, %v751_v37  ;;  %v880_v46 = vmax.f32 %v624_v29, %v752_v38  ;;  %v881_v47 = vmax.f32 %v625_v30, %v753_v39  ;;  %v755_v48 = vmul.f32 0.1, %v627_v40  ;;  %v2210_v39 = vld [vmem:[%s2295_s18 + $0x108] sm:$0xff]  }
  0x61   : > { %1517 = vst.msk [vmem:[%s2333_s25 + $0xc0] sm:$0xf] %vm1468_vm0, %v1842_v41  ;;  %1518 = vst.msk [vmem:[%s2333_s25 + $0xc4] sm:$0xf] %vm1468_vm0, %v1843_v42  ;;  %v1844_v50 = vpack.c.bf16 %v878_v43, %v878_v43  ;;  %v882_v51 = vmax.f32 %v626_v35, %v754_v44  ;;  %v2036_v52 = vunpack.c.l.bf16 %v2205_v36  ;;  %v2037_v53 = vunpack.c.h.bf16 %v2205_v36  ;;  %v2211_v44 = vld [vmem:[%s2295_s18 + $0x110] sm:$0xff]  }
  0x62   : > { %v1845_v55 = vpack.c.bf16 %v879_v45, %v879_v45  ;;  %v1846_v56 = vpack.c.bf16 %v880_v46, %v880_v46  ;;  %v1847_v57 = vpack.c.bf16 %v881_v47, %v881_v47  ;;  %v883_v58 = vmax.f32 %v627_v40, %v755_v48 }
  0x63   : > { %1519 = vst.msk [vmem:[%s2333_s25 + $0xc8] sm:$0xf] %vm1468_vm0, %v1844_v50  ;;  %v1848_v60 = vpack.c.bf16 %v882_v51, %v882_v51  ;;  %v493_v61 = vmul.f32 %v2036_v52, %v2300_v0  ;;  %v494_v62 = vmul.f32 %v2037_v53, %v2300_v0  ;;  %v2040_v63 = vunpack.c.l.bf16 %v2206_v49 }
  0x64   : > { %1520 = vst.msk [vmem:[%s2333_s25 + $0xcc] sm:$0xf] %vm1468_vm0, %v1845_v55  ;;  %1521 = vst.msk [vmem:[%s2333_s25 + $0xd0] sm:$0xf] %vm1468_vm0, %v1846_v56  ;;  %v1849_v1 = vpack.c.bf16 %v883_v58, %v883_v58  ;;  %v2041_v2 = vunpack.c.h.bf16 %v2206_v49  ;;  %v2044_v3 = vunpack.c.l.bf16 %v2207_v54  ;;  %v2045_v4 = vunpack.c.h.bf16 %v2207_v54  ;;  %v2212_v49 = vld [vmem:[%s2295_s18 + $0x118] sm:$0xff]  }
  0x65   : > { %1522 = vst.msk [vmem:[%s2333_s25 + $0xd4] sm:$0xf] %vm1468_vm0, %v1847_v57  ;;  %1523 = vst.msk [vmem:[%s2333_s25 + $0xd8] sm:$0xf] %vm1468_vm0, %v1848_v60  ;;  %v628_v5 = vadd.f32 %v2309_v9, %v493_v61  ;;  %v629_v6 = vadd.f32 %v2309_v9, %v494_v62  ;;  %v495_v7 = vmul.f32 %v2040_v63, %v2300_v0  ;;  %v2048_v8 = vunpack.c.l.bf16 %v2208_v59 }
  0x66   : > { %1524 = vst.msk [vmem:[%s2333_s25 + $0xdc] sm:$0xf] %vm1468_vm0, %v1849_v1  ;;  %v496_v10 = vmul.f32 %v2041_v2, %v2300_v0  ;;  %v497_v11 = vmul.f32 %v2044_v3, %v2300_v0  ;;  %v498_v12 = vmul.f32 %v2045_v4, %v2300_v0  ;;  %v2049_v13 = vunpack.c.h.bf16 %v2208_v59 }
  0x67   : > { %v756_v14 = vmul.f32 0.1, %v628_v5  ;;  %v757_v15 = vmul.f32 0.1, %v629_v6  ;;  %v630_v16 = vadd.f32 %v2309_v9, %v495_v7  ;;  %v499_v17 = vmul.f32 %v2048_v8, %v2300_v0 }
  0x68   : > { %v631_v18 = vadd.f32 %v2309_v9, %v496_v10  ;;  %v632_v19 = vadd.f32 %v2309_v9, %v497_v11  ;;  %v633_v20 = vadd.f32 %v2309_v9, %v498_v12  ;;  %v500_v21 = vmul.f32 %v2049_v13, %v2300_v0 }
  0x69   : > { %v884_v22 = vmax.f32 %v628_v5, %v756_v14  ;;  %v885_v23 = vmax.f32 %v629_v6, %v757_v15  ;;  %v758_v24 = vmul.f32 0.1, %v630_v16  ;;  %v634_v25 = vadd.f32 %v2309_v9, %v499_v17 }
  0x6a   : > { %v759_v27 = vmul.f32 0.1, %v631_v18  ;;  %v760_v28 = vmul.f32 0.1, %v632_v19  ;;  %v761_v29 = vmul.f32 0.1, %v633_v20  ;;  %v635_v30 = vadd.f32 %v2309_v9, %v500_v21 }
  0x6b   : > { %v1850_v31 = vpack.c.bf16 %v884_v22, %v884_v22  ;;  %v1851_v32 = vpack.c.bf16 %v885_v23, %v885_v23  ;;  %v886_v33 = vmax.f32 %v630_v16, %v758_v24  ;;  %v762_v34 = vmul.f32 0.1, %v634_v25  ;;  %v2213_v16 = vld [vmem:[%s2295_s18 + $0x120] sm:$0xff]  }
  0x6c   : > { %v887_v35 = vmax.f32 %v631_v18, %v759_v27  ;;  %v888_v36 = vmax.f32 %v632_v19, %v760_v28  ;;  %v889_v37 = vmax.f32 %v633_v20, %v761_v29  ;;  %v763_v38 = vmul.f32 0.1, %v635_v30  ;;  %v2214_v28 = vld [vmem:[%s2295_s18 + $0x128] sm:$0xff]  }
  0x6d   : > { %1525 = vst.msk [vmem:[%s2333_s25 + $0xe0] sm:$0xf] %vm1468_vm0, %v1850_v31  ;;  %1526 = vst.msk [vmem:[%s2333_s25 + $0xe4] sm:$0xf] %vm1468_vm0, %v1851_v32  ;;  %v1852_v40 = vpack.c.bf16 %v886_v33, %v886_v33  ;;  %v890_v41 = vmax.f32 %v634_v25, %v762_v34  ;;  %v2052_v42 = vunpack.c.l.bf16 %v2209_v26  ;;  %v2053_v43 = vunpack.c.h.bf16 %v2209_v26  ;;  %v2215_v32 = vld [vmem:[%s2295_s18 + $0x130] sm:$0xff]  }
  0x6e   : > { %v1853_v45 = vpack.c.bf16 %v887_v35, %v887_v35  ;;  %v1854_v46 = vpack.c.bf16 %v888_v36, %v888_v36  ;;  %v1855_v47 = vpack.c.bf16 %v889_v37, %v889_v37  ;;  %v891_v48 = vmax.f32 %v635_v30, %v763_v38  ;;  %v2216_v37 = vld [vmem:[%s2295_s18 + $0x138] sm:$0xff]  }
  0x6f   : > { %1527 = vst.msk [vmem:[%s2333_s25 + $0xe8] sm:$0xf] %vm1468_vm0, %v1852_v40  ;;  %v1856_v50 = vpack.c.bf16 %v890_v41, %v890_v41  ;;  %v501_v51 = vmul.f32 %v2052_v42, %v2300_v0  ;;  %v502_v52 = vmul.f32 %v2053_v43, %v2300_v0  ;;  %v2056_v53 = vunpack.c.l.bf16 %v2210_v39 }
  0x70   : > { %1528 = vst.msk [vmem:[%s2333_s25 + $0xec] sm:$0xf] %vm1468_vm0, %v1853_v45  ;;  %1529 = vst.msk [vmem:[%s2333_s25 + $0xf0] sm:$0xf] %vm1468_vm0, %v1854_v46  ;;  %v1857_v54 = vpack.c.bf16 %v891_v48, %v891_v48  ;;  %v2057_v55 = vunpack.c.h.bf16 %v2210_v39  ;;  %v2060_v56 = vunpack.c.l.bf16 %v2211_v44  ;;  %v2061_v57 = vunpack.c.h.bf16 %v2211_v44  ;;  %v2635_v39 = vld [vmem:[%s2904_s1] ss:$0 sm:$0xff] }
  0x71   : > { %1530 = vst.msk [vmem:[%s2333_s25 + $0xf4] sm:$0xf] %vm1468_vm0, %v1855_v47  ;;  %1531 = vst.msk [vmem:[%s2333_s25 + $0xf8] sm:$0xf] %vm1468_vm0, %v1856_v50  ;;  %v636_v58 = vadd.f32 %v2309_v9, %v501_v51  ;;  %v637_v59 = vadd.f32 %v2309_v9, %v502_v52  ;;  %v503_v60 = vmul.f32 %v2056_v53, %v2300_v0  ;;  %v2064_v61 = vunpack.c.l.bf16 %v2212_v49  ;;  %v2650_v47 = vld [vmem:[%s2905_s2] ss:$0 sm:$0xff] }
  0x72   : > { %1532 = vst.msk [vmem:[%s2333_s25 + $0xfc] sm:$0xf] %vm1468_vm0, %v1857_v54  ;;  %v504_v62 = vmul.f32 %v2057_v55, %v2300_v0  ;;  %v505_v63 = vmul.f32 %v2060_v56, %v2300_v0  ;;  %v506_v1 = vmul.f32 %v2061_v57, %v2300_v0  ;;  %v2065_v2 = vunpack.c.h.bf16 %v2212_v49 }
  0x73   : > { %v764_v3 = vmul.f32 0.1, %v636_v58  ;;  %v765_v4 = vmul.f32 0.1, %v637_v59  ;;  %v638_v5 = vadd.f32 %v2309_v9, %v503_v60  ;;  %v507_v6 = vmul.f32 %v2064_v61, %v2300_v0 }
  0x74   : > { %v639_v7 = vadd.f32 %v2309_v9, %v504_v62  ;;  %v640_v8 = vadd.f32 %v2309_v9, %v505_v63  ;;  %v641_v10 = vadd.f32 %v2309_v9, %v506_v1  ;;  %v508_v11 = vmul.f32 %v2065_v2, %v2300_v0 }
  0x75   : > { %v892_v12 = vmax.f32 %v636_v58, %v764_v3  ;;  %v893_v13 = vmax.f32 %v637_v59, %v765_v4  ;;  %v766_v14 = vmul.f32 0.1, %v638_v5  ;;  %v642_v15 = vadd.f32 %v2309_v9, %v507_v6 }
  0x76   : > { %v767_v17 = vmul.f32 0.1, %v639_v7  ;;  %v768_v18 = vmul.f32 0.1, %v640_v8  ;;  %v769_v19 = vmul.f32 0.1, %v641_v10  ;;  %v643_v20 = vadd.f32 %v2309_v9, %v508_v11 }
  0x77   : > { %v1858_v21 = vpack.c.bf16 %v892_v12, %v892_v12  ;;  %v1859_v22 = vpack.c.bf16 %v893_v13, %v893_v13  ;;  %v894_v23 = vmax.f32 %v638_v5, %v766_v14  ;;  %v770_v24 = vmul.f32 0.1, %v642_v15  ;;  %v2217_v5 = vld [vmem:[%s2295_s18 + $0x140] sm:$0xff]  }
  0x78   : > { %v895_v0 = vmax.f32 %v639_v7, %v767_v17  ;;  %v896_v25 = vmax.f32 %v640_v8, %v768_v18  ;;  %v897_v26 = vmax.f32 %v641_v10, %v769_v19  ;;  %v771_v27 = vmul.f32 0.1, %v643_v20  ;;  %v2218_v19 = vld [vmem:[%s2295_s18 + $0x148] sm:$0xff]  }
  0x79   : > { %1533 = vst.msk [vmem:[%s2333_s25 + $0x100] sm:$0xf] %vm1468_vm0, %v1858_v21  ;;  %1534 = vst.msk [vmem:[%s2333_s25 + $0x104] sm:$0xf] %vm1468_vm0, %v1859_v22  ;;  %v1860_v29 = vpack.c.bf16 %v894_v23, %v894_v23  ;;  %v898_v30 = vmax.f32 %v642_v15, %v770_v24  ;;  %v2068_v9 = vunpack.c.l.bf16 %v2213_v16  ;;  %v2069_v31 = vunpack.c.h.bf16 %v2213_v16  ;;  %v2219_v24 = vld [vmem:[%s2295_s18 + $0x150] sm:$0xff]  }
  0x7a   : > { %v1861_v33 = vpack.c.bf16 %v895_v0, %v895_v0  ;;  %v1862_v34 = vpack.c.bf16 %v896_v25, %v896_v25  ;;  %v1863_v35 = vpack.c.bf16 %v897_v26, %v897_v26  ;;  %v899_v36 = vmax.f32 %v643_v20, %v771_v27 }
  0x7b   : > { %1535 = vst.msk [vmem:[%s2333_s25 + $0x108] sm:$0xf] %vm1468_vm0, %v1860_v29  ;;  %v1864_v38 = vpack.c.bf16 %v898_v30, %v898_v30  ;;  %v509_v40 = vmul.f32 %v2635_v39, %v2068_v9  ;;  %v510_v41 = vmul.f32 %v2635_v39, %v2069_v31  ;;  %v2072_v42 = vunpack.c.l.bf16 %v2214_v28 }
  0x7c   : > { %1536 = vst.msk [vmem:[%s2333_s25 + $0x10c] sm:$0xf] %vm1468_vm0, %v1861_v33  ;;  %1537 = vst.msk [vmem:[%s2333_s25 + $0x110] sm:$0xf] %vm1468_vm0, %v1862_v34  ;;  %v1865_v43 = vpack.c.bf16 %v899_v36, %v899_v36  ;;  %v2073_v44 = vunpack.c.h.bf16 %v2214_v28  ;;  %v2076_v45 = vunpack.c.l.bf16 %v2215_v32  ;;  %v2077_v46 = vunpack.c.h.bf16 %v2215_v32  ;;  %v2220_v28 = vld [vmem:[%s2295_s18 + $0x158] sm:$0xff]  }
  0x7d   : > { %1538 = vst.msk [vmem:[%s2333_s25 + $0x114] sm:$0xf] %vm1468_vm0, %v1863_v35  ;;  %1539 = vst.msk [vmem:[%s2333_s25 + $0x118] sm:$0xf] %vm1468_vm0, %v1864_v38  ;;  %v644_v48 = vadd.f32 %v2650_v47, %v509_v40  ;;  %v645_v49 = vadd.f32 %v2650_v47, %v510_v41  ;;  %v511_v50 = vmul.f32 %v2635_v39, %v2072_v42  ;;  %v2080_v51 = vunpack.c.l.bf16 %v2216_v37 }
  0x7e   : > { %1540 = vst.msk [vmem:[%s2333_s25 + $0x11c] sm:$0xf] %vm1468_vm0, %v1865_v43  ;;  %v512_v52 = vmul.f32 %v2635_v39, %v2073_v44  ;;  %v513_v53 = vmul.f32 %v2635_v39, %v2076_v45  ;;  %v514_v54 = vmul.f32 %v2635_v39, %v2077_v46  ;;  %v2081_v55 = vunpack.c.h.bf16 %v2216_v37 }
  0x7f   : > { %v772_v56 = vmul.f32 0.1, %v644_v48  ;;  %v773_v57 = vmul.f32 0.1, %v645_v49  ;;  %v646_v58 = vadd.f32 %v2650_v47, %v511_v50  ;;  %v515_v59 = vmul.f32 %v2635_v39, %v2080_v51 }
  0x80   : > { %v647_v60 = vadd.f32 %v2650_v47, %v512_v52  ;;  %v648_v61 = vadd.f32 %v2650_v47, %v513_v53  ;;  %v649_v62 = vadd.f32 %v2650_v47, %v514_v54  ;;  %v516_v63 = vmul.f32 %v2635_v39, %v2081_v55 }
  0x81   : > { %v900_v1 = vmax.f32 %v644_v48, %v772_v56  ;;  %v901_v2 = vmax.f32 %v645_v49, %v773_v57  ;;  %v774_v3 = vmul.f32 0.1, %v646_v58  ;;  %v650_v4 = vadd.f32 %v2650_v47, %v515_v59 }
  0x82   : > { %v775_v6 = vmul.f32 0.1, %v647_v60  ;;  %v776_v7 = vmul.f32 0.1, %v648_v61  ;;  %v777_v8 = vmul.f32 0.1, %v649_v62  ;;  %v651_v10 = vadd.f32 %v2650_v47, %v516_v63 }
  0x83   : > { %v1866_v11 = vpack.c.bf16 %v900_v1, %v900_v1  ;;  %v1867_v12 = vpack.c.bf16 %v901_v2, %v901_v2  ;;  %v902_v13 = vmax.f32 %v646_v58, %v774_v3  ;;  %v778_v14 = vmul.f32 0.1, %v650_v4  ;;  %v2221_v58 = vld [vmem:[%s2295_s18 + $0x160] sm:$0xff]  }
  0x84   : > { %v903_v15 = vmax.f32 %v647_v60, %v775_v6  ;;  %v904_v16 = vmax.f32 %v648_v61, %v776_v7  ;;  %v905_v17 = vmax.f32 %v649_v62, %v777_v8  ;;  %v779_v18 = vmul.f32 0.1, %v651_v10  ;;  %v2222_v8 = vld [vmem:[%s2295_s18 + $0x168] sm:$0xff]  }
  0x85   : > { %1541 = vst.msk [vmem:[%s2333_s25 + $0x120] sm:$0xf] %vm1468_vm0, %v1866_v11  ;;  %1542 = vst.msk [vmem:[%s2333_s25 + $0x124] sm:$0xf] %vm1468_vm0, %v1867_v12  ;;  %v1868_v20 = vpack.c.bf16 %v902_v13, %v902_v13  ;;  %v906_v21 = vmax.f32 %v650_v4, %v778_v14  ;;  %v2084_v22 = vunpack.c.l.bf16 %v2217_v5  ;;  %v2085_v23 = vunpack.c.h.bf16 %v2217_v5  ;;  %v2223_v14 = vld [vmem:[%s2295_s18 + $0x170] sm:$0xff]  }
  0x86   : > { %v1869_v0 = vpack.c.bf16 %v903_v15, %v903_v15  ;;  %v1870_v25 = vpack.c.bf16 %v904_v16, %v904_v16  ;;  %v1871_v26 = vpack.c.bf16 %v905_v17, %v905_v17  ;;  %v907_v27 = vmax.f32 %v651_v10, %v779_v18 }
  0x87   : > { %1543 = vst.msk [vmem:[%s2333_s25 + $0x128] sm:$0xf] %vm1468_vm0, %v1868_v20  ;;  %v1872_v29 = vpack.c.bf16 %v906_v21, %v906_v21  ;;  %v517_v30 = vmul.f32 %v2635_v39, %v2084_v22  ;;  %v518_v9 = vmul.f32 %v2635_v39, %v2085_v23  ;;  %v2088_v31 = vunpack.c.l.bf16 %v2218_v19 }
  0x88   : > { %1544 = vst.msk [vmem:[%s2333_s25 + $0x12c] sm:$0xf] %vm1468_vm0, %v1869_v0  ;;  %1545 = vst.msk [vmem:[%s2333_s25 + $0x130] sm:$0xf] %vm1468_vm0, %v1870_v25  ;;  %v1873_v32 = vpack.c.bf16 %v907_v27, %v907_v27  ;;  %v2089_v33 = vunpack.c.h.bf16 %v2218_v19  ;;  %v2092_v34 = vunpack.c.l.bf16 %v2219_v24  ;;  %v2093_v35 = vunpack.c.h.bf16 %v2219_v24  ;;  %v2224_v19 = vld [vmem:[%s2295_s18 + $0x178] sm:$0xff]  }
  0x89   : > { %1546 = vst.msk [vmem:[%s2333_s25 + $0x134] sm:$0xf] %vm1468_vm0, %v1871_v26  ;;  %1547 = vst.msk [vmem:[%s2333_s25 + $0x138] sm:$0xf] %vm1468_vm0, %v1872_v29  ;;  %v652_v36 = vadd.f32 %v2650_v47, %v517_v30  ;;  %v653_v37 = vadd.f32 %v2650_v47, %v518_v9  ;;  %v519_v38 = vmul.f32 %v2635_v39, %v2088_v31  ;;  %v2096_v40 = vunpack.c.l.bf16 %v2220_v28 }
  0x8a   : > { %1548 = vst.msk [vmem:[%s2333_s25 + $0x13c] sm:$0xf] %vm1468_vm0, %v1873_v32  ;;  %v520_v41 = vmul.f32 %v2635_v39, %v2089_v33  ;;  %v521_v42 = vmul.f32 %v2635_v39, %v2092_v34  ;;  %v522_v43 = vmul.f32 %v2635_v39, %v2093_v35  ;;  %v2097_v44 = vunpack.c.h.bf16 %v2220_v28 }
  0x8b   : > { %v780_v45 = vmul.f32 0.1, %v652_v36  ;;  %v781_v46 = vmul.f32 0.1, %v653_v37  ;;  %v654_v48 = vadd.f32 %v2650_v47, %v519_v38  ;;  %v523_v49 = vmul.f32 %v2635_v39, %v2096_v40 }
  0x8c   : > { %v655_v50 = vadd.f32 %v2650_v47, %v520_v41  ;;  %v656_v51 = vadd.f32 %v2650_v47, %v521_v42  ;;  %v657_v52 = vadd.f32 %v2650_v47, %v522_v43  ;;  %v524_v53 = vmul.f32 %v2635_v39, %v2097_v44 }
  0x8d   : > { %v908_v54 = vmax.f32 %v652_v36, %v780_v45  ;;  %v909_v55 = vmax.f32 %v653_v37, %v781_v46  ;;  %v782_v56 = vmul.f32 0.1, %v654_v48  ;;  %v658_v57 = vadd.f32 %v2650_v47, %v523_v49 }
  0x8e   : > { %v783_v59 = vmul.f32 0.1, %v655_v50  ;;  %v784_v60 = vmul.f32 0.1, %v656_v51  ;;  %v785_v61 = vmul.f32 0.1, %v657_v52  ;;  %v659_v62 = vadd.f32 %v2650_v47, %v524_v53 }
  0x8f   : > { %v1874_v63 = vpack.c.bf16 %v908_v54, %v908_v54  ;;  %v1875_v1 = vpack.c.bf16 %v909_v55, %v909_v55  ;;  %v910_v2 = vmax.f32 %v654_v48, %v782_v56  ;;  %v786_v3 = vmul.f32 0.1, %v658_v57  ;;  %v2225_v48 = vld [vmem:[%s2295_s18 + $0x180] sm:$0xff]  }
  0x90   : > { %v911_v4 = vmax.f32 %v655_v50, %v783_v59  ;;  %v912_v5 = vmax.f32 %v656_v51, %v784_v60  ;;  %v913_v6 = vmax.f32 %v657_v52, %v785_v61  ;;  %v787_v7 = vmul.f32 0.1, %v659_v62  ;;  %v2226_v61 = vld [vmem:[%s2295_s18 + $0x188] sm:$0xff]  }
  0x91   : > { %1549 = vst.msk [vmem:[%s2333_s25 + $0x140] sm:$0xf] %vm1468_vm0, %v1874_v63  ;;  %1550 = vst.msk [vmem:[%s2333_s25 + $0x144] sm:$0xf] %vm1468_vm0, %v1875_v1  ;;  %v1876_v10 = vpack.c.bf16 %v910_v2, %v910_v2  ;;  %v914_v11 = vmax.f32 %v658_v57, %v786_v3  ;;  %v2100_v12 = vunpack.c.l.bf16 %v2221_v58  ;;  %v2101_v13 = vunpack.c.h.bf16 %v2221_v58  ;;  %v2227_v3 = vld [vmem:[%s2295_s18 + $0x190] sm:$0xff]  }
  0x92   : > { %v1877_v15 = vpack.c.bf16 %v911_v4, %v911_v4  ;;  %v1878_v16 = vpack.c.bf16 %v912_v5, %v912_v5  ;;  %v1879_v17 = vpack.c.bf16 %v913_v6, %v913_v6  ;;  %v915_v18 = vmax.f32 %v659_v62, %v787_v7 }
  0x93   : > { %1551 = vst.msk [vmem:[%s2333_s25 + $0x148] sm:$0xf] %vm1468_vm0, %v1876_v10  ;;  %v1880_v20 = vpack.c.bf16 %v914_v11, %v914_v11  ;;  %v525_v21 = vmul.f32 %v2635_v39, %v2100_v12  ;;  %v526_v22 = vmul.f32 %v2635_v39, %v2101_v13  ;;  %v2104_v23 = vunpack.c.l.bf16 %v2222_v8 }
  0x94   : > { %1552 = vst.msk [vmem:[%s2333_s25 + $0x14c] sm:$0xf] %vm1468_vm0, %v1877_v15  ;;  %1553 = vst.msk [vmem:[%s2333_s25 + $0x150] sm:$0xf] %vm1468_vm0, %v1878_v16  ;;  %v1881_v24 = vpack.c.bf16 %v915_v18, %v915_v18  ;;  %v2105_v0 = vunpack.c.h.bf16 %v2222_v8  ;;  %v2108_v25 = vunpack.c.l.bf16 %v2223_v14  ;;  %v2109_v26 = vunpack.c.h.bf16 %v2223_v14  ;;  %v2228_v8 = vld [vmem:[%s2295_s18 + $0x198] sm:$0xff]  }
  0x95   : > { %1554 = vst.msk [vmem:[%s2333_s25 + $0x154] sm:$0xf] %vm1468_vm0, %v1879_v17  ;;  %1555 = vst.msk [vmem:[%s2333_s25 + $0x158] sm:$0xf] %vm1468_vm0, %v1880_v20  ;;  %v660_v27 = vadd.f32 %v2650_v47, %v525_v21  ;;  %v661_v28 = vadd.f32 %v2650_v47, %v526_v22  ;;  %v527_v29 = vmul.f32 %v2635_v39, %v2104_v23  ;;  %v2112_v30 = vunpack.c.l.bf16 %v2224_v19 }
  0x96   : > { %1556 = vst.msk [vmem:[%s2333_s25 + $0x15c] sm:$0xf] %vm1468_vm0, %v1881_v24  ;;  %v528_v9 = vmul.f32 %v2635_v39, %v2105_v0  ;;  %v529_v31 = vmul.f32 %v2635_v39, %v2108_v25  ;;  %v530_v32 = vmul.f32 %v2635_v39, %v2109_v26  ;;  %v2113_v33 = vunpack.c.h.bf16 %v2224_v19 }
  0x97   : > { %v788_v34 = vmul.f32 0.1, %v660_v27  ;;  %v789_v35 = vmul.f32 0.1, %v661_v28  ;;  %v662_v36 = vadd.f32 %v2650_v47, %v527_v29  ;;  %v531_v37 = vmul.f32 %v2635_v39, %v2112_v30 }
  0x98   : > { %v663_v38 = vadd.f32 %v2650_v47, %v528_v9  ;;  %v664_v40 = vadd.f32 %v2650_v47, %v529_v31  ;;  %v665_v41 = vadd.f32 %v2650_v47, %v530_v32  ;;  %v532_v42 = vmul.f32 %v2635_v39, %v2113_v33 }
  0x99   : > { %v916_v43 = vmax.f32 %v660_v27, %v788_v34  ;;  %v917_v44 = vmax.f32 %v661_v28, %v789_v35  ;;  %v790_v45 = vmul.f32 0.1, %v662_v36  ;;  %v666_v46 = vadd.f32 %v2650_v47, %v531_v37 }
  0x9a   : > { %v791_v49 = vmul.f32 0.1, %v663_v38  ;;  %v792_v50 = vmul.f32 0.1, %v664_v40  ;;  %v793_v51 = vmul.f32 0.1, %v665_v41  ;;  %v667_v52 = vadd.f32 %v2650_v47, %v532_v42 }
  0x9b   : > { %v1882_v53 = vpack.c.bf16 %v916_v43, %v916_v43  ;;  %v1883_v54 = vpack.c.bf16 %v917_v44, %v917_v44  ;;  %v918_v55 = vmax.f32 %v662_v36, %v790_v45  ;;  %v794_v56 = vmul.f32 0.1, %v666_v46  ;;  %v2229_v36 = vld [vmem:[%s2295_s18 + $0x1a0] sm:$0xff]  }
  0x9c   : > { %v919_v57 = vmax.f32 %v663_v38, %v791_v49  ;;  %v920_v58 = vmax.f32 %v664_v40, %v792_v50  ;;  %v921_v59 = vmax.f32 %v665_v41, %v793_v51  ;;  %v795_v60 = vmul.f32 0.1, %v667_v52  ;;  %v2230_v51 = vld [vmem:[%s2295_s18 + $0x1a8] sm:$0xff]  }
  0x9d   : > { %1557 = vst.msk [vmem:[%s2333_s25 + $0x160] sm:$0xf] %vm1468_vm0, %v1882_v53  ;;  %1558 = vst.msk [vmem:[%s2333_s25 + $0x164] sm:$0xf] %vm1468_vm0, %v1883_v54  ;;  %v1884_v62 = vpack.c.bf16 %v918_v55, %v918_v55  ;;  %v922_v63 = vmax.f32 %v666_v46, %v794_v56  ;;  %v2116_v1 = vunpack.c.l.bf16 %v2225_v48  ;;  %v2117_v2 = vunpack.c.h.bf16 %v2225_v48  ;;  %v2231_v56 = vld [vmem:[%s2295_s18 + $0x1b0] sm:$0xff]  }
  0x9e   : > { %v1885_v4 = vpack.c.bf16 %v919_v57, %v919_v57  ;;  %v1886_v5 = vpack.c.bf16 %v920_v58, %v920_v58  ;;  %v1887_v6 = vpack.c.bf16 %v921_v59, %v921_v59  ;;  %v923_v7 = vmax.f32 %v667_v52, %v795_v60 }
  0x9f   : > { %1559 = vst.msk [vmem:[%s2333_s25 + $0x168] sm:$0xf] %vm1468_vm0, %v1884_v62  ;;  %v1888_v10 = vpack.c.bf16 %v922_v63, %v922_v63  ;;  %v533_v11 = vmul.f32 %v2635_v39, %v2116_v1  ;;  %v534_v12 = vmul.f32 %v2635_v39, %v2117_v2  ;;  %v2120_v13 = vunpack.c.l.bf16 %v2226_v61 }
  0xa0   : > { %1560 = vst.msk [vmem:[%s2333_s25 + $0x16c] sm:$0xf] %vm1468_vm0, %v1885_v4  ;;  %1561 = vst.msk [vmem:[%s2333_s25 + $0x170] sm:$0xf] %vm1468_vm0, %v1886_v5  ;;  %v1889_v14 = vpack.c.bf16 %v923_v7, %v923_v7  ;;  %v2121_v15 = vunpack.c.h.bf16 %v2226_v61  ;;  %v2124_v16 = vunpack.c.l.bf16 %v2227_v3  ;;  %v2125_v17 = vunpack.c.h.bf16 %v2227_v3  ;;  %v2232_v61 = vld [vmem:[%s2295_s18 + $0x1b8] sm:$0xff]  }
  0xa1   : > { %1562 = vst.msk [vmem:[%s2333_s25 + $0x174] sm:$0xf] %vm1468_vm0, %v1887_v6  ;;  %1563 = vst.msk [vmem:[%s2333_s25 + $0x178] sm:$0xf] %vm1468_vm0, %v1888_v10  ;;  %v668_v18 = vadd.f32 %v2650_v47, %v533_v11  ;;  %v669_v19 = vadd.f32 %v2650_v47, %v534_v12  ;;  %v535_v20 = vmul.f32 %v2635_v39, %v2120_v13  ;;  %v2128_v21 = vunpack.c.l.bf16 %v2228_v8 }
  0xa2   : > { %1564 = vst.msk [vmem:[%s2333_s25 + $0x17c] sm:$0xf] %vm1468_vm0, %v1889_v14  ;;  %v536_v22 = vmul.f32 %v2635_v39, %v2121_v15  ;;  %v537_v23 = vmul.f32 %v2635_v39, %v2124_v16  ;;  %v538_v24 = vmul.f32 %v2635_v39, %v2125_v17  ;;  %v2129_v0 = vunpack.c.h.bf16 %v2228_v8 }
  0xa3   : > { %v796_v25 = vmul.f32 0.1, %v668_v18  ;;  %v797_v26 = vmul.f32 0.1, %v669_v19  ;;  %v670_v27 = vadd.f32 %v2650_v47, %v535_v20  ;;  %v539_v28 = vmul.f32 %v2635_v39, %v2128_v21 }
  0xa4   : > { %v671_v29 = vadd.f32 %v2650_v47, %v536_v22  ;;  %v672_v30 = vadd.f32 %v2650_v47, %v537_v23  ;;  %v673_v9 = vadd.f32 %v2650_v47, %v538_v24  ;;  %v540_v31 = vmul.f32 %v2635_v39, %v2129_v0 }
  0xa5   : > { %v924_v32 = vmax.f32 %v668_v18, %v796_v25  ;;  %v925_v33 = vmax.f32 %v669_v19, %v797_v26  ;;  %v798_v34 = vmul.f32 0.1, %v670_v27  ;;  %v674_v35 = vadd.f32 %v2650_v47, %v539_v28 }
  0xa6   : > { %v799_v37 = vmul.f32 0.1, %v671_v29  ;;  %v800_v38 = vmul.f32 0.1, %v672_v30  ;;  %v801_v40 = vmul.f32 0.1, %v673_v9  ;;  %v675_v41 = vadd.f32 %v2650_v47, %v540_v31 }
  0xa7   : > { %v1890_v42 = vpack.c.bf16 %v924_v32, %v924_v32  ;;  %v1891_v43 = vpack.c.bf16 %v925_v33, %v925_v33  ;;  %v926_v44 = vmax.f32 %v670_v27, %v798_v34  ;;  %v802_v45 = vmul.f32 0.1, %v674_v35  ;;  %v2233_v27 = vld [vmem:[%s2295_s18 + $0x1c0] sm:$0xff]  }
  0xa8   : > { %v927_v46 = vmax.f32 %v671_v29, %v799_v37  ;;  %v928_v48 = vmax.f32 %v672_v30, %v800_v38  ;;  %v929_v49 = vmax.f32 %v673_v9, %v801_v40  ;;  %v803_v50 = vmul.f32 0.1, %v675_v41  ;;  %v2234_v40 = vld [vmem:[%s2295_s18 + $0x1c8] sm:$0xff]  }
  0xa9   : > { %1565 = vst.msk [vmem:[%s2333_s25 + $0x180] sm:$0xf] %vm1468_vm0, %v1890_v42  ;;  %1566 = vst.msk [vmem:[%s2333_s25 + $0x184] sm:$0xf] %vm1468_vm0, %v1891_v43  ;;  %v1892_v52 = vpack.c.bf16 %v926_v44, %v926_v44  ;;  %v930_v53 = vmax.f32 %v674_v35, %v802_v45  ;;  %v2132_v54 = vunpack.c.l.bf16 %v2229_v36  ;;  %v2133_v55 = vunpack.c.h.bf16 %v2229_v36  ;;  %v2235_v45 = vld [vmem:[%s2295_s18 + $0x1d0] sm:$0xff]  }
  0xaa   : > { %v1893_v57 = vpack.c.bf16 %v927_v46, %v927_v46  ;;  %v1894_v58 = vpack.c.bf16 %v928_v48, %v928_v48  ;;  %v1895_v59 = vpack.c.bf16 %v929_v49, %v929_v49  ;;  %v931_v60 = vmax.f32 %v675_v41, %v803_v50 }
  0xab   : > { %1567 = vst.msk [vmem:[%s2333_s25 + $0x188] sm:$0xf] %vm1468_vm0, %v1892_v52  ;;  %v1896_v62 = vpack.c.bf16 %v930_v53, %v930_v53  ;;  %v541_v63 = vmul.f32 %v2635_v39, %v2132_v54  ;;  %v542_v1 = vmul.f32 %v2635_v39, %v2133_v55  ;;  %v2136_v2 = vunpack.c.l.bf16 %v2230_v51 }
  0xac   : > { %1568 = vst.msk [vmem:[%s2333_s25 + $0x18c] sm:$0xf] %vm1468_vm0, %v1893_v57  ;;  %1569 = vst.msk [vmem:[%s2333_s25 + $0x190] sm:$0xf] %vm1468_vm0, %v1894_v58  ;;  %v1897_v3 = vpack.c.bf16 %v931_v60, %v931_v60  ;;  %v2137_v4 = vunpack.c.h.bf16 %v2230_v51  ;;  %v2140_v5 = vunpack.c.l.bf16 %v2231_v56  ;;  %v2141_v6 = vunpack.c.h.bf16 %v2231_v56  ;;  %v2236_v51 = vld [vmem:[%s2295_s18 + $0x1d8] sm:$0xff]  }
  0xad   : > { %1570 = vst.msk [vmem:[%s2333_s25 + $0x194] sm:$0xf] %vm1468_vm0, %v1895_v59  ;;  %1571 = vst.msk [vmem:[%s2333_s25 + $0x198] sm:$0xf] %vm1468_vm0, %v1896_v62  ;;  %v676_v7 = vadd.f32 %v2650_v47, %v541_v63  ;;  %v677_v8 = vadd.f32 %v2650_v47, %v542_v1  ;;  %v543_v10 = vmul.f32 %v2635_v39, %v2136_v2  ;;  %v2144_v11 = vunpack.c.l.bf16 %v2232_v61 }
  0xae   : > { %1572 = vst.msk [vmem:[%s2333_s25 + $0x19c] sm:$0xf] %vm1468_vm0, %v1897_v3  ;;  %v544_v12 = vmul.f32 %v2635_v39, %v2137_v4  ;;  %v545_v13 = vmul.f32 %v2635_v39, %v2140_v5  ;;  %v546_v14 = vmul.f32 %v2635_v39, %v2141_v6  ;;  %v2145_v15 = vunpack.c.h.bf16 %v2232_v61 }
  0xaf   : > { %v804_v16 = vmul.f32 0.1, %v676_v7  ;;  %v805_v17 = vmul.f32 0.1, %v677_v8  ;;  %v678_v18 = vadd.f32 %v2650_v47, %v543_v10  ;;  %v547_v19 = vmul.f32 %v2635_v39, %v2144_v11 }
  0xb0   : > { %v679_v20 = vadd.f32 %v2650_v47, %v544_v12  ;;  %v680_v21 = vadd.f32 %v2650_v47, %v545_v13  ;;  %v681_v22 = vadd.f32 %v2650_v47, %v546_v14  ;;  %v548_v23 = vmul.f32 %v2635_v39, %v2145_v15 }
  0xb1   : > { %v932_v24 = vmax.f32 %v676_v7, %v804_v16  ;;  %v933_v0 = vmax.f32 %v677_v8, %v805_v17  ;;  %v806_v25 = vmul.f32 0.1, %v678_v18  ;;  %v682_v26 = vadd.f32 %v2650_v47, %v547_v19 }
  0xb2   : > { %v807_v28 = vmul.f32 0.1, %v679_v20  ;;  %v808_v29 = vmul.f32 0.1, %v680_v21  ;;  %v809_v30 = vmul.f32 0.1, %v681_v22  ;;  %v683_v9 = vadd.f32 %v2650_v47, %v548_v23 }
  0xb3   : > { %v1898_v31 = vpack.c.bf16 %v932_v24, %v932_v24  ;;  %v1899_v32 = vpack.c.bf16 %v933_v0, %v933_v0  ;;  %v934_v33 = vmax.f32 %v678_v18, %v806_v25  ;;  %v810_v34 = vmul.f32 0.1, %v682_v26  ;;  %v2237_v18 = vld [vmem:[%s2295_s18 + $0x1e0] sm:$0xff]  }
  0xb4   : > { %v935_v35 = vmax.f32 %v679_v20, %v807_v28  ;;  %v936_v36 = vmax.f32 %v680_v21, %v808_v29  ;;  %v937_v37 = vmax.f32 %v681_v22, %v809_v30  ;;  %v811_v38 = vmul.f32 0.1, %v683_v9  ;;  %v2238_v30 = vld [vmem:[%s2295_s18 + $0x1e8] sm:$0xff]  }
  0xb5   : > { %1573 = vst.msk [vmem:[%s2333_s25 + $0x1a0] sm:$0xf] %vm1468_vm0, %v1898_v31  ;;  %1574 = vst.msk [vmem:[%s2333_s25 + $0x1a4] sm:$0xf] %vm1468_vm0, %v1899_v32  ;;  %v1900_v41 = vpack.c.bf16 %v934_v33, %v934_v33  ;;  %v938_v42 = vmax.f32 %v682_v26, %v810_v34  ;;  %v2148_v43 = vunpack.c.l.bf16 %v2233_v27  ;;  %v2149_v44 = vunpack.c.h.bf16 %v2233_v27  ;;  %v2239_v34 = vld [vmem:[%s2295_s18 + $0x1f0] sm:$0xff]  }
  0xb6   : > { %v1901_v46 = vpack.c.bf16 %v935_v35, %v935_v35  ;;  %v1902_v48 = vpack.c.bf16 %v936_v36, %v936_v36  ;;  %v1903_v49 = vpack.c.bf16 %v937_v37, %v937_v37  ;;  %v939_v50 = vmax.f32 %v683_v9, %v811_v38 }
  0xb7   : > { %1575 = vst.msk [vmem:[%s2333_s25 + $0x1a8] sm:$0xf] %vm1468_vm0, %v1900_v41  ;;  %v1904_v52 = vpack.c.bf16 %v938_v42, %v938_v42  ;;  %v549_v53 = vmul.f32 %v2635_v39, %v2148_v43  ;;  %v550_v54 = vmul.f32 %v2635_v39, %v2149_v44  ;;  %v2152_v55 = vunpack.c.l.bf16 %v2234_v40 }
  0xb8   : > { %1576 = vst.msk [vmem:[%s2333_s25 + $0x1ac] sm:$0xf] %vm1468_vm0, %v1901_v46  ;;  %1577 = vst.msk [vmem:[%s2333_s25 + $0x1b0] sm:$0xf] %vm1468_vm0, %v1902_v48  ;;  %v1905_v56 = vpack.c.bf16 %v939_v50, %v939_v50  ;;  %v2153_v57 = vunpack.c.h.bf16 %v2234_v40  ;;  %v2156_v58 = vunpack.c.l.bf16 %v2235_v45  ;;  %v2157_v59 = vunpack.c.h.bf16 %v2235_v45  ;;  %v2240_v40 = vld [vmem:[%s2295_s18 + $0x1f8] sm:$0xff]  }
  0xb9   : > { %1578 = vst.msk [vmem:[%s2333_s25 + $0x1b4] sm:$0xf] %vm1468_vm0, %v1903_v49  ;;  %1579 = vst.msk [vmem:[%s2333_s25 + $0x1b8] sm:$0xf] %vm1468_vm0, %v1904_v52  ;;  %v684_v60 = vadd.f32 %v2650_v47, %v549_v53  ;;  %v685_v61 = vadd.f32 %v2650_v47, %v550_v54  ;;  %v551_v62 = vmul.f32 %v2635_v39, %v2152_v55  ;;  %v2160_v63 = vunpack.c.l.bf16 %v2236_v51 }
  0xba   : > { %1580 = vst.msk [vmem:[%s2333_s25 + $0x1bc] sm:$0xf] %vm1468_vm0, %v1905_v56  ;;  %v552_v1 = vmul.f32 %v2635_v39, %v2153_v57  ;;  %v553_v2 = vmul.f32 %v2635_v39, %v2156_v58  ;;  %v554_v3 = vmul.f32 %v2635_v39, %v2157_v59  ;;  %v2161_v4 = vunpack.c.h.bf16 %v2236_v51 }
  0xbb   : > { %v812_v5 = vmul.f32 0.1, %v684_v60  ;;  %v813_v6 = vmul.f32 0.1, %v685_v61  ;;  %v686_v7 = vadd.f32 %v2650_v47, %v551_v62  ;;  %v555_v8 = vmul.f32 %v2635_v39, %v2160_v63 }
  0xbc   : > { %v687_v10 = vadd.f32 %v2650_v47, %v552_v1  ;;  %v688_v11 = vadd.f32 %v2650_v47, %v553_v2  ;;  %v689_v12 = vadd.f32 %v2650_v47, %v554_v3  ;;  %v556_v13 = vmul.f32 %v2635_v39, %v2161_v4 }
  0xbd   : > { %v940_v14 = vmax.f32 %v684_v60, %v812_v5  ;;  %v941_v15 = vmax.f32 %v685_v61, %v813_v6  ;;  %v814_v16 = vmul.f32 0.1, %v686_v7  ;;  %v690_v17 = vadd.f32 %v2650_v47, %v555_v8 }
  0xbe   : > { %v815_v19 = vmul.f32 0.1, %v687_v10  ;;  %v816_v20 = vmul.f32 0.1, %v688_v11  ;;  %v817_v21 = vmul.f32 0.1, %v689_v12  ;;  %v691_v22 = vadd.f32 %v2650_v47, %v556_v13 }
  0xbf   : > { %v1906_v23 = vpack.c.bf16 %v940_v14, %v940_v14  ;;  %v1907_v24 = vpack.c.bf16 %v941_v15, %v941_v15  ;;  %v942_v0 = vmax.f32 %v686_v7, %v814_v16  ;;  %v818_v25 = vmul.f32 0.1, %v690_v17 }
  0xc0   : > { %v943_v26 = vmax.f32 %v687_v10, %v815_v19  ;;  %v944_v27 = vmax.f32 %v688_v11, %v816_v20  ;;  %v945_v28 = vmax.f32 %v689_v12, %v817_v21  ;;  %v819_v29 = vmul.f32 0.1, %v691_v22 }
  0xc1   : > { %1581 = vst.msk [vmem:[%s2333_s25 + $0x1c0] sm:$0xf] %vm1468_vm0, %v1906_v23  ;;  %1582 = vst.msk [vmem:[%s2333_s25 + $0x1c4] sm:$0xf] %vm1468_vm0, %v1907_v24  ;;  %v1908_v9 = vpack.c.bf16 %v942_v0, %v942_v0  ;;  %v946_v31 = vmax.f32 %v690_v17, %v818_v25  ;;  %v2164_v32 = vunpack.c.l.bf16 %v2237_v18  ;;  %v2165_v33 = vunpack.c.h.bf16 %v2237_v18 }
  0xc2   : > { %v1909_v35 = vpack.c.bf16 %v943_v26, %v943_v26  ;;  %v1910_v36 = vpack.c.bf16 %v944_v27, %v944_v27  ;;  %v1911_v37 = vpack.c.bf16 %v945_v28, %v945_v28  ;;  %v947_v38 = vmax.f32 %v691_v22, %v819_v29 }
  0xc3   : > { %1583 = vst.msk [vmem:[%s2333_s25 + $0x1c8] sm:$0xf] %vm1468_vm0, %v1908_v9  ;;  %v1912_v41 = vpack.c.bf16 %v946_v31, %v946_v31  ;;  %v557_v42 = vmul.f32 %v2635_v39, %v2164_v32  ;;  %v558_v43 = vmul.f32 %v2635_v39, %v2165_v33  ;;  %v2168_v44 = vunpack.c.l.bf16 %v2238_v30 }
  0xc4   : > { %1584 = vst.msk [vmem:[%s2333_s25 + $0x1cc] sm:$0xf] %vm1468_vm0, %v1909_v35  ;;  %1585 = vst.msk [vmem:[%s2333_s25 + $0x1d0] sm:$0xf] %vm1468_vm0, %v1910_v36  ;;  %v1913_v45 = vpack.c.bf16 %v947_v38, %v947_v38  ;;  %v2169_v46 = vunpack.c.h.bf16 %v2238_v30  ;;  %v2172_v48 = vunpack.c.l.bf16 %v2239_v34  ;;  %v2173_v49 = vunpack.c.h.bf16 %v2239_v34 }
  0xc5   : > { %1586 = vst.msk [vmem:[%s2333_s25 + $0x1d4] sm:$0xf] %vm1468_vm0, %v1911_v37  ;;  %1587 = vst.msk [vmem:[%s2333_s25 + $0x1d8] sm:$0xf] %vm1468_vm0, %v1912_v41  ;;  %v692_v50 = vadd.f32 %v2650_v47, %v557_v42  ;;  %v693_v51 = vadd.f32 %v2650_v47, %v558_v43  ;;  %v559_v52 = vmul.f32 %v2635_v39, %v2168_v44  ;;  %v2176_v53 = vunpack.c.l.bf16 %v2240_v40 }
  0xc6   : > { %1588 = vst.msk [vmem:[%s2333_s25 + $0x1dc] sm:$0xf] %vm1468_vm0, %v1913_v45  ;;  %v560_v54 = vmul.f32 %v2635_v39, %v2169_v46  ;;  %v561_v55 = vmul.f32 %v2635_v39, %v2172_v48  ;;  %v562_v56 = vmul.f32 %v2635_v39, %v2173_v49  ;;  %v2177_v57 = vunpack.c.h.bf16 %v2240_v40 }
  0xc7   : > { %v820_v58 = vmul.f32 0.1, %v692_v50  ;;  %v821_v59 = vmul.f32 0.1, %v693_v51  ;;  %v694_v60 = vadd.f32 %v2650_v47, %v559_v52  ;;  %v563_v61 = vmul.f32 %v2635_v39, %v2176_v53 }
  0xc8   : > { %v695_v62 = vadd.f32 %v2650_v47, %v560_v54  ;;  %v696_v63 = vadd.f32 %v2650_v47, %v561_v55  ;;  %v697_v1 = vadd.f32 %v2650_v47, %v562_v56  ;;  %v564_v2 = vmul.f32 %v2635_v39, %v2177_v57 }
  0xc9   : > { %v948_v3 = vmax.f32 %v692_v50, %v820_v58  ;;  %v949_v4 = vmax.f32 %v693_v51, %v821_v59  ;;  %v822_v5 = vmul.f32 0.1, %v694_v60  ;;  %v698_v6 = vadd.f32 %v2650_v47, %v563_v61 }
  0xca   : > { %v823_v7 = vmul.f32 0.1, %v695_v62  ;;  %v824_v8 = vmul.f32 0.1, %v696_v63  ;;  %v825_v10 = vmul.f32 0.1, %v697_v1  ;;  %v699_v11 = vadd.f32 %v2650_v47, %v564_v2 }
  0xcb   : > { %v1914_v12 = vpack.c.bf16 %v948_v3, %v948_v3  ;;  %v1915_v13 = vpack.c.bf16 %v949_v4, %v949_v4  ;;  %v950_v14 = vmax.f32 %v694_v60, %v822_v5  ;;  %v826_v15 = vmul.f32 0.1, %v698_v6 }
  0xcc   : > { %v951_v39 = vmax.f32 %v695_v62, %v823_v7  ;;  %v952_v16 = vmax.f32 %v696_v63, %v824_v8  ;;  %v953_v17 = vmax.f32 %v697_v1, %v825_v10  ;;  %v827_v18 = vmul.f32 0.1, %v699_v11 }
  0xcd   : > { %1589 = vst.msk [vmem:[%s2333_s25 + $0x1e0] sm:$0xf] %vm1468_vm0, %v1914_v12  ;;  %1590 = vst.msk [vmem:[%s2333_s25 + $0x1e4] sm:$0xf] %vm1468_vm0, %v1915_v13  ;;  %v1916_v19 = vpack.c.bf16 %v950_v14, %v950_v14  ;;  %v954_v47 = vmax.f32 %v698_v6, %v826_v15 }
  0xce   : > { %v1917_v20 = vpack.c.bf16 %v951_v39, %v951_v39  ;;  %v1918_v21 = vpack.c.bf16 %v952_v16, %v952_v16  ;;  %v1919_v22 = vpack.c.bf16 %v953_v17, %v953_v17  ;;  %v955_v23 = vmax.f32 %v699_v11, %v827_v18 }
  0xcf   : > { %1591 = vst.msk [vmem:[%s2333_s25 + $0x1e8] sm:$0xf] %vm1468_vm0, %v1916_v19  ;;  %v1920_v24 = vpack.c.bf16 %v954_v47, %v954_v47 }
  0xd0   : > { %1592 = vst.msk [vmem:[%s2333_s25 + $0x1ec] sm:$0xf] %vm1468_vm0, %v1917_v20  ;;  %1593 = vst.msk [vmem:[%s2333_s25 + $0x1f0] sm:$0xf] %vm1468_vm0, %v1918_v21  ;;  %v1921_v0 = vpack.c.bf16 %v955_v23, %v955_v23 }
  0xd1   : > { %1594 = vst.msk [vmem:[%s2333_s25 + $0x1f4] sm:$0xf] %vm1468_vm0, %v1919_v22  ;;  %1595 = vst.msk [vmem:[%s2333_s25 + $0x1f8] sm:$0xf] %vm1468_vm0, %v1920_v24 }
  0xd2   : > { %1596 = vst.msk [vmem:[%s2333_s25 + $0x1fc] sm:$0xf] %vm1468_vm0, %v1921_v0 }
  0xd3 PF: > { %s13_s12 = sadd.s32 1, %s2257_s12  }
  0xd4   : > { %p10_p4 = scmp.ge.s32.totalorder %s13_s12, 10  }
  0xd6   :  { %12 = sbr.rel (!%p10_p4) target bundleno = 1 (0x1), region = 62 }

// kernel: _conv_bn_leaky.2
= control target key start
LH: loop header
LB: loop body
LE: loop exit
PB: predicated region body
PF: predicated region fallthrough
CT: control target
= control target key end

     0   :  { %s4374_s15 = smov 0   ;;  %s4376_s16 = smov 0   ;;  %s6113_s0 = inlined_call_operand.vmem [shape: bf16[8192,27], index: 0, kind: input, shape index: {}]   ;;  %s6114_s1 = inlined_call_operand.vmem [shape: bf16[27,32], index: 1, kind: input, shape index: {}]   ;;  %s6115_s2 = inlined_call_operand.vmem [shape: bf16[8192,32], index: 2, kind: output, shape index: {0}]   ;;  %s6116_s3 = inlined_call_operand.vmem [shape: f32[8,1,32], index: 3, kind: output, shape index: {1}]   ;;  %s6117_s4 = inlined_call_operand.vmem [shape: f32[8,1,32], index: 4, kind: output, shape index: {2}]  }
   0x1   :  { %s4378_s17 = smov 0  }
   0x2 LB: > { %s34_s18 = sadd.s32 1, %s4341_s16  ;;  %p3631_p0 = scmp.ge.s32.totalorder %s4345_s17, 1  ;;  %s4345_s17 = sphi %s4378_s17, %s15_s17   ;;  %s4341_s16 = sphi %s4376_s16, %s6139_s16   ;;  %s4337_s15 = sphi %s4374_s15, %s6138_s15  }
   0x3   : > { %p36_p1 = scmp.ge.s32.totalorder %s34_s18, 8  ;;  %p214_p2 = scmp.lt.s32.totalorder %s4345_s17, 9 }
   0x5   : > { %s6141_s18 = smov (%p36_p1, %s34_s18), 0  ;;  %p215_p3 = pnand %p3631_p0, %p214_p2 }
   0x7   : > { %218 = sbr.rel (%p215_p3) target bundleno = 506 (0x1fa), region = 28 }
   0xc   : > { %v4252_v0 = vld [vmem:[%s6114_s1 + $0x8] sm:$0x3f]   ;;  %vm1223_vm0 = vcmask 1044480   ;;  %vm1224_vm1 = vcmask 1045504   ;;  %v4347_v1 = vmov 65535   ;;  %s3632_s21 = sshll.u32 %s4337_s15, 7 }
   0xd   : > { %v1225_v2 = vsel %vm1223_vm0, 4294967295, %v4347_v1  ;;  %p267_p4 = scmp.lt.s32.totalorder %s3632_s21, 1023  ;;  %v4401_v5 = vld [vmem:[%s6114_s1] sm:$0xff]   ;;  %vm310_vm2 = vcmask 261120   ;;  %v4348_v6 = vmov 0.0   ;;  %vm1030_vm3 = vcmask 220160  }
   0xe   : > { %v1226_v3 = vsel %vm1224_vm1, %v1225_v2, 0  ;;  %313 = vst.msk [vmem:[#allocation2 + $0x10] sm:$0xff] %vm310_vm2, %v4348_v6  ;;  %311 = vst.msk [vmem:[#allocation2] sm:$0xff] %vm310_vm2, %v4348_v6  ;;  %vm2675_vm4 = vcmask 257024   ;;  %p293_p5 = scmp.lt.s32.totalorder %s4337_s15, 7  ;;  %vm3065_vm5 = vcmask 253952  }
   0xf   : > { %v1228_v4 = vand.u32 %v4252_v0, %v1226_v3  ;;  %s6143_s21 = smov (!%p267_p4, %s3632_s21), 1023  ;;  %312 = vst.msk [vmem:[#allocation2 + $0x8] sm:$0xff] %vm310_vm2, %v4348_v6  ;;  %314 = vst.msk [vmem:[#allocation2 + $0x18] sm:$0xff] %vm310_vm2, %v4348_v6 }
  0x10   : > { %s3633_s24 = sshll.u32 %s6143_s21, 2  ;;  %315 = vst.msk [vmem:[#allocation2 + $0x20] sm:$0xff] %vm310_vm2, %v4348_v6  ;;  %316 = vst.msk [vmem:[#allocation2 + $0x28] sm:$0xff] %vm310_vm2, %v4348_v6  ;;  %s6145_s15 = smov (!%p293_p5, %s4337_s15), 7 }
  0x11   : > { %4090 = vmatprep.subr.bf16.mxu0 %v1228_v4  ;;  %4222 = vmatprep.subr.bf16.mxu1 %v1228_v4  ;;  %317 = vst.msk [vmem:[#allocation2 + $0x30] sm:$0xff] %vm310_vm2, %v4348_v6  ;;  %318 = vst.msk [vmem:[#allocation2 + $0x38] sm:$0xff] %vm310_vm2, %v4348_v6  ;;  %s4668_s27 = scalar_lea.vmem %s6113_s0, %s3633_s24  ;;  %s4810_s30 = scalar_lea.vmem %s6115_s2, %s3633_s24 }
  0x12   : > { %4091 = vmatpush3.bf16.msra.mxu0 %v1228_v4  ;;  %4224 = vmatpush3.bf16.msra.mxu1 %v1228_v4  ;;  %319 = vst.msk [vmem:[#allocation2 + $0x40] sm:$0xff] %vm310_vm2, %v4348_v6  ;;  %320 = vst.msk [vmem:[#allocation2 + $0x48] sm:$0xff] %vm310_vm2, %v4348_v6  ;;  %v4254_v7 = vld [vmem:[%s4668_s27] sm:$0xff]   ;;  %v4255_v8 = vld [vmem:[%s4668_s27 + $0x8] sm:$0xff]   ;;  %s298_s7 = scalar_lea.vmem %s6116_s3, %s6145_s15  ;;  %s304_s10 = scalar_lea.vmem %s6117_s4, %s6145_s15 }
  0x13   : > { %321 = vst.msk [vmem:[#allocation2 + $0x50] sm:$0xff] %vm310_vm2, %v4348_v6  ;;  %322 = vst.msk [vmem:[#allocation2 + $0x58] sm:$0xff] %vm310_vm2, %v4348_v6  ;;  %4092 = vmatprep.subr.bf16.mxu0 %v4401_v5  ;;  %4223 = vmatprep.subr.bf16.mxu1 %v4401_v5  ;;  %v4256_v9 = vld [vmem:[%s4668_s27 + $0x10] sm:$0xff]   ;;  %v4257_v10 = vld [vmem:[%s4668_s27 + $0x18] sm:$0xff]  }
  0x14   : > { %323 = vst.msk [vmem:[#allocation2 + $0x60] sm:$0xff] %vm310_vm2, %v4348_v6  ;;  %324 = vst.msk [vmem:[#allocation2 + $0x68] sm:$0xff] %vm310_vm2, %v4348_v6  ;;  %4094 = vmatprep.mubr.msk.bf16.mxu0 %vm1030_vm3, %v4254_v7  ;;  %v4258_v11 = vld [vmem:[%s4668_s27 + $0x20] sm:$0xff]   ;;  %v4259_v12 = vld [vmem:[%s4668_s27 + $0x28] sm:$0xff]  }
  0x15   : > { %325 = vst.msk [vmem:[#allocation2 + $0x70] sm:$0xff] %vm310_vm2, %v4348_v6  ;;  %326 = vst.msk [vmem:[#allocation2 + $0x78] sm:$0xff] %vm310_vm2, %v4348_v6  ;;  %v4260_v13 = vld [vmem:[%s4668_s27 + $0x30] sm:$0xff]   ;;  %v4261_v14 = vld [vmem:[%s4668_s27 + $0x38] sm:$0xff]  }
  0x16   : > { %327 = vst.msk [vmem:[#allocation2 + $0x80] sm:$0xff] %vm310_vm2, %v4348_v6  ;;  %328 = vst.msk [vmem:[#allocation2 + $0x88] sm:$0xff] %vm310_vm2, %v4348_v6  ;;  %4093 = vmatpush3.bf16.msra.mxu0 %v4401_v5  ;;  %4225 = vmatpush3.bf16.msra.mxu1 %v4401_v5  ;;  %v4262_v15 = vld [vmem:[%s4668_s27 + $0x40] sm:$0xff]   ;;  %v4263_v16 = vld [vmem:[%s4668_s27 + $0x48] sm:$0xff]  }
  0x17   : > { %329 = vst.msk [vmem:[#allocation2 + $0x90] sm:$0xff] %vm310_vm2, %v4348_v6  ;;  %330 = vst.msk [vmem:[#allocation2 + $0x98] sm:$0xff] %vm310_vm2, %v4348_v6  ;;  %v4264_v17 = vld [vmem:[%s4668_s27 + $0x50] sm:$0xff]   ;;  %v4286_v18 = vld [vmem:[%s4668_s27 + $0x100] sm:$0xff]  }
  0x18   : > { %331 = vst.msk [vmem:[#allocation2 + $0xa0] sm:$0xff] %vm310_vm2, %v4348_v6  ;;  %332 = vst.msk [vmem:[#allocation2 + $0xa8] sm:$0xff] %vm310_vm2, %v4348_v6  ;;  %v4287_v19 = vld [vmem:[%s4668_s27 + $0x108] sm:$0xff]   ;;  %4158 = vmatprep.mubr.msk.bf16.mxu1 %vm1030_vm3, %v4286_v18  ;;  %v4288_v20 = vld [vmem:[%s4668_s27 + $0x110] sm:$0xff]  }
  0x19   : > { %333 = vst.msk [vmem:[#allocation2 + $0xb0] sm:$0xff] %vm310_vm2, %v4348_v6  ;;  %334 = vst.msk [vmem:[#allocation2 + $0xb8] sm:$0xff] %vm310_vm2, %v4348_v6  ;;  %4095 = vmatmul.mubr.msk.bf16.vlgmr.msra.gmra.mxu0 %vm1030_vm3, %v4255_v8  ;;  %4159 = vmatmul.mubr.msk.bf16.vlgmr.msra.gmra.mxu1 %vm1030_vm3, %v4287_v19  ;;  %v4289_v21 = vld [vmem:[%s4668_s27 + $0x118] sm:$0xff]   ;;  %v4290_v22 = vld [vmem:[%s4668_s27 + $0x120] sm:$0xff]  }
  0x1a   : > { %335 = vst.msk [vmem:[#allocation2 + $0xc0] sm:$0xff] %vm310_vm2, %v4348_v6  ;;  %336 = vst.msk [vmem:[#allocation2 + $0xc8] sm:$0xff] %vm310_vm2, %v4348_v6  ;;  %4098 = vmatprep.mubr.msk.bf16.mxu0 %vm1030_vm3, %v4256_v9  ;;  %4162 = vmatprep.mubr.msk.bf16.mxu1 %vm1030_vm3, %v4288_v20  ;;  %v4265_v23 = vld [vmem:[%s4668_s27 + $0x58] sm:$0xff]   ;;  %v4266_v24 = vld [vmem:[%s4668_s27 + $0x60] sm:$0xff]  }
  0x1b   : > { %337 = vst.msk [vmem:[#allocation2 + $0xd0] sm:$0xff] %vm310_vm2, %v4348_v6  ;;  %338 = vst.msk [vmem:[#allocation2 + $0xd8] sm:$0xff] %vm310_vm2, %v4348_v6  ;;  %v4291_v25 = vld [vmem:[%s4668_s27 + $0x128] sm:$0xff]   ;;  %v4292_v26 = vld [vmem:[%s4668_s27 + $0x130] sm:$0xff]  }
  0x1c   : > { %339 = vst.msk [vmem:[#allocation2 + $0xe0] sm:$0xff] %vm310_vm2, %v4348_v6  ;;  %340 = vst.msk [vmem:[#allocation2 + $0xe8] sm:$0xff] %vm310_vm2, %v4348_v6  ;;  %v4267_v27 = vld [vmem:[%s4668_s27 + $0x68] sm:$0xff]   ;;  %v4268_v28 = vld [vmem:[%s4668_s27 + $0x70] sm:$0xff]  }
  0x1d   : > { %341 = vst.msk [vmem:[#allocation2 + $0xf0] sm:$0xff] %vm310_vm2, %v4348_v6  ;;  %342 = vst.msk [vmem:[#allocation2 + $0xf8] sm:$0xff] %vm310_vm2, %v4348_v6  ;;  %v4293_v29 = vld [vmem:[%s4668_s27 + $0x138] sm:$0xff]   ;;  %v4294_v30 = vld [vmem:[%s4668_s27 + $0x140] sm:$0xff]  }
  0x1e   : > { %343 = vst.msk [vmem:[#allocation2 + $0x100] sm:$0xff] %vm310_vm2, %v4348_v6  ;;  %344 = vst.msk [vmem:[#allocation2 + $0x108] sm:$0xff] %vm310_vm2, %v4348_v6  ;;  %v4269_v31 = vld [vmem:[%s4668_s27 + $0x78] sm:$0xff]   ;;  %v4270_v32 = vld [vmem:[%s4668_s27 + $0x80] sm:$0xff]  }
  0x1f   : > { %345 = vst.msk [vmem:[#allocation2 + $0x110] sm:$0xff] %vm310_vm2, %v4348_v6  ;;  %346 = vst.msk [vmem:[#allocation2 + $0x118] sm:$0xff] %vm310_vm2, %v4348_v6  ;;  %v4295_v33 = vld [vmem:[%s4668_s27 + $0x148] sm:$0xff]   ;;  %v4296_v34 = vld [vmem:[%s4668_s27 + $0x150] sm:$0xff]  }
  0x20   : > { %347 = vst.msk [vmem:[#allocation2 + $0x120] sm:$0xff] %vm310_vm2, %v4348_v6  ;;  %348 = vst.msk [vmem:[#allocation2 + $0x128] sm:$0xff] %vm310_vm2, %v4348_v6  ;;  %v4271_v35 = vld [vmem:[%s4668_s27 + $0x88] sm:$0xff]   ;;  %v4272_v36 = vld [vmem:[%s4668_s27 + $0x90] sm:$0xff]  }
  0x21   : > { %349 = vst.msk [vmem:[#allocation2 + $0x130] sm:$0xff] %vm310_vm2, %v4348_v6  ;;  %350 = vst.msk [vmem:[#allocation2 + $0x138] sm:$0xff] %vm310_vm2, %v4348_v6  ;;  %4099 = vmatmul.mubr.msk.bf16.gmra.mxu0 %vm1030_vm3, %v4257_v10  ;;  %4163 = vmatmul.mubr.msk.bf16.gmra.mxu1 %vm1030_vm3, %v4289_v21  ;;  %v4297_v37 = vld [vmem:[%s4668_s27 + $0x158] sm:$0xff]   ;;  %v4298_v38 = vld [vmem:[%s4668_s27 + $0x160] sm:$0xff]  }
  0x22   : > { %351 = vst.msk [vmem:[#allocation2 + $0x140] sm:$0xff] %vm310_vm2, %v4348_v6  ;;  %352 = vst.msk [vmem:[#allocation2 + $0x148] sm:$0xff] %vm310_vm2, %v4348_v6  ;;  %4102 = vmatprep.mubr.msk.bf16.mxu0 %vm1030_vm3, %v4258_v11  ;;  %4166 = vmatprep.mubr.msk.bf16.mxu1 %vm1030_vm3, %v4290_v22  ;;  %v4273_v39 = vld [vmem:[%s4668_s27 + $0x98] sm:$0xff]   ;;  %v4274_v40 = vld [vmem:[%s4668_s27 + $0xa0] sm:$0xff]  }
  0x23   : > { %353 = vst.msk [vmem:[#allocation2 + $0x150] sm:$0xff] %vm310_vm2, %v4348_v6  ;;  %354 = vst.msk [vmem:[#allocation2 + $0x158] sm:$0xff] %vm310_vm2, %v4348_v6  ;;  %v4299_v41 = vld [vmem:[%s4668_s27 + $0x168] sm:$0xff]   ;;  %v4300_v42 = vld [vmem:[%s4668_s27 + $0x170] sm:$0xff]  }
  0x24   : > { %355 = vst.msk [vmem:[#allocation2 + $0x160] sm:$0xff] %vm310_vm2, %v4348_v6  ;;  %356 = vst.msk [vmem:[#allocation2 + $0x168] sm:$0xff] %vm310_vm2, %v4348_v6  ;;  %v4275_v43 = vld [vmem:[%s4668_s27 + $0xa8] sm:$0xff]   ;;  %v4276_v44 = vld [vmem:[%s4668_s27 + $0xb0] sm:$0xff]  }
  0x25   : > { %357 = vst.msk [vmem:[#allocation2 + $0x170] sm:$0xff] %vm310_vm2, %v4348_v6  ;;  %358 = vst.msk [vmem:[#allocation2 + $0x178] sm:$0xff] %vm310_vm2, %v4348_v6  ;;  %v4301_v45 = vld [vmem:[%s4668_s27 + $0x178] sm:$0xff]   ;;  %v4302_v46 = vld [vmem:[%s4668_s27 + $0x180] sm:$0xff]  }
  0x26   : > { %359 = vst.msk [vmem:[#allocation2 + $0x180] sm:$0xff] %vm310_vm2, %v4348_v6  ;;  %360 = vst.msk [vmem:[#allocation2 + $0x188] sm:$0xff] %vm310_vm2, %v4348_v6  ;;  %v4277_v47 = vld [vmem:[%s4668_s27 + $0xb8] sm:$0xff]   ;;  %v4278_v48 = vld [vmem:[%s4668_s27 + $0xc0] sm:$0xff]  }
  0x27   : > { %361 = vst.msk [vmem:[#allocation2 + $0x190] sm:$0xff] %vm310_vm2, %v4348_v6  ;;  %362 = vst.msk [vmem:[#allocation2 + $0x198] sm:$0xff] %vm310_vm2, %v4348_v6  ;;  %v4303_v49 = vld [vmem:[%s4668_s27 + $0x188] sm:$0xff]   ;;  %v4304_v50 = vld [vmem:[%s4668_s27 + $0x190] sm:$0xff]  }
  0x28   : > { %363 = vst.msk [vmem:[#allocation2 + $0x1a0] sm:$0xff] %vm310_vm2, %v4348_v6  ;;  %364 = vst.msk [vmem:[#allocation2 + $0x1a8] sm:$0xff] %vm310_vm2, %v4348_v6  ;;  %v4279_v51 = vld [vmem:[%s4668_s27 + $0xc8] sm:$0xff]   ;;  %v4280_v52 = vld [vmem:[%s4668_s27 + $0xd0] sm:$0xff]  }
  0x29   : > { %365 = vst.msk [vmem:[#allocation2 + $0x1b0] sm:$0xff] %vm310_vm2, %v4348_v6  ;;  %366 = vst.msk [vmem:[#allocation2 + $0x1b8] sm:$0xff] %vm310_vm2, %v4348_v6  ;;  %4103 = vmatmul.mubr.msk.bf16.gmra.mxu0 %vm1030_vm3, %v4259_v12  ;;  %4167 = vmatmul.mubr.msk.bf16.gmra.mxu1 %vm1030_vm3, %v4291_v25  ;;  %v4305_v53 = vld [vmem:[%s4668_s27 + $0x198] sm:$0xff]   ;;  %v4306_v54 = vld [vmem:[%s4668_s27 + $0x1a0] sm:$0xff]  }
  0x2a   : > { %367 = vst.msk [vmem:[#allocation2 + $0x1c0] sm:$0xff] %vm310_vm2, %v4348_v6  ;;  %368 = vst.msk [vmem:[#allocation2 + $0x1c8] sm:$0xff] %vm310_vm2, %v4348_v6  ;;  %4106 = vmatprep.mubr.msk.bf16.mxu0 %vm1030_vm3, %v4260_v13  ;;  %4170 = vmatprep.mubr.msk.bf16.mxu1 %vm1030_vm3, %v4292_v26  ;;  %v4281_v55 = vld [vmem:[%s4668_s27 + $0xd8] sm:$0xff]   ;;  %v4282_v56 = vld [vmem:[%s4668_s27 + $0xe0] sm:$0xff]  }
  0x2b   : > { %369 = vst.msk [vmem:[#allocation2 + $0x1d0] sm:$0xff] %vm310_vm2, %v4348_v6  ;;  %370 = vst.msk [vmem:[#allocation2 + $0x1d8] sm:$0xff] %vm310_vm2, %v4348_v6  ;;  %v4307_v57 = vld [vmem:[%s4668_s27 + $0x1a8] sm:$0xff]   ;;  %v4308_v58 = vld [vmem:[%s4668_s27 + $0x1b0] sm:$0xff]  }
  0x2c   : > { %371 = vst.msk [vmem:[#allocation2 + $0x1e0] sm:$0xff] %vm310_vm2, %v4348_v6  ;;  %372 = vst.msk [vmem:[#allocation2 + $0x1e8] sm:$0xff] %vm310_vm2, %v4348_v6  ;;  %v4283_v59 = vld [vmem:[%s4668_s27 + $0xe8] sm:$0xff]   ;;  %v4284_v60 = vld [vmem:[%s4668_s27 + $0xf0] sm:$0xff]  }
  0x2d   : > { %373 = vst.msk [vmem:[#allocation2 + $0x1f0] sm:$0xff] %vm310_vm2, %v4348_v6  ;;  %374 = vst.msk [vmem:[#allocation2 + $0x1f8] sm:$0xff] %vm310_vm2, %v4348_v6  ;;  %v4309_v61 = vld [vmem:[%s4668_s27 + $0x1b8] sm:$0xff]   ;;  %v4310_v62 = vld [vmem:[%s4668_s27 + $0x1c0] sm:$0xff]  }
  0x2e   : > { %375 = vst.msk [vmem:[#allocation2 + $0x200] sm:$0xff] %vm310_vm2, %v4348_v6  ;;  %376 = vst.msk [vmem:[#allocation2 + $0x208] sm:$0xff] %vm310_vm2, %v4348_v6  ;;  %v4285_v63 = vld [vmem:[%s4668_s27 + $0xf8] sm:$0xff]   ;;  %v4311_v0 = vld [vmem:[%s4668_s27 + $0x1c8] sm:$0xff]  }
  0x2f   : > { %377 = vst.msk [vmem:[#allocation2 + $0x210] sm:$0xff] %vm310_vm2, %v4348_v6  ;;  %378 = vst.msk [vmem:[#allocation2 + $0x218] sm:$0xff] %vm310_vm2, %v4348_v6  ;;  %v4312_v1 = vld [vmem:[%s4668_s27 + $0x1d0] sm:$0xff]   ;;  %v4313_v2 = vld [vmem:[%s4668_s27 + $0x1d8] sm:$0xff]  }
  0x30   : > { %379 = vst.msk [vmem:[#allocation2 + $0x220] sm:$0xff] %vm310_vm2, %v4348_v6  ;;  %380 = vst.msk [vmem:[#allocation2 + $0x228] sm:$0xff] %vm310_vm2, %v4348_v6  ;;  %v4314_v3 = vld [vmem:[%s4668_s27 + $0x1e0] sm:$0xff]   ;;  %v4315_v4 = vld [vmem:[%s4668_s27 + $0x1e8] sm:$0xff]  }
  0x31   : > { %381 = vst.msk [vmem:[#allocation2 + $0x230] sm:$0xff] %vm310_vm2, %v4348_v6  ;;  %382 = vst.msk [vmem:[#allocation2 + $0x238] sm:$0xff] %vm310_vm2, %v4348_v6  ;;  %4107 = vmatmul.mubr.msk.bf16.gmra.mxu0 %vm1030_vm3, %v4261_v14  ;;  %4171 = vmatmul.mubr.msk.bf16.gmra.mxu1 %vm1030_vm3, %v4293_v29  ;;  %v4316_v5 = vld [vmem:[%s4668_s27 + $0x1f0] sm:$0xff]   ;;  %v439_v9 = vld [vmem:[#allocation2] sm:$0xff] }
  0x32   : > { %383 = vst.msk [vmem:[#allocation2 + $0x240] sm:$0xff] %vm310_vm2, %v4348_v6  ;;  %384 = vst.msk [vmem:[#allocation2 + $0x248] sm:$0xff] %vm310_vm2, %v4348_v6  ;;  %4110 = vmatprep.mubr.msk.bf16.mxu0 %vm1030_vm3, %v4262_v15  ;;  %4174 = vmatprep.mubr.msk.bf16.mxu1 %vm1030_vm3, %v4294_v30  ;;  %v441_v7 = vld [vmem:[#allocation2 + $0x10] sm:$0xff]  ;;  %v442_v12 = vld [vmem:[#allocation2 + $0x18] sm:$0xff] }
  0x33   : > { %385 = vst.msk [vmem:[#allocation2 + $0x250] sm:$0xff] %vm310_vm2, %v4348_v6  ;;  %386 = vst.msk [vmem:[#allocation2 + $0x258] sm:$0xff] %vm310_vm2, %v4348_v6  ;;  %v440_v15 = vld [vmem:[#allocation2 + $0x8] sm:$0xff]  ;;  %v445_v18 = vld [vmem:[#allocation2 + $0x30] sm:$0xff] }
  0x34   : > { %387 = vst.msk [vmem:[#allocation2 + $0x260] sm:$0xff] %vm310_vm2, %v4348_v6  ;;  %388 = vst.msk [vmem:[#allocation2 + $0x268] sm:$0xff] %vm310_vm2, %v4348_v6  ;;  %v443_v21 = vld [vmem:[#allocation2 + $0x20] sm:$0xff] }
  0x35   : > { %389 = vst.msk [vmem:[#allocation2 + $0x270] sm:$0xff] %vm310_vm2, %v4348_v6  ;;  %390 = vst.msk [vmem:[#allocation2 + $0x278] sm:$0xff] %vm310_vm2, %v4348_v6 }
  0x36   : > { %391 = vst.msk [vmem:[#allocation2 + $0x280] sm:$0xff] %vm310_vm2, %v4348_v6  ;;  %392 = vst.msk [vmem:[#allocation2 + $0x288] sm:$0xff] %vm310_vm2, %v4348_v6 }
  0x37   : > { %393 = vst.msk [vmem:[#allocation2 + $0x290] sm:$0xff] %vm310_vm2, %v4348_v6  ;;  %394 = vst.msk [vmem:[#allocation2 + $0x298] sm:$0xff] %vm310_vm2, %v4348_v6 }
  0x38   : > { %395 = vst.msk [vmem:[#allocation2 + $0x2a0] sm:$0xff] %vm310_vm2, %v4348_v6  ;;  %396 = vst.msk [vmem:[#allocation2 + $0x2a8] sm:$0xff] %vm310_vm2, %v4348_v6 }
  0x39   : > { %397 = vst.msk [vmem:[#allocation2 + $0x2b0] sm:$0xff] %vm310_vm2, %v4348_v6  ;;  %398 = vst.msk [vmem:[#allocation2 + $0x2b8] sm:$0xff] %vm310_vm2, %v4348_v6  ;;  %4111 = vmatmul.mubr.msk.bf16.gmra.mxu0 %vm1030_vm3, %v4263_v16  ;;  %4175 = vmatmul.mubr.msk.bf16.gmra.mxu1 %vm1030_vm3, %v4295_v33 }
  0x3a   : > { %399 = vst.msk [vmem:[#allocation2 + $0x2c0] sm:$0xff] %vm310_vm2, %v4348_v6  ;;  %400 = vst.msk [vmem:[#allocation2 + $0x2c8] sm:$0xff] %vm310_vm2, %v4348_v6  ;;  %4114 = vmatprep.mubr.msk.bf16.mxu0 %vm1030_vm3, %v4264_v17  ;;  %4178 = vmatprep.mubr.msk.bf16.mxu1 %vm1030_vm3, %v4296_v34 }
  0x3b   : > { %401 = vst.msk [vmem:[#allocation2 + $0x2d0] sm:$0xff] %vm310_vm2, %v4348_v6  ;;  %402 = vst.msk [vmem:[#allocation2 + $0x2d8] sm:$0xff] %vm310_vm2, %v4348_v6 }
  0x3c   : > { %403 = vst.msk [vmem:[#allocation2 + $0x2e0] sm:$0xff] %vm310_vm2, %v4348_v6  ;;  %404 = vst.msk [vmem:[#allocation2 + $0x2e8] sm:$0xff] %vm310_vm2, %v4348_v6 }
  0x3d   : > { %405 = vst.msk [vmem:[#allocation2 + $0x2f0] sm:$0xff] %vm310_vm2, %v4348_v6  ;;  %406 = vst.msk [vmem:[#allocation2 + $0x2f8] sm:$0xff] %vm310_vm2, %v4348_v6 }
  0x3e   : > { %407 = vst.msk [vmem:[#allocation2 + $0x300] sm:$0xff] %vm310_vm2, %v4348_v6  ;;  %408 = vst.msk [vmem:[#allocation2 + $0x308] sm:$0xff] %vm310_vm2, %v4348_v6 }
  0x3f   : > { %409 = vst.msk [vmem:[#allocation2 + $0x310] sm:$0xff] %vm310_vm2, %v4348_v6  ;;  %410 = vst.msk [vmem:[#allocation2 + $0x318] sm:$0xff] %vm310_vm2, %v4348_v6 }
  0x40   : > { %411 = vst.msk [vmem:[#allocation2 + $0x320] sm:$0xff] %vm310_vm2, %v4348_v6  ;;  %412 = vst.msk [vmem:[#allocation2 + $0x328] sm:$0xff] %vm310_vm2, %v4348_v6 }
  0x41   : > { %413 = vst.msk [vmem:[#allocation2 + $0x330] sm:$0xff] %vm310_vm2, %v4348_v6  ;;  %414 = vst.msk [vmem:[#allocation2 + $0x338] sm:$0xff] %vm310_vm2, %v4348_v6  ;;  %4115 = vmatmul.mubr.msk.bf16.gmra.mxu0 %vm1030_vm3, %v4265_v23  ;;  %4179 = vmatmul.mubr.msk.bf16.gmra.mxu1 %vm1030_vm3, %v4297_v37  ;;  %v449_v37 = vld [vmem:[#allocation2 + $0x50] sm:$0xff] }
  0x42   : > { %415 = vst.msk [vmem:[#allocation2 + $0x340] sm:$0xff] %vm310_vm2, %v4348_v6  ;;  %416 = vst.msk [vmem:[#allocation2 + $0x348] sm:$0xff] %vm310_vm2, %v4348_v6  ;;  %4118 = vmatprep.mubr.msk.bf16.mxu0 %vm1030_vm3, %v4266_v24  ;;  %4182 = vmatprep.mubr.msk.bf16.mxu1 %vm1030_vm3, %v4298_v38 }
  0x43   : > { %417 = vst.msk [vmem:[#allocation2 + $0x350] sm:$0xff] %vm310_vm2, %v4348_v6  ;;  %418 = vst.msk [vmem:[#allocation2 + $0x358] sm:$0xff] %vm310_vm2, %v4348_v6 }
  0x44   : > { %419 = vst.msk [vmem:[#allocation2 + $0x360] sm:$0xff] %vm310_vm2, %v4348_v6  ;;  %420 = vst.msk [vmem:[#allocation2 + $0x368] sm:$0xff] %vm310_vm2, %v4348_v6 }
  0x45   : > { %421 = vst.msk [vmem:[#allocation2 + $0x370] sm:$0xff] %vm310_vm2, %v4348_v6  ;;  %422 = vst.msk [vmem:[#allocation2 + $0x378] sm:$0xff] %vm310_vm2, %v4348_v6 }
  0x46   : > { %423 = vst.msk [vmem:[#allocation2 + $0x380] sm:$0xff] %vm310_vm2, %v4348_v6  ;;  %424 = vst.msk [vmem:[#allocation2 + $0x388] sm:$0xff] %vm310_vm2, %v4348_v6 }
  0x47   : > { %425 = vst.msk [vmem:[#allocation2 + $0x390] sm:$0xff] %vm310_vm2, %v4348_v6  ;;  %426 = vst.msk [vmem:[#allocation2 + $0x398] sm:$0xff] %vm310_vm2, %v4348_v6 }
  0x48   : > { %427 = vst.msk [vmem:[#allocation2 + $0x3a0] sm:$0xff] %vm310_vm2, %v4348_v6  ;;  %428 = vst.msk [vmem:[#allocation2 + $0x3a8] sm:$0xff] %vm310_vm2, %v4348_v6 }
  0x49   : > { %429 = vst.msk [vmem:[#allocation2 + $0x3b0] sm:$0xff] %vm310_vm2, %v4348_v6  ;;  %430 = vst.msk [vmem:[#allocation2 + $0x3b8] sm:$0xff] %vm310_vm2, %v4348_v6  ;;  %4119 = vmatmul.mubr.msk.bf16.gmra.mxu0 %vm1030_vm3, %v4267_v27  ;;  %4183 = vmatmul.mubr.msk.bf16.gmra.mxu1 %vm1030_vm3, %v4299_v41  ;;  %v446_v27 = vld [vmem:[#allocation2 + $0x38] sm:$0xff] }
  0x4a   : > { %431 = vst.msk [vmem:[#allocation2 + $0x3c0] sm:$0xff] %vm310_vm2, %v4348_v6  ;;  %432 = vst.msk [vmem:[#allocation2 + $0x3c8] sm:$0xff] %vm310_vm2, %v4348_v6  ;;  %4122 = vmatprep.mubr.msk.bf16.mxu0 %vm1030_vm3, %v4268_v28  ;;  %4186 = vmatprep.mubr.msk.bf16.mxu1 %vm1030_vm3, %v4300_v42 }
  0x4b   : > { %433 = vst.msk [vmem:[#allocation2 + $0x3d0] sm:$0xff] %vm310_vm2, %v4348_v6  ;;  %434 = vst.msk [vmem:[#allocation2 + $0x3d8] sm:$0xff] %vm310_vm2, %v4348_v6 }
  0x4c   : > { %435 = vst.msk [vmem:[#allocation2 + $0x3e0] sm:$0xff] %vm310_vm2, %v4348_v6  ;;  %436 = vst.msk [vmem:[#allocation2 + $0x3e8] sm:$0xff] %vm310_vm2, %v4348_v6 }
  0x4d   : > { %437 = vst.msk [vmem:[#allocation2 + $0x3f0] sm:$0xff] %vm310_vm2, %v4348_v6  ;;  %438 = vst.msk [vmem:[#allocation2 + $0x3f8] sm:$0xff] %vm310_vm2, %v4348_v6  ;;  %v4317_v6 = vld [vmem:[%s4668_s27 + $0x1f8] sm:$0xff]  }
  0x51   : > { %4123 = vmatmul.mubr.msk.bf16.gmra.mxu0 %vm1030_vm3, %v4269_v31  ;;  %4187 = vmatmul.mubr.msk.bf16.gmra.mxu1 %vm1030_vm3, %v4301_v45  ;;  %v444_v31 = vld [vmem:[#allocation2 + $0x28] sm:$0xff] }
  0x52   : > { %4126 = vmatprep.mubr.msk.bf16.mxu0 %vm1030_vm3, %v4270_v32  ;;  %4190 = vmatprep.mubr.msk.bf16.mxu1 %vm1030_vm3, %v4302_v46  ;;  %v447_v46 = vld [vmem:[#allocation2 + $0x40] sm:$0xff] }
  0x59   : > { %4127 = vmatmul.mubr.msk.bf16.gmra.mxu0 %vm1030_vm3, %v4271_v35  ;;  %4191 = vmatmul.mubr.msk.bf16.gmra.mxu1 %vm1030_vm3, %v4303_v49 }
  0x5a   : > { %4130 = vmatprep.mubr.msk.bf16.mxu0 %vm1030_vm3, %v4272_v36  ;;  %4194 = vmatprep.mubr.msk.bf16.mxu1 %vm1030_vm3, %v4304_v50 }
  0x61   : > { %4131 = vmatmul.mubr.msk.bf16.gmra.mxu0 %vm1030_vm3, %v4273_v39  ;;  %4195 = vmatmul.mubr.msk.bf16.gmra.mxu1 %vm1030_vm3, %v4305_v53 }
  0x62   : > { %4134 = vmatprep.mubr.msk.bf16.mxu0 %vm1030_vm3, %v4274_v40  ;;  %4198 = vmatprep.mubr.msk.bf16.mxu1 %vm1030_vm3, %v4306_v54 }
  0x69   : > { %4135 = vmatmul.mubr.msk.bf16.gmra.mxu0 %vm1030_vm3, %v4275_v43  ;;  %4199 = vmatmul.mubr.msk.bf16.gmra.mxu1 %vm1030_vm3, %v4307_v57 }
  0x6a   : > { %4138 = vmatprep.mubr.msk.bf16.mxu0 %vm1030_vm3, %v4276_v44  ;;  %4202 = vmatprep.mubr.msk.bf16.mxu1 %vm1030_vm3, %v4308_v58 }
  0x71   : > { %4139 = vmatmul.mubr.msk.bf16.gmra.mxu0 %vm1030_vm3, %v4277_v47  ;;  %4203 = vmatmul.mubr.msk.bf16.gmra.mxu1 %vm1030_vm3, %v4309_v61 }
  0x72   : > { %4142 = vmatprep.mubr.msk.bf16.mxu0 %vm1030_vm3, %v4278_v48  ;;  %4206 = vmatprep.mubr.msk.bf16.mxu1 %vm1030_vm3, %v4310_v62  ;;  %v448_v62 = vld [vmem:[#allocation2 + $0x48] sm:$0xff] }
  0x79   : > { %4143 = vmatmul.mubr.msk.bf16.gmra.mxu0 %vm1030_vm3, %v4279_v51  ;;  %4207 = vmatmul.mubr.msk.bf16.gmra.mxu1 %vm1030_vm3, %v4311_v0 }
  0x7a   : > { %4146 = vmatprep.mubr.msk.bf16.mxu0 %vm1030_vm3, %v4280_v52  ;;  %4210 = vmatprep.mubr.msk.bf16.mxu1 %vm1030_vm3, %v4312_v1 }
  0x81   : > { %4147 = vmatmul.mubr.msk.bf16.gmra.mxu0 %vm1030_vm3, %v4281_v55  ;;  %4211 = vmatmul.mubr.msk.bf16.gmra.mxu1 %vm1030_vm3, %v4313_v2 }
  0x82   : > { %4150 = vmatprep.mubr.msk.bf16.mxu0 %vm1030_vm3, %v4282_v56  ;;  %4214 = vmatprep.mubr.msk.bf16.mxu1 %vm1030_vm3, %v4314_v3  ;;  %v450_v56 = vld [vmem:[#allocation2 + $0x58] sm:$0xff] }
  0x89   : > { %4151 = vmatmul.mubr.msk.bf16.gmra.mxu0 %vm1030_vm3, %v4283_v59  ;;  %4215 = vmatmul.mubr.msk.bf16.gmra.mxu1 %vm1030_vm3, %v4315_v4 }
  0x8a   : > { %4154 = vmatprep.mubr.msk.bf16.mxu0 %vm1030_vm3, %v4284_v60  ;;  %4218 = vmatprep.mubr.msk.bf16.mxu1 %vm1030_vm3, %v4316_v5 }
  0x91   : > { %4155 = vmatmul.mubr.msk.bf16.gmra.mxu0 %vm1030_vm3, %v4285_v63  ;;  %4219 = vmatmul.mubr.msk.bf16.gmra.mxu1 %vm1030_vm3, %v4317_v6 }
  0xd9   : > { %v4096_v8 = vpop.f32.mrf.mxu0 }
  0xda   : > { %v1777_v10 = vadd.f32 %v4096_v8, %v441_v7  ;;  %v453_v7 = vld [vmem:[#allocation2 + $0x70] sm:$0xff] }
  0xdb   : > { %v1264_v11 = vpop.f32.mrf.mxu0 }
  0xdc   : > { %1906 = vst.msk [vmem:[#allocation2 + $0x10] sm:$0xff] %vm310_vm2, %v1777_v10  ;;  %v1775_v13 = vadd.f32 %v1264_v11, %v439_v9 }
  0xdd   : > { %v4097_v14 = vpop.f32.mrf.mxu0 }
  0xde   : > { %1904 = vst.msk [vmem:[#allocation2] sm:$0xff] %vm310_vm2, %v1775_v13  ;;  %v1778_v16 = vadd.f32 %v4097_v14, %v442_v12 }
  0xdf   : > { %v1267_v17 = vpop.f32.mrf.mxu0 }
  0xe0   : > { %1907 = vst.msk [vmem:[#allocation2 + $0x18] sm:$0xff] %vm310_vm2, %v1778_v16  ;;  %v1776_v19 = vadd.f32 %v1267_v17, %v440_v15  ;;  %v451_v16 = vld [vmem:[#allocation2 + $0x60] sm:$0xff] }
  0xe1   : > { %v4100_v20 = vpop.f32.mrf.mxu0 }
  0xe2   : > { %1905 = vst.msk [vmem:[#allocation2 + $0x8] sm:$0xff] %vm310_vm2, %v1776_v19  ;;  %v1781_v22 = vadd.f32 %v4100_v20, %v445_v18 }
  0xe3   : > { %v2037_v23 = vld [vmem:[#allocation2 + $0x10] sm:$0xff]  ;;  %v1280_v24 = vpop.f32.mrf.mxu0 }
  0xe4   : > { %v3898_v25 = vpack.c.bf16 %v2037_v23, %v2037_v23  ;;  %1910 = vst.msk [vmem:[#allocation2 + $0x30] sm:$0xff] %vm310_vm2, %v1781_v22  ;;  %v1779_v26 = vadd.f32 %v1280_v24, %v443_v21  ;;  %v3069_v38 = vmul.f32 %v2037_v23, %v2037_v23  ;;  %v2807_v47 = vsel %vm310_vm2, %v2037_v23, 0.0 }
  0xe5   : > { %v2035_v28 = vld [vmem:[#allocation2] sm:$0xff]  ;;  %v4101_v29 = vpop.f32.mrf.mxu0 }
  0xe6   : > { %2678 = vst.msk [vmem:[%s4810_s30 + $0x8] sm:$0xf] %vm2675_vm4, %v3898_v25  ;;  %v3896_v30 = vpack.c.bf16 %v2035_v28, %v2035_v28  ;;  %v1782_v33 = vadd.f32 %v4101_v29, %v446_v27  ;;  %v3067_v35 = vmul.f32 %v2035_v28, %v2035_v28  ;;  %v2804_v42 = vsel %vm310_vm2, %v2035_v28, 0.0 }
  0xe7   : > { %1908 = vst.msk [vmem:[#allocation2 + $0x20] sm:$0xff] %vm310_vm2, %v1779_v26  ;;  %v2038_v32 = vld [vmem:[#allocation2 + $0x18] sm:$0xff]  ;;  %v1283_v34 = vpop.f32.mrf.mxu0  ;;  %v3198_v63 = vsel %vm310_vm2, %v3069_v38, 0.0 }
  0xe8   : > { %2676 = vst.msk [vmem:[%s4810_s30] sm:$0xf] %vm2675_vm4, %v3896_v30  ;;  %v3899_v36 = vpack.c.bf16 %v2038_v32, %v2038_v32  ;;  %v1780_v40 = vadd.f32 %v1283_v34, %v444_v31  ;;  %v3195_v52 = vsel %vm310_vm2, %v3067_v35, 0.0  ;;  %v3070_v53 = vmul.f32 %v2038_v32, %v2038_v32  ;;  %v454_v26 = vld [vmem:[#allocation2 + $0x78] sm:$0xff]  ;;  %v452_v35 = vld [vmem:[#allocation2 + $0x68] sm:$0xff] }
  0xe9   : > { %v2036_v39 = vld [vmem:[#allocation2 + $0x8] sm:$0xff]  ;;  %1911 = vst.msk [vmem:[#allocation2 + $0x38] sm:$0xff] %vm310_vm2, %v1782_v33  ;;  %v4104_v41 = vpop.f32.mrf.mxu0  ;;  %v2809_v0 = vsel %vm310_vm2, %v2038_v32, 0.0 }
  0xea   : > { %2679 = vst.msk [vmem:[%s4810_s30 + $0xc] sm:$0xf] %vm2675_vm4, %v3899_v36  ;;  %v3897_v43 = vpack.c.bf16 %v2036_v39, %v2036_v39  ;;  %v2805_v44 = vsel %vm310_vm2, %v2036_v39, 0.0  ;;  %v3068_v45 = vmul.f32 %v2036_v39, %v2036_v39  ;;  %v1785_v50 = vadd.f32 %v4104_v41, %v449_v37  ;;  %v505_v36 = vld [vmem:[#allocation2 + $0x210] sm:$0xff] }
  0xeb   : > { %v2806_v48 = vadd.f32 %v2805_v44, %v2804_v42  ;;  %v2041_v49 = vld [vmem:[#allocation2 + $0x30] sm:$0xff]  ;;  %1909 = vst.msk [vmem:[#allocation2 + $0x28] sm:$0xff] %vm310_vm2, %v1780_v40  ;;  %v1296_v51 = vpop.f32.mrf.mxu0  ;;  %v3200_v8 = vsel %vm310_vm2, %v3070_v53, 0.0  ;;  %v503_v53 = vld [vmem:[#allocation2 + $0x200] sm:$0xff] }
  0xec   : > { %2677 = vst.msk [vmem:[%s4810_s30 + $0x4] sm:$0xf] %vm2675_vm4, %v3897_v43  ;;  %v3196_v54 = vsel %vm310_vm2, %v3068_v45, 0.0  ;;  %v3902_v55 = vpack.c.bf16 %v2041_v49, %v2041_v49  ;;  %v1783_v60 = vadd.f32 %v1296_v51, %v447_v46  ;;  %v3073_v17 = vmul.f32 %v2041_v49, %v2041_v49  ;;  %v4160_v46 = vpop.f32.mrf.mxu1  ;;  %v457_v51 = vld [vmem:[#allocation2 + $0x90] sm:$0xff] }
  0xed   : > { %v2808_v57 = vadd.f32 %v2807_v47, %v2806_v48  ;;  %v3197_v58 = vadd.f32 %v3196_v54, %v3195_v52  ;;  %1914 = vst.msk [vmem:[#allocation2 + $0x50] sm:$0xff] %vm310_vm2, %v1785_v50  ;;  %v4105_v61 = vpop.f32.mrf.mxu0  ;;  %v2815_v30 = vsel %vm310_vm2, %v2041_v49, 0.0  ;;  %v1841_v52 = vadd.f32 %v4160_v46, %v505_v36  ;;  %v459_v46 = vld [vmem:[#allocation2 + $0xa0] sm:$0xff] }
  0xee   : > { %v2039_v59 = vld [vmem:[#allocation2 + $0x20] sm:$0xff]  ;;  %2682 = vst.msk [vmem:[%s4810_s30 + $0x18] sm:$0xf] %vm2675_vm4, %v3902_v55  ;;  %v1786_v5 = vadd.f32 %v4105_v61, %v450_v56  ;;  %v3206_v41 = vsel %vm310_vm2, %v3073_v17, 0.0 }
  0xef   : > { %v3900_v1 = vpack.c.bf16 %v2039_v59, %v2039_v59  ;;  %v3071_v2 = vmul.f32 %v2039_v59, %v2039_v59  ;;  %v2810_v3 = vadd.f32 %v2809_v0, %v2808_v57  ;;  %v3199_v4 = vadd.f32 %v3198_v63, %v3197_v58  ;;  %1912 = vst.msk [vmem:[#allocation2 + $0x40] sm:$0xff] %vm310_vm2, %v1783_v60  ;;  %v1299_v6 = vpop.f32.mrf.mxu0  ;;  %v1520_v60 = vpop.f32.mrf.mxu1 }
  0xf0   : > { %v2811_v9 = vsel %vm310_vm2, %v2039_v59, 0.0  ;;  %v2042_v10 = vld [vmem:[#allocation2 + $0x38] sm:$0xff]  ;;  %v1784_v11 = vadd.f32 %v1299_v6, %v448_v62  ;;  %1915 = vst.msk [vmem:[#allocation2 + $0x58] sm:$0xff] %vm310_vm2, %v1786_v5  ;;  %1970 = vst.msk [vmem:[#allocation2 + $0x210] sm:$0xff] %vm310_vm2, %v1841_v52 }
  0xf1   : > { %2680 = vst.msk [vmem:[%s4810_s30 + $0x10] sm:$0xf] %vm2675_vm4, %v3900_v1  ;;  %v3201_v12 = vadd.f32 %v3200_v8, %v3199_v4  ;;  %v2812_v13 = vadd.f32 %v2811_v9, %v2810_v3  ;;  %v3903_v14 = vpack.c.bf16 %v2042_v10, %v2042_v10  ;;  %v4108_v15 = vpop.f32.mrf.mxu0  ;;  %v3202_v18 = vsel %vm310_vm2, %v3071_v2, 0.0  ;;  %v455_v1 = vld [vmem:[#allocation2 + $0x80] sm:$0xff]  ;;  %v506_v2 = vld [vmem:[#allocation2 + $0x218] sm:$0xff]  ;;  %v4161_v9 = vpop.f32.mrf.mxu1 }
  0xf2   : > { %v2040_v19 = vld [vmem:[#allocation2 + $0x28] sm:$0xff]  ;;  %1913 = vst.msk [vmem:[#allocation2 + $0x48] sm:$0xff] %vm310_vm2, %v1784_v11  ;;  %v1789_v20 = vadd.f32 %v4108_v15, %v453_v7  ;;  %v3074_v31 = vmul.f32 %v2042_v10, %v2042_v10  ;;  %v2817_v42 = vsel %vm310_vm2, %v2042_v10, 0.0  ;;  %v1839_v8 = vadd.f32 %v1520_v60, %v503_v53 }
  0xf3   : > { %v3203_v21 = vadd.f32 %v3202_v18, %v3201_v12  ;;  %2683 = vst.msk [vmem:[%s4810_s30 + $0x1c] sm:$0xf] %vm2675_vm4, %v3903_v14  ;;  %v3901_v22 = vpack.c.bf16 %v2040_v19, %v2040_v19  ;;  %v2813_v23 = vsel %vm310_vm2, %v2040_v19, 0.0  ;;  %v3072_v24 = vmul.f32 %v2040_v19, %v2040_v19  ;;  %v1312_v25 = vpop.f32.mrf.mxu0  ;;  %v458_v14 = vld [vmem:[#allocation2 + $0x98] sm:$0xff]  ;;  %v504_v15 = vld [vmem:[#allocation2 + $0x208] sm:$0xff] }
  0xf4   : > { %v2814_v27 = vadd.f32 %v2813_v23, %v2812_v13  ;;  %v2045_v28 = vld [vmem:[#allocation2 + $0x50] sm:$0xff]  ;;  %1918 = vst.msk [vmem:[#allocation2 + $0x70] sm:$0xff] %vm310_vm2, %v1789_v20  ;;  %v1787_v29 = vadd.f32 %v1312_v25, %v451_v16  ;;  %v3208_v54 = vsel %vm310_vm2, %v3074_v31, 0.0  ;;  %1968 = vst.msk [vmem:[#allocation2 + $0x200] sm:$0xff] %vm310_vm2, %v1839_v8 }
  0xf5   : > { %2681 = vst.msk [vmem:[%s4810_s30 + $0x14] sm:$0xf] %vm2675_vm4, %v3901_v22  ;;  %v3204_v32 = vsel %vm310_vm2, %v3072_v24, 0.0  ;;  %v3906_v33 = vpack.c.bf16 %v2045_v28, %v2045_v28  ;;  %v4109_v34 = vpop.f32.mrf.mxu0  ;;  %v3077_v55 = vmul.f32 %v2045_v28, %v2045_v28  ;;  %v2823_v16 = vsel %vm310_vm2, %v2045_v28, 0.0  ;;  %v1523_v22 = vpop.f32.mrf.mxu1  ;;  %v509_v28 = vld [vmem:[#allocation2 + $0x230] sm:$0xff] }
  0xf6   : > { %v2816_v37 = vadd.f32 %v2815_v30, %v2814_v27  ;;  %v3205_v38 = vadd.f32 %v3204_v32, %v3203_v21  ;;  %v2043_v39 = vld [vmem:[#allocation2 + $0x40] sm:$0xff]  ;;  %1916 = vst.msk [vmem:[#allocation2 + $0x60] sm:$0xff] %vm310_vm2, %v1787_v29  ;;  %v1790_v40 = vadd.f32 %v4109_v34, %v454_v26  ;;  %v1842_v21 = vadd.f32 %v4161_v9, %v506_v2  ;;  %v456_v27 = vld [vmem:[#allocation2 + $0x88] sm:$0xff] }
  0xf7   : > { %2686 = vst.msk [vmem:[%s4810_s30 + $0x28] sm:$0xf] %vm2675_vm4, %v3906_v33  ;;  %v3904_v43 = vpack.c.bf16 %v2043_v39, %v2043_v39  ;;  %v3075_v44 = vmul.f32 %v2043_v39, %v2043_v39  ;;  %v1315_v45 = vpop.f32.mrf.mxu0  ;;  %v2046_v49 = vld [vmem:[#allocation2 + $0x58] sm:$0xff]  ;;  %v2819_v56 = vsel %vm310_vm2, %v2043_v39, 0.0  ;;  %v3214_v23 = vsel %vm310_vm2, %v3077_v55, 0.0 }
  0xf8   : > { %v2818_v47 = vadd.f32 %v2817_v42, %v2816_v37  ;;  %v3207_v48 = vadd.f32 %v3206_v41, %v3205_v38  ;;  %1919 = vst.msk [vmem:[#allocation2 + $0x78] sm:$0xff] %vm310_vm2, %v1790_v40  ;;  %v1788_v50 = vadd.f32 %v1315_v45, %v452_v35  ;;  %v3907_v57 = vpack.c.bf16 %v2046_v49, %v2046_v49  ;;  %v4164_v35 = vpop.f32.mrf.mxu1  ;;  %v461_v40 = vld [vmem:[#allocation2 + $0xb0] sm:$0xff] }
  0xf9   : > { %2684 = vst.msk [vmem:[%s4810_s30 + $0x20] sm:$0xf] %vm2675_vm4, %v3904_v43  ;;  %v2044_v58 = vld [vmem:[#allocation2 + $0x48] sm:$0xff]  ;;  %v4112_v59 = vpop.f32.mrf.mxu0  ;;  %v3210_v3 = vsel %vm310_vm2, %v3075_v44, 0.0  ;;  %v3078_v11 = vmul.f32 %v2046_v49, %v2046_v49  ;;  %v2825_v29 = vsel %vm310_vm2, %v2046_v49, 0.0  ;;  %v1840_v34 = vadd.f32 %v1523_v22, %v504_v15 }
  0xfa   : > { %v3209_v61 = vadd.f32 %v3208_v54, %v3207_v48  ;;  %v2820_v62 = vadd.f32 %v2819_v56, %v2818_v47  ;;  %v3905_v63 = vpack.c.bf16 %v2044_v58, %v2044_v58  ;;  %v2821_v0 = vsel %vm310_vm2, %v2044_v58, 0.0  ;;  %1917 = vst.msk [vmem:[#allocation2 + $0x68] sm:$0xff] %vm310_vm2, %v1788_v50  ;;  %1971 = vst.msk [vmem:[#allocation2 + $0x218] sm:$0xff] %vm310_vm2, %v1842_v21  ;;  %v2101_v47 = vld [vmem:[#allocation2 + $0x210] sm:$0xff]  ;;  %v4890_v49 = vpop.f32.mrf.mxu1 }
  0xfb   : > { %2687 = vst.msk [vmem:[%s4810_s30 + $0x2c] sm:$0xf] %vm2675_vm4, %v3907_v57  ;;  %v3076_v4 = vmul.f32 %v2044_v58, %v2044_v58  ;;  %v4866_v5 = vld [vmem:[#allocation2 + $0x70] sm:$0xff]  ;;  %v1793_v6 = vadd.f32 %v4112_v59, %v457_v51  ;;  %v1328_v7 = vpop.f32.mrf.mxu0  ;;  %v3216_v36 = vsel %vm310_vm2, %v3078_v11, 0.0  ;;  %v1845_v48 = vadd.f32 %v4164_v35, %v509_v28  ;;  %v462_v58 = vld [vmem:[#allocation2 + $0xb8] sm:$0xff] }
  0xfc   : > { %v3211_v10 = vadd.f32 %v3210_v3, %v3209_v61  ;;  %2685 = vst.msk [vmem:[%s4810_s30 + $0x24] sm:$0xf] %vm2675_vm4, %v3905_v63  ;;  %v2822_v12 = vadd.f32 %v2821_v0, %v2820_v62  ;;  %v3910_v13 = vpack.c.bf16 %v4866_v5, %v4866_v5  ;;  %v1791_v19 = vadd.f32 %v1328_v7, %v455_v1  ;;  %v4898_v60 = vpop.f32.mrf.mxu1  ;;  %v460_v7 = vld [vmem:[#allocation2 + $0xa8] sm:$0xff] }
  0xfd   : > { %v3212_v17 = vsel %vm310_vm2, %v3076_v4, 0.0  ;;  %v2047_v18 = vld [vmem:[#allocation2 + $0x60] sm:$0xff]  ;;  %1922 = vst.msk [vmem:[#allocation2 + $0x90] sm:$0xff] %vm310_vm2, %v1793_v6  ;;  %v4113_v20 = vpop.f32.mrf.mxu0  ;;  %v3081_v41 = vmul.f32 %v4866_v5, %v4866_v5  ;;  %1969 = vst.msk [vmem:[#allocation2 + $0x208] sm:$0xff] %vm310_vm2, %v1840_v34  ;;  %v3962_v59 = vpack.c.bf16 %v2101_v47, %v2101_v47  ;;  %v2831_v1 = vsel %vm310_vm2, %v4866_v5, 0.0 }
  0xfe   : > { %v2824_v24 = vadd.f32 %v2823_v16, %v2822_v12  ;;  %v3213_v25 = vadd.f32 %v3212_v17, %v3211_v10  ;;  %2690 = vst.msk [vmem:[%s4810_s30 + $0x38] sm:$0xf] %vm2675_vm4, %v3910_v13  ;;  %v3908_v26 = vpack.c.bf16 %v2047_v18, %v2047_v18  ;;  %v3079_v30 = vmul.f32 %v2047_v18, %v2047_v18  ;;  %v4908_v8 = vpop.f32.mrf.mxu1  ;;  %v465_v17 = vld [vmem:[#allocation2 + $0xd0] sm:$0xff] }
  0xff   : > { %v2050_v31 = vld [vmem:[#allocation2 + $0x78] sm:$0xff]  ;;  %1920 = vst.msk [vmem:[#allocation2 + $0x80] sm:$0xff] %vm310_vm2, %v1791_v19  ;;  %v1794_v32 = vadd.f32 %v4113_v20, %v458_v14  ;;  %v1331_v33 = vpop.f32.mrf.mxu0  ;;  %v2827_v42 = vsel %vm310_vm2, %v2047_v18, 0.0  ;;  %1974 = vst.msk [vmem:[#allocation2 + $0x230] sm:$0xff] %vm310_vm2, %v1845_v48  ;;  %v3222_v5 = vsel %vm310_vm2, %v3081_v41, 0.0  ;;  %v2099_v18 = vld [vmem:[#allocation2 + $0x200] sm:$0xff] }
 0x100   : > { %v2826_v37 = vadd.f32 %v2825_v29, %v2824_v24  ;;  %v3215_v38 = vadd.f32 %v3214_v23, %v3213_v25  ;;  %2688 = vst.msk [vmem:[%s4810_s30 + $0x30] sm:$0xf] %vm2675_vm4, %v3908_v26  ;;  %v3911_v39 = vpack.c.bf16 %v2050_v31, %v2050_v31  ;;  %v1792_v44 = vadd.f32 %v1331_v33, %v456_v27  ;;  %v4915_v19 = vpop.f32.mrf.mxu1  ;;  %v463_v29 = vld [vmem:[#allocation2 + $0xc0] sm:$0xff] }
 0x101   : > { %v2048_v43 = vld [vmem:[#allocation2 + $0x68] sm:$0xff]  ;;  %1923 = vst.msk [vmem:[#allocation2 + $0x98] sm:$0xff] %vm310_vm2, %v1794_v32  ;;  %v4116_v45 = vpop.f32.mrf.mxu0  ;;  %v3218_v54 = vsel %vm310_vm2, %v3079_v30, 0.0  ;;  %v3082_v2 = vmul.f32 %v2050_v31, %v2050_v31  ;;  %v2833_v13 = vsel %vm310_vm2, %v2050_v31, 0.0  ;;  %v3960_v35 = vpack.c.bf16 %v2099_v18, %v2099_v18 }
 0x102   : > { %v3217_v50 = vadd.f32 %v3216_v36, %v3215_v38  ;;  %v2828_v51 = vadd.f32 %v2827_v42, %v2826_v37  ;;  %2691 = vst.msk [vmem:[%s4810_s30 + $0x3c] sm:$0xf] %vm2675_vm4, %v3911_v39  ;;  %v3909_v52 = vpack.c.bf16 %v2048_v43, %v2048_v43  ;;  %v2829_v53 = vsel %vm310_vm2, %v2048_v43, 0.0  ;;  %2742 = vst.msk [vmem:[%s4810_s30 + $0x108] sm:$0xf] %vm2675_vm4, %v3962_v59  ;;  %v4922_v30 = vpop.f32.mrf.mxu1 }
 0x103   : > { %v3080_v55 = vmul.f32 %v2048_v43, %v2048_v43  ;;  %1921 = vst.msk [vmem:[#allocation2 + $0x88] sm:$0xff] %vm310_vm2, %v1792_v44  ;;  %v1797_v56 = vadd.f32 %v4116_v45, %v461_v40  ;;  %v1344_v57 = vpop.f32.mrf.mxu0  ;;  %v3224_v24 = vsel %vm310_vm2, %v3082_v2, 0.0 }
 0x104   : > { %v3219_v61 = vadd.f32 %v3218_v54, %v3217_v50  ;;  %2689 = vst.msk [vmem:[%s4810_s30 + $0x34] sm:$0xf] %vm2675_vm4, %v3909_v52  ;;  %v2830_v62 = vadd.f32 %v2829_v53, %v2828_v51  ;;  %v2053_v63 = vld [vmem:[#allocation2 + $0x90] sm:$0xff]  ;;  %v1795_v0 = vadd.f32 %v1344_v57, %v459_v46  ;;  %v4929_v41 = vpop.f32.mrf.mxu1  ;;  %v466_v46 = vld [vmem:[#allocation2 + $0xd8] sm:$0xff]  ;;  %2740 = vst.msk [vmem:[%s4810_s30 + $0x100] sm:$0xf] %vm2675_vm4, %v3960_v35 }
 0x105   : > { %v3220_v3 = vsel %vm310_vm2, %v3080_v55, 0.0  ;;  %v3914_v4 = vpack.c.bf16 %v2053_v63, %v2053_v63  ;;  %1926 = vst.msk [vmem:[#allocation2 + $0xb0] sm:$0xff] %vm310_vm2, %v1797_v56  ;;  %v4117_v6 = vpop.f32.mrf.mxu0  ;;  %v3085_v25 = vmul.f32 %v2053_v63, %v2053_v63  ;;  %v2839_v47 = vsel %vm310_vm2, %v2053_v63, 0.0 }
 0x106   : > { %v2832_v9 = vadd.f32 %v2831_v1, %v2830_v62  ;;  %v3221_v10 = vadd.f32 %v3220_v3, %v3219_v61  ;;  %v2051_v11 = vld [vmem:[#allocation2 + $0x80] sm:$0xff]  ;;  %1924 = vst.msk [vmem:[#allocation2 + $0xa0] sm:$0xff] %vm310_vm2, %v1795_v0  ;;  %v1798_v12 = vadd.f32 %v4117_v6, %v462_v58  ;;  %v4938_v54 = vpop.f32.mrf.mxu1  ;;  %v464_v58 = vld [vmem:[#allocation2 + $0xc8] sm:$0xff] }
 0x107   : > { %2694 = vst.msk [vmem:[%s4810_s30 + $0x48] sm:$0xf] %vm2675_vm4, %v3914_v4  ;;  %v3912_v14 = vpack.c.bf16 %v2051_v11, %v2051_v11  ;;  %v3083_v15 = vmul.f32 %v2051_v11, %v2051_v11  ;;  %v1347_v16 = vpop.f32.mrf.mxu0  ;;  %v2835_v26 = vsel %vm310_vm2, %v2051_v11, 0.0  ;;  %v3230_v59 = vsel %vm310_vm2, %v3085_v25, 0.0 }
 0x108   : > { %v2834_v20 = vadd.f32 %v2833_v13, %v2832_v9  ;;  %v3223_v21 = vadd.f32 %v3222_v5, %v3221_v10  ;;  %v2054_v22 = vld [vmem:[#allocation2 + $0x98] sm:$0xff]  ;;  %1927 = vst.msk [vmem:[#allocation2 + $0xb8] sm:$0xff] %vm310_vm2, %v1798_v12  ;;  %v1796_v23 = vadd.f32 %v1347_v16, %v460_v7  ;;  %v4945_v2 = vpop.f32.mrf.mxu1  ;;  %v469_v7 = vld [vmem:[#allocation2 + $0xf0] sm:$0xff] }
 0x109   : > { %2692 = vst.msk [vmem:[%s4810_s30 + $0x40] sm:$0xf] %vm2675_vm4, %v3912_v14  ;;  %v3915_v27 = vpack.c.bf16 %v2054_v22, %v2054_v22  ;;  %v4120_v28 = vpop.f32.mrf.mxu0  ;;  %v3226_v36 = vsel %vm310_vm2, %v3083_v15, 0.0  ;;  %v3086_v48 = vmul.f32 %v2054_v22, %v2054_v22  ;;  %v2841_v61 = vsel %vm310_vm2, %v2054_v22, 0.0  ;;  %v2102_v9 = vld [vmem:[#allocation2 + $0x218] sm:$0xff] }
 0x10a   : > { %v3225_v31 = vadd.f32 %v3224_v24, %v3223_v21  ;;  %v2836_v32 = vadd.f32 %v2835_v26, %v2834_v20  ;;  %v2052_v33 = vld [vmem:[#allocation2 + $0x88] sm:$0xff]  ;;  %1925 = vst.msk [vmem:[#allocation2 + $0xa8] sm:$0xff] %vm310_vm2, %v1796_v23  ;;  %v1801_v34 = vadd.f32 %v4120_v28, %v465_v17  ;;  %v4952_v15 = vpop.f32.mrf.mxu1  ;;  %v467_v21 = vld [vmem:[#allocation2 + $0xe0] sm:$0xff] }
 0x10b   : > { %2695 = vst.msk [vmem:[%s4810_s30 + $0x4c] sm:$0xf] %vm2675_vm4, %v3915_v27  ;;  %v3913_v37 = vpack.c.bf16 %v2052_v33, %v2052_v33  ;;  %v2837_v38 = vsel %vm310_vm2, %v2052_v33, 0.0  ;;  %v3084_v39 = vmul.f32 %v2052_v33, %v2052_v33  ;;  %v1360_v40 = vpop.f32.mrf.mxu0  ;;  %v3232_v10 = vsel %vm310_vm2, %v3086_v48, 0.0  ;;  %v470_v33 = vld [vmem:[#allocation2 + $0xf8] sm:$0xff] }
 0x10c   : > { %v3227_v42 = vadd.f32 %v3226_v36, %v3225_v31  ;;  %v2838_v43 = vadd.f32 %v2837_v38, %v2836_v32  ;;  %v2057_v44 = vld [vmem:[#allocation2 + $0xb0] sm:$0xff]  ;;  %1930 = vst.msk [vmem:[#allocation2 + $0xd0] sm:$0xff] %vm310_vm2, %v1801_v34  ;;  %v1799_v45 = vadd.f32 %v1360_v40, %v463_v29  ;;  %v3963_v27 = vpack.c.bf16 %v2102_v9, %v2102_v9  ;;  %v4961_v28 = vpop.f32.mrf.mxu1  ;;  %v468_v40 = vld [vmem:[#allocation2 + $0xe8] sm:$0xff] }
 0x10d   : > { %2693 = vst.msk [vmem:[%s4810_s30 + $0x44] sm:$0xf] %vm2675_vm4, %v3913_v37  ;;  %v3228_v50 = vsel %vm310_vm2, %v3084_v39, 0.0  ;;  %v3918_v51 = vpack.c.bf16 %v2057_v44, %v2057_v44  ;;  %v2055_v52 = vld [vmem:[#allocation2 + $0xa0] sm:$0xff]  ;;  %v4121_v53 = vpop.f32.mrf.mxu0  ;;  %v3089_v11 = vmul.f32 %v2057_v44, %v2057_v44  ;;  %v2847_v34 = vsel %vm310_vm2, %v2057_v44, 0.0 }
 0x10e   : > { %v2840_v55 = vadd.f32 %v2839_v47, %v2838_v43  ;;  %v3229_v56 = vadd.f32 %v3228_v50, %v3227_v42  ;;  %v3916_v57 = vpack.c.bf16 %v2055_v52, %v2055_v52  ;;  %1928 = vst.msk [vmem:[#allocation2 + $0xc0] sm:$0xff] %vm310_vm2, %v1799_v45  ;;  %v3087_v62 = vmul.f32 %v2055_v52, %v2055_v52  ;;  %v2100_v42 = vld [vmem:[#allocation2 + $0x208] sm:$0xff]  ;;  %v4972_v43 = vpop.f32.mrf.mxu1 }
 0x10f   : > { %2698 = vst.msk [vmem:[%s4810_s30 + $0x58] sm:$0xf] %vm2675_vm4, %v3918_v51  ;;  %v2058_v63 = vld [vmem:[#allocation2 + $0xb8] sm:$0xff]  ;;  %v1802_v0 = vadd.f32 %v4121_v53, %v466_v46  ;;  %v1363_v1 = vpop.f32.mrf.mxu0  ;;  %v2843_v12 = vsel %vm310_vm2, %v2055_v52, 0.0  ;;  %2743 = vst.msk [vmem:[%s4810_s30 + $0x10c] sm:$0xf] %vm2675_vm4, %v3963_v27 }
 0x110   : > { %v2842_v3 = vadd.f32 %v2841_v61, %v2840_v55  ;;  %v3231_v4 = vadd.f32 %v3230_v59, %v3229_v56  ;;  %2696 = vst.msk [vmem:[%s4810_s30 + $0x50] sm:$0xf] %vm2675_vm4, %v3916_v57  ;;  %v3919_v6 = vpack.c.bf16 %v2058_v63, %v2058_v63  ;;  %v1800_v13 = vadd.f32 %v1363_v1, %v464_v58  ;;  %v473_v53 = vld [vmem:[#allocation2 + $0x110] sm:$0xff]  ;;  %v4979_v55 = vpop.f32.mrf.mxu1 }
 0x111   : > { %v2056_v5 = vld [vmem:[#allocation2 + $0xa8] sm:$0xff]  ;;  %1931 = vst.msk [vmem:[#allocation2 + $0xd8] sm:$0xff] %vm310_vm2, %v1802_v0  ;;  %v4124_v14 = vpop.f32.mrf.mxu0  ;;  %v3234_v22 = vsel %vm310_vm2, %v3087_v62, 0.0  ;;  %v3090_v35 = vmul.f32 %v2058_v63, %v2058_v63  ;;  %v3238_v47 = vsel %vm310_vm2, %v3089_v11, 0.0  ;;  %v2849_v48 = vsel %vm310_vm2, %v2058_v63, 0.0 }
 0x112   : > { %v3233_v16 = vadd.f32 %v3232_v10, %v3231_v4  ;;  %v2844_v17 = vadd.f32 %v2843_v12, %v2842_v3  ;;  %2699 = vst.msk [vmem:[%s4810_s30 + $0x5c] sm:$0xf] %vm2675_vm4, %v3919_v6  ;;  %v3917_v18 = vpack.c.bf16 %v2056_v5, %v2056_v5  ;;  %v2845_v20 = vsel %vm310_vm2, %v2056_v5, 0.0  ;;  %v471_v3 = vld [vmem:[#allocation2 + $0x100] sm:$0xff]  ;;  %v4986_v4 = vpop.f32.mrf.mxu1 }
 0x113   : > { %v3088_v23 = vmul.f32 %v2056_v5, %v2056_v5  ;;  %v4958_v24 = vld [vmem:[#allocation2 + $0xd0] sm:$0xff]  ;;  %1929 = vst.msk [vmem:[#allocation2 + $0xc8] sm:$0xff] %vm310_vm2, %v1800_v13  ;;  %v1805_v25 = vadd.f32 %v4124_v14, %v469_v7  ;;  %v1376_v26 = vpop.f32.mrf.mxu0  ;;  %v3961_v61 = vpack.c.bf16 %v2100_v42, %v2100_v42  ;;  %v3240_v62 = vsel %vm310_vm2, %v3090_v35, 0.0 }
 0x114   : > { %v3235_v29 = vadd.f32 %v3234_v22, %v3233_v16  ;;  %2697 = vst.msk [vmem:[%s4810_s30 + $0x54] sm:$0xf] %vm2675_vm4, %v3917_v18  ;;  %v2846_v31 = vadd.f32 %v2845_v20, %v2844_v17  ;;  %v3922_v32 = vpack.c.bf16 %v4958_v24, %v4958_v24  ;;  %v1803_v38 = vadd.f32 %v1376_v26, %v467_v21  ;;  %v474_v17 = vld [vmem:[#allocation2 + $0x118] sm:$0xff]  ;;  %v4997_v18 = vpop.f32.mrf.mxu1 }
 0x115   : > { %v3236_v36 = vsel %vm310_vm2, %v3088_v23, 0.0  ;;  %v2059_v37 = vld [vmem:[#allocation2 + $0xc0] sm:$0xff]  ;;  %1934 = vst.msk [vmem:[#allocation2 + $0xf0] sm:$0xff] %vm310_vm2, %v1805_v25  ;;  %v4125_v39 = vpop.f32.mrf.mxu0  ;;  %v3093_v7 = vmul.f32 %v4958_v24, %v4958_v24  ;;  %v2855_v25 = vsel %vm310_vm2, %v4958_v24, 0.0 }
 0x116   : > { %v2848_v45 = vadd.f32 %v2847_v34, %v2846_v31  ;;  %v3237_v46 = vadd.f32 %v3236_v36, %v3235_v29  ;;  %2702 = vst.msk [vmem:[%s4810_s30 + $0x68] sm:$0xf] %vm2675_vm4, %v3922_v32  ;;  %v3920_v44 = vpack.c.bf16 %v2059_v37, %v2059_v37  ;;  %v3091_v50 = vmul.f32 %v2059_v37, %v2059_v37  ;;  %v472_v32 = vld [vmem:[#allocation2 + $0x108] sm:$0xff] }
 0x117   : > { %1932 = vst.msk [vmem:[#allocation2 + $0xe0] sm:$0xff] %vm310_vm2, %v1803_v38  ;;  %v1806_v51 = vadd.f32 %v4125_v39, %v470_v33  ;;  %v1379_v52 = vpop.f32.mrf.mxu0  ;;  %v2851_v63 = vsel %vm310_vm2, %v2059_v37, 0.0  ;;  %v5005_v33 = vpop.f32.mrf.mxu1  ;;  %v3246_v38 = vsel %vm310_vm2, %v3093_v7, 0.0 }
 0x118   : > { %v2850_v56 = vadd.f32 %v2849_v48, %v2848_v45  ;;  %v3239_v57 = vadd.f32 %v3238_v47, %v3237_v46  ;;  %2700 = vst.msk [vmem:[%s4810_s30 + $0x60] sm:$0xf] %vm2675_vm4, %v3920_v44  ;;  %v2062_v58 = vld [vmem:[#allocation2 + $0xd8] sm:$0xff]  ;;  %v1804_v59 = vadd.f32 %v1379_v52, %v468_v40  ;;  %2741 = vst.msk [vmem:[%s4810_s30 + $0x104] sm:$0xf] %vm2675_vm4, %v3961_v61  ;;  %v3242_v12 = vsel %vm310_vm2, %v3091_v50, 0.0 }
 0x119   : > { %v3923_v0 = vpack.c.bf16 %v2062_v58, %v2062_v58  ;;  %1935 = vst.msk [vmem:[#allocation2 + $0xf8] sm:$0xff] %vm310_vm2, %v1806_v51  ;;  %v4128_v1 = vpop.f32.mrf.mxu0  ;;  %v3094_v26 = vmul.f32 %v2062_v58, %v2062_v58  ;;  %v2857_v24 = vsel %vm310_vm2, %v2062_v58, 0.0  ;;  %v5012_v45 = vpop.f32.mrf.mxu1  ;;  %v477_v50 = vld [vmem:[#allocation2 + $0x130] sm:$0xff] }
 0x11a   : > { %v3241_v6 = vadd.f32 %v3240_v62, %v3239_v57  ;;  %v2852_v9 = vadd.f32 %v2851_v63, %v2850_v56  ;;  %v2060_v10 = vld [vmem:[#allocation2 + $0xc8] sm:$0xff]  ;;  %1933 = vst.msk [vmem:[#allocation2 + $0xe8] sm:$0xff] %vm310_vm2, %v1804_v59  ;;  %v1809_v11 = vadd.f32 %v4128_v1, %v473_v53  ;;  %v2105_v51 = vld [vmem:[#allocation2 + $0x230] sm:$0xff] }
 0x11b   : > { %2703 = vst.msk [vmem:[%s4810_s30 + $0x6c] sm:$0xf] %vm2675_vm4, %v3923_v0  ;;  %v3921_v5 = vpack.c.bf16 %v2060_v10, %v2060_v10  ;;  %v2853_v13 = vsel %vm310_vm2, %v2060_v10, 0.0  ;;  %v3092_v14 = vmul.f32 %v2060_v10, %v2060_v10  ;;  %v1392_v16 = vpop.f32.mrf.mxu0  ;;  %v3248_v52 = vsel %vm310_vm2, %v3094_v26, 0.0  ;;  %v5019_v61 = vpop.f32.mrf.mxu1 }
 0x11c   : > { %v3243_v20 = vadd.f32 %v3242_v12, %v3241_v6  ;;  %v2854_v21 = vadd.f32 %v2853_v13, %v2852_v9  ;;  %v2065_v22 = vld [vmem:[#allocation2 + $0xf0] sm:$0xff]  ;;  %1938 = vst.msk [vmem:[#allocation2 + $0x110] sm:$0xff] %vm310_vm2, %v1809_v11  ;;  %v1807_v23 = vadd.f32 %v1392_v16, %v471_v3  ;;  %v475_v3 = vld [vmem:[#allocation2 + $0x120] sm:$0xff]  ;;  %v3966_v12 = vpack.c.bf16 %v2105_v51, %v2105_v51 }
 0x11d   : > { %2701 = vst.msk [vmem:[%s4810_s30 + $0x64] sm:$0xf] %vm2675_vm4, %v3921_v5  ;;  %v3244_v27 = vsel %vm310_vm2, %v3092_v14, 0.0  ;;  %v3926_v29 = vpack.c.bf16 %v2065_v22, %v2065_v22  ;;  %v4129_v31 = vpop.f32.mrf.mxu0  ;;  %v3097_v53 = vmul.f32 %v2065_v22, %v2065_v22  ;;  %v5028_v5 = vpop.f32.mrf.mxu1 }
 0x11e   : > { %v2856_v34 = vadd.f32 %v2855_v25, %v2854_v21  ;;  %v3245_v35 = vadd.f32 %v3244_v27, %v3243_v20  ;;  %v2063_v36 = vld [vmem:[#allocation2 + $0xe0] sm:$0xff]  ;;  %1936 = vst.msk [vmem:[#allocation2 + $0x100] sm:$0xff] %vm310_vm2, %v1807_v23  ;;  %v1810_v37 = vadd.f32 %v4129_v31, %v474_v17  ;;  %v478_v17 = vld [vmem:[#allocation2 + $0x138] sm:$0xff]  ;;  %v2863_v20 = vsel %vm310_vm2, %v2065_v22, 0.0 }
 0x11f   : > { %2706 = vst.msk [vmem:[%s4810_s30 + $0x78] sm:$0xf] %vm2675_vm4, %v3926_v29  ;;  %v3924_v39 = vpack.c.bf16 %v2063_v36, %v2063_v36  ;;  %v3095_v40 = vmul.f32 %v2063_v36, %v2063_v36  ;;  %v1395_v42 = vpop.f32.mrf.mxu0  ;;  %v2859_v56 = vsel %vm310_vm2, %v2063_v36, 0.0  ;;  %2746 = vst.msk [vmem:[%s4810_s30 + $0x118] sm:$0xf] %vm2675_vm4, %v3966_v12  ;;  %v5039_v29 = vpop.f32.mrf.mxu1  ;;  %v3254_v22 = vsel %vm310_vm2, %v3097_v53, 0.0 }
 0x120   : > { %v2858_v46 = vadd.f32 %v2857_v24, %v2856_v34  ;;  %v3247_v44 = vadd.f32 %v3246_v38, %v3245_v35  ;;  %v2066_v47 = vld [vmem:[#allocation2 + $0xf8] sm:$0xff]  ;;  %1939 = vst.msk [vmem:[#allocation2 + $0x118] sm:$0xff] %vm310_vm2, %v1810_v37  ;;  %v1808_v48 = vadd.f32 %v1395_v42, %v472_v32  ;;  %v476_v35 = vld [vmem:[#allocation2 + $0x128] sm:$0xff] }
 0x121   : > { %2704 = vst.msk [vmem:[%s4810_s30 + $0x70] sm:$0xf] %vm2675_vm4, %v3924_v39  ;;  %v3927_v57 = vpack.c.bf16 %v2066_v47, %v2066_v47  ;;  %v2064_v58 = vld [vmem:[#allocation2 + $0xe8] sm:$0xff]  ;;  %v4132_v59 = vpop.f32.mrf.mxu0  ;;  %v3250_v6 = vsel %vm310_vm2, %v3095_v40, 0.0  ;;  %v3098_v21 = vmul.f32 %v2066_v47, %v2066_v47  ;;  %v2865_v36 = vsel %vm310_vm2, %v2066_v47, 0.0  ;;  %v5046_v40 = vpop.f32.mrf.mxu1  ;;  %v482_v12 = vld [vmem:[#allocation2 + $0x158] sm:$0xff] }
 0x122   : > { %v3249_v62 = vadd.f32 %v3248_v52, %v3247_v44  ;;  %v2860_v63 = vadd.f32 %v2859_v56, %v2858_v46  ;;  %v3925_v0 = vpack.c.bf16 %v2064_v58, %v2064_v58  ;;  %v2861_v1 = vsel %vm310_vm2, %v2064_v58, 0.0  ;;  %1937 = vst.msk [vmem:[#allocation2 + $0x108] sm:$0xff] %vm310_vm2, %v1808_v48  ;;  %v481_v48 = vld [vmem:[#allocation2 + $0x150] sm:$0xff] }
 0x123   : > { %2707 = vst.msk [vmem:[%s4810_s30 + $0x7c] sm:$0xf] %vm2675_vm4, %v3927_v57  ;;  %v3096_v7 = vmul.f32 %v2064_v58, %v2064_v58  ;;  %v5026_v9 = vld [vmem:[#allocation2 + $0x110] sm:$0xff]  ;;  %v1813_v10 = vadd.f32 %v4132_v59, %v477_v50  ;;  %v1408_v11 = vpop.f32.mrf.mxu0  ;;  %v507_v50 = vld [vmem:[#allocation2 + $0x220] sm:$0xff]  ;;  %v3256_v51 = vsel %vm310_vm2, %v3098_v21, 0.0  ;;  %v510_v59 = vld [vmem:[#allocation2 + $0x238] sm:$0xff] }
 0x124   : > { %v3251_v13 = vadd.f32 %v3250_v6, %v3249_v62  ;;  %2705 = vst.msk [vmem:[%s4810_s30 + $0x74] sm:$0xf] %vm2675_vm4, %v3925_v0  ;;  %v2862_v14 = vadd.f32 %v2861_v1, %v2860_v63  ;;  %v3930_v16 = vpack.c.bf16 %v5026_v9, %v5026_v9  ;;  %v1811_v26 = vadd.f32 %v1408_v11, %v475_v3  ;;  %v479_v58 = vld [vmem:[#allocation2 + $0x140] sm:$0xff]  ;;  %v5055_v62 = vpop.f32.mrf.mxu1 }
 0x125   : > { %v3252_v23 = vsel %vm310_vm2, %v3096_v7, 0.0  ;;  %v2067_v25 = vld [vmem:[#allocation2 + $0x100] sm:$0xff]  ;;  %1942 = vst.msk [vmem:[#allocation2 + $0x130] sm:$0xff] %vm310_vm2, %v1813_v10  ;;  %v4133_v27 = vpop.f32.mrf.mxu0  ;;  %v3101_v47 = vmul.f32 %v5026_v9, %v5026_v9 }
 0x126   : > { %v2864_v31 = vadd.f32 %v2863_v20, %v2862_v14  ;;  %v3253_v32 = vadd.f32 %v3252_v23, %v3251_v13  ;;  %2710 = vst.msk [vmem:[%s4810_s30 + $0x88] sm:$0xf] %vm2675_vm4, %v3930_v16  ;;  %v3928_v34 = vpack.c.bf16 %v2067_v25, %v2067_v25  ;;  %v3099_v37 = vmul.f32 %v2067_v25, %v2067_v25  ;;  %v508_v14 = vld [vmem:[#allocation2 + $0x228] sm:$0xff]  ;;  %v5063_v16 = vpop.f32.mrf.mxu1 }
 0x127   : > { %v2070_v38 = vld [vmem:[#allocation2 + $0x118] sm:$0xff]  ;;  %1940 = vst.msk [vmem:[#allocation2 + $0x120] sm:$0xff] %vm310_vm2, %v1811_v26  ;;  %v1814_v24 = vadd.f32 %v4133_v27, %v478_v17  ;;  %v1411_v39 = vpop.f32.mrf.mxu0  ;;  %v2867_v52 = vsel %vm310_vm2, %v2067_v25, 0.0  ;;  %v1843_v13 = vadd.f32 %v4890_v49, %v507_v50  ;;  %v1846_v25 = vadd.f32 %v4898_v60, %v510_v59  ;;  %v485_v50 = vld [vmem:[#allocation2 + $0x170] sm:$0xff] }
 0x128   : > { %v2866_v42 = vadd.f32 %v2865_v36, %v2864_v31  ;;  %v3255_v46 = vadd.f32 %v3254_v22, %v3253_v32  ;;  %2708 = vst.msk [vmem:[%s4810_s30 + $0x80] sm:$0xf] %vm2675_vm4, %v3928_v34  ;;  %v3931_v44 = vpack.c.bf16 %v2070_v38, %v2070_v38  ;;  %v1812_v56 = vadd.f32 %v1411_v39, %v476_v35  ;;  %v480_v34 = vld [vmem:[#allocation2 + $0x148] sm:$0xff]  ;;  %v513_v35 = vld [vmem:[#allocation2 + $0x250] sm:$0xff]  ;;  %v5077_v22 = vpop.f32.mrf.mxu1 }
 0x129   : > { %v2068_v53 = vld [vmem:[#allocation2 + $0x108] sm:$0xff]  ;;  %1943 = vst.msk [vmem:[#allocation2 + $0x138] sm:$0xff] %vm310_vm2, %v1814_v24  ;;  %v4136_v57 = vpop.f32.mrf.mxu0  ;;  %v3258_v6 = vsel %vm310_vm2, %v3099_v37, 0.0  ;;  %v2871_v26 = vsel %vm310_vm2, %v5026_v9, 0.0  ;;  %v3102_v27 = vmul.f32 %v2070_v38, %v2070_v38  ;;  %1972 = vst.msk [vmem:[#allocation2 + $0x220] sm:$0xff] %vm310_vm2, %v1843_v13  ;;  %v1844_v24 = vadd.f32 %v4908_v8, %v508_v14 }
 0x12a   : > { %v3257_v63 = vadd.f32 %v3256_v51, %v3255_v46  ;;  %v2868_v0 = vadd.f32 %v2867_v52, %v2866_v42  ;;  %2711 = vst.msk [vmem:[%s4810_s30 + $0x8c] sm:$0xf] %vm2675_vm4, %v3931_v44  ;;  %v3929_v1 = vpack.c.bf16 %v2068_v53, %v2068_v53  ;;  %v2869_v3 = vsel %vm310_vm2, %v2068_v53, 0.0  ;;  %v511_v51 = vld [vmem:[#allocation2 + $0x240] sm:$0xff]  ;;  %v5086_v52 = vpop.f32.mrf.mxu1 }
 0x12b   : > { %v3100_v7 = vmul.f32 %v2068_v53, %v2068_v53  ;;  %1941 = vst.msk [vmem:[#allocation2 + $0x128] sm:$0xff] %vm310_vm2, %v1812_v56  ;;  %v1817_v10 = vadd.f32 %v4136_v57, %v481_v48  ;;  %v1424_v11 = vpop.f32.mrf.mxu0  ;;  %1975 = vst.msk [vmem:[#allocation2 + $0x238] sm:$0xff] %vm310_vm2, %v1846_v25  ;;  %v3262_v39 = vsel %vm310_vm2, %v3101_v47, 0.0  ;;  %v2873_v42 = vsel %vm310_vm2, %v2070_v38, 0.0 }
 0x12c   : > { %v3259_v17 = vadd.f32 %v3258_v6, %v3257_v63  ;;  %2709 = vst.msk [vmem:[%s4810_s30 + $0x84] sm:$0xf] %vm2675_vm4, %v3929_v1  ;;  %v2870_v20 = vadd.f32 %v2869_v3, %v2868_v0  ;;  %v5067_v21 = vld [vmem:[#allocation2 + $0x130] sm:$0xff]  ;;  %v1815_v23 = vadd.f32 %v1424_v11, %v479_v58  ;;  %v1849_v38 = vadd.f32 %v4915_v19, %v513_v35  ;;  %v483_v1 = vld [vmem:[#allocation2 + $0x160] sm:$0xff]  ;;  %v514_v3 = vld [vmem:[#allocation2 + $0x258] sm:$0xff]  ;;  %v5097_v6 = vpop.f32.mrf.mxu1 }
 0x12d   : > { %v3260_v31 = vsel %vm310_vm2, %v3100_v7, 0.0  ;;  %v3934_v49 = vpack.c.bf16 %v5067_v21, %v5067_v21  ;;  %1946 = vst.msk [vmem:[#allocation2 + $0x150] sm:$0xff] %vm310_vm2, %v1817_v10  ;;  %v4137_v32 = vpop.f32.mrf.mxu0  ;;  %1973 = vst.msk [vmem:[#allocation2 + $0x228] sm:$0xff] %vm310_vm2, %v1844_v24  ;;  %v3264_v47 = vsel %vm310_vm2, %v3102_v27, 0.0  ;;  %v3105_v58 = vmul.f32 %v5067_v21, %v5067_v21 }
 0x12e   : > { %v2872_v60 = vadd.f32 %v2871_v26, %v2870_v20  ;;  %v3261_v36 = vadd.f32 %v3260_v31, %v3259_v17  ;;  %v2071_v37 = vld [vmem:[#allocation2 + $0x120] sm:$0xff]  ;;  %1944 = vst.msk [vmem:[#allocation2 + $0x140] sm:$0xff] %vm310_vm2, %v1815_v23  ;;  %v1818_v9 = vadd.f32 %v4137_v32, %v482_v12  ;;  %1978 = vst.msk [vmem:[#allocation2 + $0x250] sm:$0xff] %vm310_vm2, %v1849_v38  ;;  %v5106_v25 = vpop.f32.mrf.mxu1  ;;  %v2879_v35 = vsel %vm310_vm2, %v5067_v21, 0.0  ;;  %v484_v21 = vld [vmem:[#allocation2 + $0x168] sm:$0xff] }
 0x12f   : > { %2714 = vst.msk [vmem:[%s4810_s30 + $0x98] sm:$0xf] %vm2675_vm4, %v3934_v49  ;;  %v3932_v46 = vpack.c.bf16 %v2071_v37, %v2071_v37  ;;  %v3103_v44 = vmul.f32 %v2071_v37, %v2071_v37  ;;  %v1427_v48 = vpop.f32.mrf.mxu0  ;;  %v2875_v59 = vsel %vm310_vm2, %v2071_v37, 0.0  ;;  %v1847_v12 = vadd.f32 %v4922_v30, %v511_v51  ;;  %v486_v30 = vld [vmem:[#allocation2 + $0x178] sm:$0xff] }
 0x130   : > { %v2874_v53 = vadd.f32 %v2873_v42, %v2872_v60  ;;  %v3263_v56 = vadd.f32 %v3262_v39, %v3261_v36  ;;  %v2074_v57 = vld [vmem:[#allocation2 + $0x138] sm:$0xff]  ;;  %1947 = vst.msk [vmem:[#allocation2 + $0x158] sm:$0xff] %vm310_vm2, %v1818_v9  ;;  %v1816_v8 = vadd.f32 %v1427_v48, %v480_v34  ;;  %v5111_v32 = vld [vmem:[#allocation2 + $0x220] sm:$0xff]  ;;  %v1850_v34 = vadd.f32 %v4929_v41, %v514_v3  ;;  %v5122_v39 = vpop.f32.mrf.mxu1 }
 0x131   : > { %2712 = vst.msk [vmem:[%s4810_s30 + $0x90] sm:$0xf] %vm2675_vm4, %v3932_v46  ;;  %v3935_v63 = vpack.c.bf16 %v2074_v57, %v2074_v57  ;;  %v4140_v0 = vpop.f32.mrf.mxu0  ;;  %v3266_v13 = vsel %vm310_vm2, %v3103_v44, 0.0  ;;  %v3106_v60 = vmul.f32 %v2074_v57, %v2074_v57  ;;  %v3270_v42 = vsel %vm310_vm2, %v3105_v58, 0.0 }
 0x132   : > { %v3265_v7 = vadd.f32 %v3264_v47, %v3263_v56  ;;  %v2876_v10 = vadd.f32 %v2875_v59, %v2874_v53  ;;  %v2072_v11 = vld [vmem:[#allocation2 + $0x128] sm:$0xff]  ;;  %1945 = vst.msk [vmem:[#allocation2 + $0x148] sm:$0xff] %vm310_vm2, %v1816_v8  ;;  %v1821_v19 = vadd.f32 %v4140_v0, %v485_v50  ;;  %1976 = vst.msk [vmem:[#allocation2 + $0x240] sm:$0xff] %vm310_vm2, %v1847_v12  ;;  %v2881_v48 = vsel %vm310_vm2, %v2074_v57, 0.0  ;;  %v5132_v38 = vpop.f32.mrf.mxu1 }
 0x133   : > { %2715 = vst.msk [vmem:[%s4810_s30 + $0x9c] sm:$0xf] %vm2675_vm4, %v3935_v63  ;;  %v3933_v14 = vpack.c.bf16 %v2072_v11, %v2072_v11  ;;  %v2877_v17 = vsel %vm310_vm2, %v2072_v11, 0.0  ;;  %v3104_v20 = vmul.f32 %v2072_v11, %v2072_v11  ;;  %v1440_v23 = vpop.f32.mrf.mxu0  ;;  %v3964_v8 = vpack.c.bf16 %v5111_v32, %v5111_v32  ;;  %v489_v63 = vld [vmem:[#allocation2 + $0x190] sm:$0xff] }
 0x134   : > { %v3267_v26 = vadd.f32 %v3266_v13, %v3265_v7  ;;  %v2878_v27 = vadd.f32 %v2877_v17, %v2876_v10  ;;  %v5108_v31 = vld [vmem:[#allocation2 + $0x150] sm:$0xff]  ;;  %1950 = vst.msk [vmem:[#allocation2 + $0x170] sm:$0xff] %vm310_vm2, %v1821_v19  ;;  %v1819_v49 = vadd.f32 %v1440_v23, %v483_v1  ;;  %1979 = vst.msk [vmem:[#allocation2 + $0x258] sm:$0xff] %vm310_vm2, %v1850_v34  ;;  %v3272_v57 = vsel %vm310_vm2, %v3106_v60, 0.0  ;;  %v5143_v11 = vpop.f32.mrf.mxu1  ;;  %v487_v17 = vld [vmem:[#allocation2 + $0x180] sm:$0xff] }
 0x135   : > { %2713 = vst.msk [vmem:[%s4810_s30 + $0x94] sm:$0xf] %vm2675_vm4, %v3933_v14  ;;  %v3268_v36 = vsel %vm310_vm2, %v3104_v20, 0.0  ;;  %v3938_v37 = vpack.c.bf16 %v5108_v31, %v5108_v31  ;;  %v2075_v9 = vld [vmem:[#allocation2 + $0x140] sm:$0xff]  ;;  %v4141_v24 = vpop.f32.mrf.mxu0  ;;  %v3109_v0 = vmul.f32 %v5108_v31, %v5108_v31  ;;  %2744 = vst.msk [vmem:[%s4810_s30 + $0x110] sm:$0xf] %vm2675_vm4, %v3964_v8 }
 0x136   : > { %v2880_v46 = vadd.f32 %v2879_v35, %v2878_v27  ;;  %v3269_v41 = vadd.f32 %v3268_v36, %v3267_v26  ;;  %v3936_v44 = vpack.c.bf16 %v2075_v9, %v2075_v9  ;;  %1948 = vst.msk [vmem:[#allocation2 + $0x160] sm:$0xff] %vm310_vm2, %v1819_v49  ;;  %v3107_v50 = vmul.f32 %v2075_v9, %v2075_v9  ;;  %v490_v36 = vld [vmem:[#allocation2 + $0x198] sm:$0xff] }
 0x137   : > { %2718 = vst.msk [vmem:[%s4810_s30 + $0xa8] sm:$0xf] %vm2675_vm4, %v3938_v37  ;;  %v2078_v51 = vld [vmem:[#allocation2 + $0x158] sm:$0xff]  ;;  %v1822_v53 = vadd.f32 %v4141_v24, %v486_v30  ;;  %v1443_v56 = vpop.f32.mrf.mxu0  ;;  %v2883_v1 = vsel %vm310_vm2, %v2075_v9, 0.0  ;;  %v5152_v30 = vpop.f32.mrf.mxu1  ;;  %v2887_v9 = vsel %vm310_vm2, %v5108_v31, 0.0 }
 0x138   : > { %v2882_v47 = vadd.f32 %v2881_v48, %v2880_v46  ;;  %v3271_v58 = vadd.f32 %v3270_v42, %v3269_v41  ;;  %2716 = vst.msk [vmem:[%s4810_s30 + $0xa0] sm:$0xf] %vm2675_vm4, %v3936_v44  ;;  %v3939_v59 = vpack.c.bf16 %v2078_v51, %v2078_v51  ;;  %v1820_v7 = vadd.f32 %v1443_v56, %v484_v21  ;;  %v5158_v37 = vld [vmem:[#allocation2 + $0x238] sm:$0xff]  ;;  %v488_v21 = vld [vmem:[#allocation2 + $0x188] sm:$0xff] }
 0x139   : > { %v2076_v3 = vld [vmem:[#allocation2 + $0x148] sm:$0xff]  ;;  %1951 = vst.msk [vmem:[#allocation2 + $0x178] sm:$0xff] %vm310_vm2, %v1822_v53  ;;  %v4144_v10 = vpop.f32.mrf.mxu0  ;;  %v3274_v20 = vsel %vm310_vm2, %v3107_v50, 0.0  ;;  %v3110_v24 = vmul.f32 %v2078_v51, %v2078_v51  ;;  %v5164_v48 = vpop.f32.mrf.mxu1  ;;  %v3278_v50 = vsel %vm310_vm2, %v3109_v0, 0.0  ;;  %v2889_v31 = vsel %vm310_vm2, %v2078_v51, 0.0 }
 0x13a   : > { %v3273_v19 = vadd.f32 %v3272_v57, %v3271_v58  ;;  %v2884_v12 = vadd.f32 %v2883_v1, %v2882_v47  ;;  %2719 = vst.msk [vmem:[%s4810_s30 + $0xac] sm:$0xf] %vm2675_vm4, %v3939_v59  ;;  %v3937_v13 = vpack.c.bf16 %v2076_v3, %v2076_v3  ;;  %v2885_v14 = vsel %vm310_vm2, %v2076_v3, 0.0 }
 0x13b   : > { %v3108_v23 = vmul.f32 %v2076_v3, %v2076_v3  ;;  %v5149_v26 = vld [vmem:[#allocation2 + $0x170] sm:$0xff]  ;;  %1949 = vst.msk [vmem:[#allocation2 + $0x168] sm:$0xff] %vm310_vm2, %v1820_v7  ;;  %v1825_v27 = vadd.f32 %v4144_v10, %v489_v63  ;;  %v1456_v49 = vpop.f32.mrf.mxu0  ;;  %v3967_v57 = vpack.c.bf16 %v5158_v37, %v5158_v37  ;;  %v5173_v1 = vpop.f32.mrf.mxu1  ;;  %v3280_v51 = vsel %vm310_vm2, %v3110_v24, 0.0 }
 0x13c   : > { %v3275_v34 = vadd.f32 %v3274_v20, %v3273_v19  ;;  %2717 = vst.msk [vmem:[%s4810_s30 + $0xa4] sm:$0xf] %vm2675_vm4, %v3937_v13  ;;  %v2886_v35 = vadd.f32 %v2885_v14, %v2884_v12  ;;  %v3942_v60 = vpack.c.bf16 %v5149_v26, %v5149_v26  ;;  %v1823_v41 = vadd.f32 %v1456_v49, %v487_v17  ;;  %v493_v63 = vld [vmem:[#allocation2 + $0x1b0] sm:$0xff]  ;;  %v491_v14 = vld [vmem:[#allocation2 + $0x1a0] sm:$0xff] }
 0x13d   : > { %v3276_v42 = vsel %vm310_vm2, %v3108_v23, 0.0  ;;  %v2079_v46 = vld [vmem:[#allocation2 + $0x160] sm:$0xff]  ;;  %1954 = vst.msk [vmem:[#allocation2 + $0x190] sm:$0xff] %vm310_vm2, %v1825_v27  ;;  %v4145_v44 = vpop.f32.mrf.mxu0  ;;  %v5182_v17 = vpop.f32.mrf.mxu1  ;;  %v3113_v23 = vmul.f32 %v5149_v26, %v5149_v26 }
 0x13e   : > { %v2888_v53 = vadd.f32 %v2887_v9, %v2886_v35  ;;  %v3277_v56 = vadd.f32 %v3276_v42, %v3275_v34  ;;  %2722 = vst.msk [vmem:[%s4810_s30 + $0xb8] sm:$0xf] %vm2675_vm4, %v3942_v60  ;;  %v3940_v8 = vpack.c.bf16 %v2079_v46, %v2079_v46  ;;  %v3111_v47 = vmul.f32 %v2079_v46, %v2079_v46  ;;  %v494_v42 = vld [vmem:[#allocation2 + $0x1b8] sm:$0xff] }
 0x13f   : > { %1952 = vst.msk [vmem:[#allocation2 + $0x180] sm:$0xff] %vm310_vm2, %v1823_v41  ;;  %v1826_v58 = vadd.f32 %v4145_v44, %v490_v36  ;;  %v1459_v59 = vpop.f32.mrf.mxu0  ;;  %v2891_v19 = vsel %vm310_vm2, %v2079_v46, 0.0  ;;  %v5191_v46 = vld [vmem:[#allocation2 + $0x228] sm:$0xff]  ;;  %v5193_v41 = vpop.f32.mrf.mxu1 }
 0x140   : > { %v2890_v0 = vadd.f32 %v2889_v31, %v2888_v53  ;;  %v3279_v3 = vadd.f32 %v3278_v50, %v3277_v56  ;;  %2720 = vst.msk [vmem:[%s4810_s30 + $0xb0] sm:$0xf] %vm2675_vm4, %v3940_v8  ;;  %v2082_v7 = vld [vmem:[#allocation2 + $0x178] sm:$0xff]  ;;  %v1824_v10 = vadd.f32 %v1459_v59, %v488_v21  ;;  %2747 = vst.msk [vmem:[%s4810_s30 + $0x11c] sm:$0xf] %vm2675_vm4, %v3967_v57  ;;  %v3282_v35 = vsel %vm310_vm2, %v3111_v47, 0.0 }
 0x141   : > { %v3943_v12 = vpack.c.bf16 %v2082_v7, %v2082_v7  ;;  %1955 = vst.msk [vmem:[#allocation2 + $0x198] sm:$0xff] %vm310_vm2, %v1826_v58  ;;  %v4148_v13 = vpop.f32.mrf.mxu0  ;;  %v2895_v56 = vsel %vm310_vm2, %v5149_v26, 0.0  ;;  %v3114_v8 = vmul.f32 %v2082_v7, %v2082_v7  ;;  %v492_v59 = vld [vmem:[#allocation2 + $0x1a8] sm:$0xff]  ;;  %v3965_v26 = vpack.c.bf16 %v5191_v46, %v5191_v46 }
 0x142   : > { %v3281_v20 = vadd.f32 %v3280_v51, %v3279_v3  ;;  %v2892_v27 = vadd.f32 %v2891_v19, %v2890_v0  ;;  %v2080_v49 = vld [vmem:[#allocation2 + $0x168] sm:$0xff]  ;;  %1953 = vst.msk [vmem:[#allocation2 + $0x188] sm:$0xff] %vm310_vm2, %v1824_v10  ;;  %v1829_v34 = vadd.f32 %v4148_v13, %v493_v63  ;;  %v5201_v63 = vpop.f32.mrf.mxu1  ;;  %v3286_v51 = vsel %vm310_vm2, %v3113_v23, 0.0 }
 0x143   : > { %2723 = vst.msk [vmem:[%s4810_s30 + $0xbc] sm:$0xf] %vm2675_vm4, %v3943_v12  ;;  %v3941_v60 = vpack.c.bf16 %v2080_v49, %v2080_v49  ;;  %v2893_v36 = vsel %vm310_vm2, %v2080_v49, 0.0  ;;  %v3112_v9 = vmul.f32 %v2080_v49, %v2080_v49  ;;  %v1472_v24 = vpop.f32.mrf.mxu0  ;;  %6118 = vst [vmem:[#allocation3_spill] sm:$0xff] %v5201_v63  ;;  %v2897_v19 = vsel %vm310_vm2, %v2082_v7, 0.0  ;;  %v524_v63 = vld [vmem:[#allocation2 + $0x2a8] sm:$0xff] }
 0x144   : > { %v3283_v44 = vadd.f32 %v3282_v35, %v3281_v20  ;;  %v2894_v21 = vadd.f32 %v2893_v36, %v2892_v27  ;;  %v2085_v50 = vld [vmem:[#allocation2 + $0x190] sm:$0xff]  ;;  %1958 = vst.msk [vmem:[#allocation2 + $0x1b0] sm:$0xff] %vm310_vm2, %v1829_v34  ;;  %v1827_v53 = vadd.f32 %v1472_v24, %v491_v14  ;;  %v5210_v20 = vpop.f32.mrf.mxu1  ;;  %v3288_v23 = vsel %vm310_vm2, %v3114_v8, 0.0 }
 0x145   : > { %2721 = vst.msk [vmem:[%s4810_s30 + $0xb4] sm:$0xf] %vm2675_vm4, %v3941_v60  ;;  %v3284_v31 = vsel %vm310_vm2, %v3112_v9, 0.0  ;;  %v3946_v47 = vpack.c.bf16 %v2085_v50, %v2085_v50  ;;  %v4149_v58 = vpop.f32.mrf.mxu0  ;;  %6119 = vst [vmem:[#allocation4_spill] sm:$0xff] %v5210_v20  ;;  %v497_v60 = vld [vmem:[#allocation2 + $0x1d0] sm:$0xff]  ;;  %v3117_v7 = vmul.f32 %v2085_v50, %v2085_v50 }
 0x146   : > { %v2896_v57 = vadd.f32 %v2895_v56, %v2894_v21  ;;  %v3285_v0 = vadd.f32 %v3284_v31, %v3283_v44  ;;  %v2083_v3 = vld [vmem:[#allocation2 + $0x180] sm:$0xff]  ;;  %1956 = vst.msk [vmem:[#allocation2 + $0x1a0] sm:$0xff] %vm310_vm2, %v1827_v53  ;;  %v1830_v10 = vadd.f32 %v4149_v58, %v494_v42  ;;  %v5219_v44 = vpop.f32.mrf.mxu1 }
 0x147   : > { %2726 = vst.msk [vmem:[%s4810_s30 + $0xc8] sm:$0xf] %vm2675_vm4, %v3946_v47  ;;  %v3944_v12 = vpack.c.bf16 %v2083_v3, %v2083_v3  ;;  %v3115_v13 = vmul.f32 %v2083_v3, %v2083_v3  ;;  %v1475_v14 = vpop.f32.mrf.mxu0  ;;  %2745 = vst.msk [vmem:[%s4810_s30 + $0x114] sm:$0xf] %vm2675_vm4, %v3965_v26  ;;  %v2899_v36 = vsel %vm310_vm2, %v2083_v3, 0.0  ;;  %v495_v47 = vld [vmem:[#allocation2 + $0x1c0] sm:$0xff] }
 0x148   : > { %v2898_v27 = vadd.f32 %v2897_v19, %v2896_v57  ;;  %v3287_v49 = vadd.f32 %v3286_v51, %v3285_v0  ;;  %v2086_v34 = vld [vmem:[#allocation2 + $0x198] sm:$0xff]  ;;  %1959 = vst.msk [vmem:[#allocation2 + $0x1b8] sm:$0xff] %vm310_vm2, %v1830_v10  ;;  %v1828_v35 = vadd.f32 %v1475_v14, %v492_v59  ;;  %6120 = vst [vmem:[#allocation5_spill] sm:$0xff] %v5219_v44  ;;  %v5228_v3 = vpop.f32.mrf.mxu1 }
 0x149   : > { %2724 = vst.msk [vmem:[%s4810_s30 + $0xc0] sm:$0xf] %vm2675_vm4, %v3944_v12  ;;  %v3947_v9 = vpack.c.bf16 %v2086_v34, %v2086_v34  ;;  %v2084_v24 = vld [vmem:[#allocation2 + $0x188] sm:$0xff]  ;;  %v4152_v42 = vpop.f32.mrf.mxu0  ;;  %v3290_v8 = vsel %vm310_vm2, %v3115_v13, 0.0  ;;  %6121 = vst [vmem:[#allocation6_spill] sm:$0xff] %v5228_v3  ;;  %v498_v19 = vld [vmem:[#allocation2 + $0x1d8] sm:$0xff]  ;;  %v3118_v14 = vmul.f32 %v2086_v34, %v2086_v34 }
 0x14a   : > { %v3289_v21 = vadd.f32 %v3288_v23, %v3287_v49  ;;  %v2900_v53 = vadd.f32 %v2899_v36, %v2898_v27  ;;  %v3945_v56 = vpack.c.bf16 %v2084_v24, %v2084_v24  ;;  %v2901_v31 = vsel %vm310_vm2, %v2084_v24, 0.0  ;;  %1957 = vst.msk [vmem:[#allocation2 + $0x1a8] sm:$0xff] %vm310_vm2, %v1828_v35  ;;  %v5234_v12 = vld [vmem:[#allocation2 + $0x250] sm:$0xff]  ;;  %v5239_v23 = vpop.f32.mrf.mxu1 }
 0x14b   : > { %2727 = vst.msk [vmem:[%s4810_s30 + $0xcc] sm:$0xf] %vm2675_vm4, %v3947_v9  ;;  %v3116_v58 = vmul.f32 %v2084_v24, %v2084_v24  ;;  %v5226_v59 = vld [vmem:[#allocation2 + $0x1b0] sm:$0xff]  ;;  %v1833_v57 = vadd.f32 %v4152_v42, %v497_v60  ;;  %v1488_v0 = vpop.f32.mrf.mxu0  ;;  %v2903_v13 = vsel %vm310_vm2, %v2085_v50, 0.0  ;;  %6122 = vst [vmem:[#allocation7_spill] sm:$0xff] %v5239_v23  ;;  %v3294_v36 = vsel %vm310_vm2, %v3117_v7, 0.0 }
 0x14c   : > { %v3291_v10 = vadd.f32 %v3290_v8, %v3289_v21  ;;  %2725 = vst.msk [vmem:[%s4810_s30 + $0xc4] sm:$0xf] %vm2675_vm4, %v3945_v56  ;;  %v2902_v26 = vadd.f32 %v2901_v31, %v2900_v53  ;;  %v3950_v51 = vpack.c.bf16 %v5226_v59, %v5226_v59  ;;  %v1831_v35 = vadd.f32 %v1488_v0, %v495_v47  ;;  %v496_v21 = vld [vmem:[#allocation2 + $0x1c8] sm:$0xff]  ;;  %v501_v0 = vld [vmem:[#allocation2 + $0x1f0] sm:$0xff] }
 0x14d   : > { %v3292_v27 = vsel %vm310_vm2, %v3116_v58, 0.0  ;;  %v2087_v49 = vld [vmem:[#allocation2 + $0x1a0] sm:$0xff]  ;;  %1962 = vst.msk [vmem:[#allocation2 + $0x1d0] sm:$0xff] %vm310_vm2, %v1833_v57  ;;  %v4153_v60 = vpop.f32.mrf.mxu0  ;;  %v2905_v50 = vsel %vm310_vm2, %v2086_v34, 0.0  ;;  %v3970_v8 = vpack.c.bf16 %v5234_v12, %v5234_v12 }
 0x14e   : > { %v2904_v9 = vadd.f32 %v2903_v13, %v2902_v26  ;;  %v3293_v24 = vadd.f32 %v3292_v27, %v3291_v10  ;;  %2730 = vst.msk [vmem:[%s4810_s30 + $0xd8] sm:$0xf] %vm2675_vm4, %v3950_v51  ;;  %v3948_v42 = vpack.c.bf16 %v2087_v49, %v2087_v49  ;;  %v3119_v53 = vmul.f32 %v2087_v49, %v2087_v49  ;;  %v499_v13 = vld [vmem:[#allocation2 + $0x1e0] sm:$0xff] }
 0x14f   : > { %v2090_v56 = vld [vmem:[#allocation2 + $0x1b8] sm:$0xff]  ;;  %1960 = vst.msk [vmem:[#allocation2 + $0x1c0] sm:$0xff] %vm310_vm2, %v1831_v35  ;;  %v1834_v31 = vadd.f32 %v4153_v60, %v498_v19  ;;  %v1491_v47 = vpop.f32.mrf.mxu0  ;;  %v3296_v10 = vsel %vm310_vm2, %v3118_v14, 0.0  ;;  %v2907_v34 = vsel %vm310_vm2, %v2087_v49, 0.0  ;;  %v5255_v27 = vld [vmem:[#allocation2 + $0x240] sm:$0xff]  ;;  %v5257_v35 = vpop.f32.mrf.mxu1 }
 0x150   : > { %v2906_v58 = vadd.f32 %v2905_v50, %v2904_v9  ;;  %v3295_v7 = vadd.f32 %v3294_v36, %v3293_v24  ;;  %2728 = vst.msk [vmem:[%s4810_s30 + $0xd0] sm:$0xf] %vm2675_vm4, %v3948_v42  ;;  %v3951_v57 = vpack.c.bf16 %v2090_v56, %v2090_v56  ;;  %v1832_v51 = vadd.f32 %v1491_v47, %v496_v21 }
 0x151   : > { %v2088_v26 = vld [vmem:[#allocation2 + $0x1a8] sm:$0xff]  ;;  %1963 = vst.msk [vmem:[#allocation2 + $0x1d8] sm:$0xff] %vm310_vm2, %v1834_v31  ;;  %v4156_v19 = vpop.f32.mrf.mxu0  ;;  %6123 = vst [vmem:[#allocation8_spill] sm:$0xff] %v5257_v35  ;;  %v3121_v9 = vmul.f32 %v5226_v59, %v5226_v59  ;;  %v3298_v24 = vsel %vm310_vm2, %v3119_v53, 0.0  ;;  %v502_v31 = vld [vmem:[#allocation2 + $0x1f8] sm:$0xff]  ;;  %v3122_v53 = vmul.f32 %v2090_v56, %v2090_v56 }
 0x152   : > { %2750 = vst.msk [vmem:[%s4810_s30 + $0x128] sm:$0xf] %vm2675_vm4, %v3970_v8  ;;  %v3297_v60 = vadd.f32 %v3296_v10, %v3295_v7  ;;  %v2908_v36 = vadd.f32 %v2907_v34, %v2906_v58  ;;  %2731 = vst.msk [vmem:[%s4810_s30 + $0xdc] sm:$0xf] %vm2675_vm4, %v3951_v57  ;;  %v3949_v14 = vpack.c.bf16 %v2088_v26, %v2088_v26  ;;  %v2909_v49 = vsel %vm310_vm2, %v2088_v26, 0.0 }
 0x153   : > { %v3120_v42 = vmul.f32 %v2088_v26, %v2088_v26  ;;  %1961 = vst.msk [vmem:[#allocation2 + $0x1c8] sm:$0xff] %vm310_vm2, %v1832_v51  ;;  %v1837_v21 = vadd.f32 %v4156_v19, %v501_v0  ;;  %v1504_v50 = vpop.f32.mrf.mxu0  ;;  %v3968_v57 = vpack.c.bf16 %v5255_v27, %v5255_v27  ;;  %v2911_v10 = vsel %vm310_vm2, %v5226_v59, 0.0  ;;  %v500_v51 = vld [vmem:[#allocation2 + $0x1e8] sm:$0xff]  ;;  %v5274_v19 = vpop.f32.mrf.mxu1 }
 0x154   : > { %v3299_v47 = vadd.f32 %v3298_v24, %v3297_v60  ;;  %2729 = vst.msk [vmem:[%s4810_s30 + $0xd4] sm:$0xf] %vm2675_vm4, %v3949_v14  ;;  %v2910_v8 = vadd.f32 %v2909_v49, %v2908_v36  ;;  %v2093_v58 = vld [vmem:[#allocation2 + $0x1d0] sm:$0xff]  ;;  %v1835_v7 = vadd.f32 %v1504_v50, %v499_v13  ;;  %6124 = vst [vmem:[#allocation9_spill] sm:$0xff] %v5274_v19  ;;  %v3302_v59 = vsel %vm310_vm2, %v3121_v9, 0.0  ;;  %v5283_v50 = vld [vmem:[#allocation2 + $0x258] sm:$0xff] }
 0x155   : > { %v3300_v34 = vsel %vm310_vm2, %v3120_v42, 0.0  ;;  %v3954_v0 = vpack.c.bf16 %v2093_v58, %v2093_v58  ;;  %1966 = vst.msk [vmem:[#allocation2 + $0x1f0] sm:$0xff] %vm310_vm2, %v1837_v21  ;;  %v4157_v26 = vpop.f32.mrf.mxu0  ;;  %v2913_v49 = vsel %vm310_vm2, %v2090_v56, 0.0  ;;  %v3304_v56 = vsel %vm310_vm2, %v3122_v53, 0.0 }
 0x156   : > { %v2912_v60 = vadd.f32 %v2911_v10, %v2910_v8  ;;  %v3301_v36 = vadd.f32 %v3300_v34, %v3299_v47  ;;  %v2091_v13 = vld [vmem:[#allocation2 + $0x1c0] sm:$0xff]  ;;  %1964 = vst.msk [vmem:[#allocation2 + $0x1e0] sm:$0xff] %vm310_vm2, %v1835_v7  ;;  %v1838_v14 = vadd.f32 %v4157_v26, %v502_v31  ;;  %v5293_v26 = vpop.f32.mrf.mxu1  ;;  %v3971_v53 = vpack.c.bf16 %v5283_v50, %v5283_v50 }
 0x157   : > { %2748 = vst.msk [vmem:[%s4810_s30 + $0x120] sm:$0xf] %vm2675_vm4, %v3968_v57  ;;  %2734 = vst.msk [vmem:[%s4810_s30 + $0xe8] sm:$0xf] %vm2675_vm4, %v3954_v0  ;;  %v3952_v24 = vpack.c.bf16 %v2091_v13, %v2091_v13  ;;  %v3123_v42 = vmul.f32 %v2091_v13, %v2091_v13  ;;  %v1507_v21 = vpop.f32.mrf.mxu0  ;;  %v4318_v31 = vld [vmem:[#allocation2 + $0x200] sm:$0xff]  ;;  %v3125_v57 = vmul.f32 %v2093_v58, %v2093_v58  ;;  %v2915_v34 = vsel %vm310_vm2, %v2091_v13, 0.0 }
 0x158   : > { %v2914_v8 = vadd.f32 %v2913_v49, %v2912_v60  ;;  %v3303_v47 = vadd.f32 %v3302_v59, %v3301_v36  ;;  %v2094_v10 = vld [vmem:[#allocation2 + $0x1d8] sm:$0xff]  ;;  %1967 = vst.msk [vmem:[#allocation2 + $0x1f8] sm:$0xff] %vm310_vm2, %v1838_v14  ;;  %v5287_v7 = vsel %vm310_vm2, %v4318_v31, 0.0  ;;  %v1836_v9 = vadd.f32 %v1507_v21, %v500_v51  ;;  %6125 = vst [vmem:[#allocation10_spill] sm:$0xff] %v5293_v26 }
 0x159   : > { %2732 = vst.msk [vmem:[%s4810_s30 + $0xe0] sm:$0xf] %vm2675_vm4, %v3952_v24  ;;  %v3955_v0 = vpack.c.bf16 %v2094_v10, %v2094_v10  ;;  %v3306_v14 = vsel %vm310_vm2, %v3123_v42, 0.0  ;;  %v3126_v51 = vmul.f32 %v2094_v10, %v2094_v10  ;;  %v2919_v21 = vsel %vm310_vm2, %v2093_v58, 0.0  ;;  %2751 = vst.msk [vmem:[%s4810_s30 + $0x12c] sm:$0xf] %vm2675_vm4, %v3971_v53  ;;  %v5311_v58 = vpop.f32.mrf.mxu1 }
 0x15a   : > { %v3305_v60 = vadd.f32 %v3304_v56, %v3303_v47  ;;  %v2916_v36 = vadd.f32 %v2915_v34, %v2914_v8  ;;  %v2092_v59 = vld [vmem:[#allocation2 + $0x1c8] sm:$0xff]  ;;  %1965 = vst.msk [vmem:[#allocation2 + $0x1e8] sm:$0xff] %vm310_vm2, %v1836_v9  ;;  %v5303_v42 = vmul.f32 %v4318_v31, %v4318_v31  ;;  %v3310_v34 = vsel %vm310_vm2, %v3125_v57, 0.0  ;;  %6126 = vst [vmem:[#allocation11_spill] sm:$0xff] %v5311_v58 }
 0x15b   : > { %2735 = vst.msk [vmem:[%s4810_s30 + $0xec] sm:$0xf] %vm2675_vm4, %v3955_v0  ;;  %v3953_v49 = vpack.c.bf16 %v2092_v59, %v2092_v59  ;;  %v2917_v13 = vsel %vm310_vm2, %v2092_v59, 0.0  ;;  %v3124_v24 = vmul.f32 %v2092_v59, %v2092_v59  ;;  %v512_v9 = vld [vmem:[#allocation2 + $0x248] sm:$0xff]  ;;  %v3312_v53 = vsel %vm310_vm2, %v3126_v51, 0.0 }
 0x15c   : > { %v3307_v47 = vadd.f32 %v3306_v14, %v3305_v60  ;;  %v2918_v8 = vadd.f32 %v2917_v13, %v2916_v36  ;;  %v2097_v56 = vld [vmem:[#allocation2 + $0x1f0] sm:$0xff]  ;;  %v2921_v60 = vsel %vm310_vm2, %v2094_v10, 0.0  ;;  %v1848_v35 = vadd.f32 %v4938_v54, %v512_v9  ;;  %v516_v9 = vld [vmem:[#allocation2 + $0x268] sm:$0xff] }
 0x15d   : > { %2733 = vst.msk [vmem:[%s4810_s30 + $0xe4] sm:$0xf] %vm2675_vm4, %v3953_v49  ;;  %v3308_v0 = vsel %vm310_vm2, %v3124_v24, 0.0  ;;  %v3958_v26 = vpack.c.bf16 %v2097_v56, %v2097_v56  ;;  %v3129_v19 = vmul.f32 %v2097_v56, %v2097_v56  ;;  %v2095_v59 = vld [vmem:[#allocation2 + $0x1e0] sm:$0xff]  ;;  %v517_v13 = vld [vmem:[#allocation2 + $0x270] sm:$0xff]  ;;  %v2927_v57 = vsel %vm310_vm2, %v2097_v56, 0.0 }
 0x15e   : > { %v2920_v31 = vadd.f32 %v2919_v21, %v2918_v8  ;;  %v3309_v36 = vadd.f32 %v3308_v0, %v3307_v47  ;;  %v3956_v14 = vpack.c.bf16 %v2095_v59, %v2095_v59  ;;  %v3127_v49 = vmul.f32 %v2095_v59, %v2095_v59  ;;  %v515_v47 = vld [vmem:[#allocation2 + $0x260] sm:$0xff]  ;;  %v518_v8 = vld [vmem:[#allocation2 + $0x278] sm:$0xff]  ;;  %1977 = vst.msk [vmem:[#allocation2 + $0x248] sm:$0xff] %vm310_vm2, %v1848_v35  ;;  %v520_v58 = vld [vmem:[#allocation2 + $0x288] sm:$0xff] }
 0x15f   : > { %2738 = vst.msk [vmem:[%s4810_s30 + $0xf8] sm:$0xf] %vm2675_vm4, %v3958_v26  ;;  %v2098_v24 = vld [vmem:[#allocation2 + $0x1f8] sm:$0xff]  ;;  %v2923_v10 = vsel %vm310_vm2, %v2095_v59, 0.0  ;;  %v3318_v51 = vsel %vm310_vm2, %v3129_v19, 0.0  ;;  %v1853_v54 = vadd.f32 %v4945_v2, %v517_v13  ;;  %v1851_v2 = vadd.f32 %v4952_v15, %v515_v47  ;;  %v525_v13 = vld [vmem:[#allocation2 + $0x2b0] sm:$0xff] }
 0x160   : > { %v2922_v23 = vadd.f32 %v2921_v60, %v2920_v31  ;;  %v3311_v3 = vadd.f32 %v3310_v34, %v3309_v36  ;;  %2736 = vst.msk [vmem:[%s4810_s30 + $0xf0] sm:$0xf] %vm2675_vm4, %v3956_v14  ;;  %v3959_v21 = vpack.c.bf16 %v2098_v24, %v2098_v24  ;;  %v3314_v26 = vsel %vm310_vm2, %v3127_v49, 0.0  ;;  %v521_v34 = vld [vmem:[#allocation2 + $0x290] sm:$0xff]  ;;  %v5327_v60 = vpop.f32.mrf.mxu1  ;;  %v519_v14 = vld [vmem:[#allocation2 + $0x280] sm:$0xff]  ;;  %v522_v49 = vld [vmem:[#allocation2 + $0x298] sm:$0xff] }
 0x161   : > { %v2929_v56 = vsel %vm310_vm2, %v2098_v24, 0.0  ;;  %v2096_v0 = vld [vmem:[#allocation2 + $0x1e8] sm:$0xff]  ;;  %6127 = vst [vmem:[#allocation12_spill] sm:$0xff] %v5327_v60  ;;  %v3130_v44 = vmul.f32 %v2098_v24, %v2098_v24  ;;  %1982 = vst.msk [vmem:[#allocation2 + $0x270] sm:$0xff] %vm310_vm2, %v1853_v54  ;;  %v1854_v35 = vadd.f32 %v4961_v28, %v518_v8  ;;  %v1857_v60 = vadd.f32 %v4979_v55, %v521_v34  ;;  %v529_v24 = vld [vmem:[#allocation2 + $0x2d0] sm:$0xff] }
 0x162   : > { %v3313_v31 = vadd.f32 %v3312_v53, %v3311_v3  ;;  %v2924_v59 = vadd.f32 %v2923_v10, %v2922_v23  ;;  %2739 = vst.msk [vmem:[%s4810_s30 + $0xfc] sm:$0xf] %vm2675_vm4, %v3959_v21  ;;  %v3957_v36 = vpack.c.bf16 %v2096_v0, %v2096_v0  ;;  %v2925_v19 = vsel %vm310_vm2, %v2096_v0, 0.0  ;;  %v523_v3 = vld [vmem:[#allocation2 + $0x2a0] sm:$0xff]  ;;  %v526_v23 = vld [vmem:[#allocation2 + $0x2b8] sm:$0xff] }
 0x163   : > { %v3128_v20 = vmul.f32 %v2096_v0, %v2096_v0  ;;  %v1852_v21 = vadd.f32 %v4972_v43, %v516_v9  ;;  %v527_v0 = vld [vmem:[#allocation2 + $0x2c0] sm:$0xff]  ;;  %1980 = vst.msk [vmem:[#allocation2 + $0x260] sm:$0xff] %vm310_vm2, %v1851_v2  ;;  %1983 = vst.msk [vmem:[#allocation2 + $0x278] sm:$0xff] %vm310_vm2, %v1854_v35  ;;  %v1855_v15 = vadd.f32 %v4986_v4, %v519_v14  ;;  %v530_v8 = vld [vmem:[#allocation2 + $0x2d8] sm:$0xff]  ;;  %v5345_v43 = vpop.f32.mrf.mxu1 }
 0x164   : > { %v3315_v53 = vadd.f32 %v3314_v26, %v3313_v31  ;;  %2737 = vst.msk [vmem:[%s4810_s30 + $0xf4] sm:$0xf] %vm2675_vm4, %v3957_v36  ;;  %v2926_v10 = vadd.f32 %v2925_v19, %v2924_v59  ;;  %v1858_v28 = vadd.f32 %v4997_v18, %v522_v49  ;;  %v1856_v47 = vadd.f32 %v5005_v33, %v520_v58  ;;  %v528_v26 = vld [vmem:[#allocation2 + $0x2c8] sm:$0xff]  ;;  %v533_v31 = vld [vmem:[#allocation2 + $0x2f0] sm:$0xff] }
 0x165   : > { %v3316_v54 = vsel %vm310_vm2, %v3128_v20, 0.0  ;;  %1981 = vst.msk [vmem:[#allocation2 + $0x268] sm:$0xff] %vm310_vm2, %v1852_v21  ;;  %1986 = vst.msk [vmem:[#allocation2 + $0x290] sm:$0xff] %vm310_vm2, %v1857_v60  ;;  %v1861_v20 = vadd.f32 %v5012_v45, %v525_v13  ;;  %v1859_v34 = vadd.f32 %v5019_v61, %v523_v3  ;;  %v1862_v4 = vadd.f32 %v5028_v5, %v526_v23  ;;  %v534_v60 = vld [vmem:[#allocation2 + $0x2f8] sm:$0xff]  ;;  %v5358_v61 = vld [vmem:[#allocation2 + $0x248] sm:$0xff] }
 0x166   : > { %v2928_v55 = vadd.f32 %v2927_v57, %v2926_v10  ;;  %v3317_v9 = vadd.f32 %v3316_v54, %v3315_v53  ;;  %1984 = vst.msk [vmem:[#allocation2 + $0x280] sm:$0xff] %vm310_vm2, %v1855_v15  ;;  %1987 = vst.msk [vmem:[#allocation2 + $0x298] sm:$0xff] %vm310_vm2, %v1858_v28  ;;  %v1860_v18 = vadd.f32 %v5039_v29, %v524_v63  ;;  %v531_v57 = vld [vmem:[#allocation2 + $0x2e0] sm:$0xff]  ;;  %v3320_v29 = vsel %vm310_vm2, %v3130_v44, 0.0  ;;  %v4319_v63 = vld [vmem:[#allocation2 + $0x208] sm:$0xff] }
 0x167   : > { %1985 = vst.msk [vmem:[#allocation2 + $0x288] sm:$0xff] %vm310_vm2, %v1856_v47  ;;  %v1865_v33 = vadd.f32 %v5046_v40, %v529_v24  ;;  %v1863_v58 = vadd.f32 %v5055_v62, %v527_v0  ;;  %1990 = vst.msk [vmem:[#allocation2 + $0x2b0] sm:$0xff] %vm310_vm2, %v1861_v20  ;;  %v1866_v36 = vadd.f32 %v5063_v16, %v530_v8  ;;  %v4320_v35 = vld [vmem:[#allocation2 + $0x210] sm:$0xff]  ;;  %v2933_v3 = vsel %vm310_vm2, %v4319_v63, 0.0  ;;  %v4321_v24 = vld [vmem:[#allocation2 + $0x218] sm:$0xff] }
 0x168   : > { %v2930_v45 = vadd.f32 %v2929_v56, %v2928_v55  ;;  %v3319_v59 = vadd.f32 %v3318_v51, %v3317_v9  ;;  %1988 = vst.msk [vmem:[#allocation2 + $0x2a0] sm:$0xff] %vm310_vm2, %v1859_v34  ;;  %v1864_v5 = vadd.f32 %v5077_v22, %v528_v26  ;;  %v3132_v40 = vmul.f32 %v4319_v63, %v4319_v63  ;;  %v532_v51 = vld [vmem:[#allocation2 + $0x2e8] sm:$0xff]  ;;  %v537_v22 = vld [vmem:[#allocation2 + $0x310] sm:$0xff]  ;;  %v5372_v56 = vpop.f32.mrf.mxu1 }
 0x169   : > { %v3969_v62 = vpack.c.bf16 %v5358_v61, %v5358_v61  ;;  %1991 = vst.msk [vmem:[#allocation2 + $0x2b8] sm:$0xff] %vm310_vm2, %v1862_v4  ;;  %1989 = vst.msk [vmem:[#allocation2 + $0x2a8] sm:$0xff] %vm310_vm2, %v1860_v18  ;;  %v1869_v16 = vadd.f32 %v5086_v52, %v533_v31  ;;  %v5375_v14 = vld [vmem:[#allocation2 + $0x270] sm:$0xff]  ;;  %v1867_v49 = vadd.f32 %v5097_v6, %v531_v57  ;;  %v3322_v52 = vsel %vm310_vm2, %v5303_v42, 0.0 }
 0x16a   : > { %1994 = vst.msk [vmem:[#allocation2 + $0x2d0] sm:$0xff] %vm310_vm2, %v1865_v33  ;;  %1992 = vst.msk [vmem:[#allocation2 + $0x2c0] sm:$0xff] %vm310_vm2, %v1863_v58  ;;  %v2932_v44 = vadd.f32 %v5287_v7, %v2930_v45  ;;  %v3321_v19 = vadd.f32 %v3320_v29, %v3319_v59  ;;  %v1870_v2 = vadd.f32 %v5106_v25, %v534_v60  ;;  %v5389_v6 = vld [vmem:[#allocation2 + $0x260] sm:$0xff]  ;;  %v5391_v25 = vld [vmem:[#allocation2 + $0x278] sm:$0xff]  ;;  %v2935_v21 = vsel %vm310_vm2, %v4320_v35, 0.0 }
 0x16b   : > { %1995 = vst.msk [vmem:[#allocation2 + $0x2d8] sm:$0xff] %vm310_vm2, %v1866_v36  ;;  %1993 = vst.msk [vmem:[#allocation2 + $0x2c8] sm:$0xff] %vm310_vm2, %v1864_v5  ;;  %v3133_v13 = vmul.f32 %v4320_v35, %v4320_v35  ;;  %v3974_v7 = vpack.c.bf16 %v5375_v14, %v5375_v14  ;;  %v1868_v42 = vadd.f32 %v5122_v39, %v532_v51  ;;  %v3324_v54 = vsel %vm310_vm2, %v3132_v40, 0.0  ;;  %v5407_v39 = vpop.f32.mrf.mxu1 }
 0x16c   : > { %2749 = vst.msk [vmem:[%s4810_s30 + $0x124] sm:$0xf] %vm2675_vm4, %v3969_v62  ;;  %v3323_v23 = vadd.f32 %v3322_v52, %v3321_v19  ;;  %v2934_v53 = vadd.f32 %v2933_v3, %v2932_v44  ;;  %v1873_v10 = vadd.f32 %v5132_v38, %v537_v22  ;;  %v3134_v0 = vmul.f32 %v4321_v24, %v4321_v24  ;;  %v5403_v28 = vld [vmem:[#allocation2 + $0x268] sm:$0xff]  ;;  %v5405_v47 = vld [vmem:[#allocation2 + $0x290] sm:$0xff] }
 0x16d   : > { %1998 = vst.msk [vmem:[#allocation2 + $0x2f0] sm:$0xff] %vm310_vm2, %v1869_v16  ;;  %1996 = vst.msk [vmem:[#allocation2 + $0x2e0] sm:$0xff] %vm310_vm2, %v1867_v49  ;;  %v3972_v15 = vpack.c.bf16 %v5389_v6, %v5389_v6  ;;  %v3975_v26 = vpack.c.bf16 %v5391_v25, %v5391_v25  ;;  %v5411_v55 = vld [vmem:[#allocation2 + $0x280] sm:$0xff]  ;;  %v3326_v9 = vsel %vm310_vm2, %v3133_v13, 0.0  ;;  %v2937_v20 = vsel %vm310_vm2, %v4321_v24, 0.0  ;;  %v5427_v58 = vld [vmem:[#allocation2 + $0x298] sm:$0xff]  ;;  %v5440_v5 = vpop.f32.mrf.mxu1 }
 0x16e   : > { %1999 = vst.msk [vmem:[#allocation2 + $0x2f8] sm:$0xff] %vm310_vm2, %v1870_v2  ;;  %v2936_v38 = vadd.f32 %v2935_v21, %v2934_v53  ;;  %v3325_v8 = vadd.f32 %v3324_v54, %v3323_v23  ;;  %1997 = vst.msk [vmem:[#allocation2 + $0x2e8] sm:$0xff] %vm310_vm2, %v1868_v42  ;;  %v3135_v34 = vmul.f32 %v5111_v32, %v5111_v32  ;;  %v3328_v57 = vsel %vm310_vm2, %v3134_v0, 0.0  ;;  %v5438_v36 = vld [vmem:[#allocation2 + $0x288] sm:$0xff]  ;;  %v5444_v40 = vld [vmem:[#allocation2 + $0x2b0] sm:$0xff] }
 0x16f   : > { %2754 = vst.msk [vmem:[%s4810_s30 + $0x138] sm:$0xf] %vm2675_vm4, %v3974_v7  ;;  %2752 = vst.msk [vmem:[%s4810_s30 + $0x130] sm:$0xf] %vm2675_vm4, %v3972_v15  ;;  %v3973_v31 = vpack.c.bf16 %v5403_v28, %v5403_v28  ;;  %v3978_v33 = vpack.c.bf16 %v5405_v47, %v5405_v47  ;;  %v2939_v60 = vsel %vm310_vm2, %v5111_v32, 0.0  ;;  %v3136_v45 = vmul.f32 %v5191_v46, %v5191_v46  ;;  %v4322_v32 = vld [vmem:[#allocation2 + $0x230] sm:$0xff]  ;;  %v5467_v7 = vpop.f32.mrf.mxu1 }
 0x170   : > { %2002 = vst.msk [vmem:[#allocation2 + $0x310] sm:$0xff] %vm310_vm2, %v1873_v10  ;;  %v2938_v4 = vadd.f32 %v2937_v20, %v2936_v38  ;;  %v3327_v18 = vadd.f32 %v3326_v9, %v3325_v8  ;;  %v3976_v59 = vpack.c.bf16 %v5411_v55, %v5411_v55  ;;  %v3137_v62 = vmul.f32 %v4322_v32, %v4322_v32  ;;  %v5457_v35 = vld [vmem:[#allocation2 + $0x2a0] sm:$0xff]  ;;  %v5465_v3 = vld [vmem:[#allocation2 + $0x2b8] sm:$0xff]  ;;  %v5473_v10 = vld [vmem:[#allocation2 + $0x2a8] sm:$0xff] }
 0x171   : > { %2755 = vst.msk [vmem:[%s4810_s30 + $0x13c] sm:$0xf] %vm2675_vm4, %v3975_v26  ;;  %2753 = vst.msk [vmem:[%s4810_s30 + $0x134] sm:$0xf] %vm2675_vm4, %v3973_v31  ;;  %v3330_v16 = vsel %vm310_vm2, %v3135_v34, 0.0  ;;  %v2941_v51 = vsel %vm310_vm2, %v5191_v46, 0.0  ;;  %v3979_v22 = vpack.c.bf16 %v5427_v58, %v5427_v58  ;;  %v3138_v19 = vmul.f32 %v5158_v37, %v5158_v37 }
 0x172   : > { %v3329_v29 = vadd.f32 %v3328_v57, %v3327_v18  ;;  %v2940_v63 = vadd.f32 %v2939_v60, %v2938_v4  ;;  %2758 = vst.msk [vmem:[%s4810_s30 + $0x148] sm:$0xf] %vm2675_vm4, %v3978_v33  ;;  %2756 = vst.msk [vmem:[%s4810_s30 + $0x140] sm:$0xf] %vm2675_vm4, %v3976_v59  ;;  %v3977_v2 = vpack.c.bf16 %v5438_v36, %v5438_v36  ;;  %v2943_v13 = vsel %vm310_vm2, %v4322_v32, 0.0  ;;  %v5487_v9 = vld [vmem:[#allocation2 + $0x2d0] sm:$0xff]  ;;  %v5501_v18 = vpop.f32.mrf.mxu1 }
 0x173   : > { %v3332_v46 = vsel %vm310_vm2, %v3136_v45, 0.0  ;;  %2759 = vst.msk [vmem:[%s4810_s30 + $0x14c] sm:$0xf] %vm2675_vm4, %v3979_v22  ;;  %v3982_v52 = vpack.c.bf16 %v5444_v40, %v5444_v40  ;;  %v3141_v42 = vmul.f32 %v5234_v12, %v5234_v12  ;;  %v3334_v21 = vsel %vm310_vm2, %v3137_v62, 0.0  ;;  %v5499_v4 = vld [vmem:[#allocation2 + $0x2c0] sm:$0xff]  ;;  %v5508_v45 = vld [vmem:[#allocation2 + $0x2d8] sm:$0xff] }
 0x174   : > { %v3331_v44 = vadd.f32 %v3330_v16, %v3329_v29  ;;  %v2942_v49 = vadd.f32 %v2941_v51, %v2940_v63  ;;  %2757 = vst.msk [vmem:[%s4810_s30 + $0x144] sm:$0xf] %vm2675_vm4, %v3977_v2  ;;  %v2945_v24 = vsel %vm310_vm2, %v5158_v37, 0.0  ;;  %v3139_v0 = vmul.f32 %v5255_v27, %v5255_v27  ;;  %v5523_v22 = vld [vmem:[#allocation2 + $0x2c8] sm:$0xff]  ;;  %v5535_v2 = vpop.f32.mrf.mxu1 }
 0x175   : > { %2762 = vst.msk [vmem:[%s4810_s30 + $0x158] sm:$0xf] %vm2675_vm4, %v3982_v52  ;;  %v3980_v54 = vpack.c.bf16 %v5457_v35, %v5457_v35  ;;  %v3336_v15 = vsel %vm310_vm2, %v3138_v19, 0.0  ;;  %v3983_v26 = vpack.c.bf16 %v5465_v3, %v5465_v3  ;;  %v2947_v37 = vsel %vm310_vm2, %v5255_v27, 0.0 }
 0x176   : > { %v2944_v23 = vadd.f32 %v2943_v13, %v2942_v49  ;;  %v3333_v53 = vadd.f32 %v3332_v46, %v3331_v44  ;;  %v3142_v20 = vmul.f32 %v5283_v50, %v5283_v50  ;;  %v3140_v34 = vmul.f32 %v5358_v61, %v5358_v61 }
 0x177   : > { %2760 = vst.msk [vmem:[%s4810_s30 + $0x150] sm:$0xf] %vm2675_vm4, %v3980_v54  ;;  %v3981_v31 = vpack.c.bf16 %v5473_v10, %v5473_v10  ;;  %v2951_v33 = vsel %vm310_vm2, %v5234_v12, 0.0  ;;  %v3342_v27 = vsel %vm310_vm2, %v3141_v42, 0.0  ;;  %2763 = vst.msk [vmem:[%s4810_s30 + $0x15c] sm:$0xf] %vm2675_vm4, %v3983_v26  ;;  %v3145_v63 = vmul.f32 %v5375_v14, %v5375_v14 }
 0x178   : > { %v3335_v38 = vadd.f32 %v3334_v21, %v3333_v53  ;;  %v2946_v8 = vadd.f32 %v2945_v24, %v2944_v23  ;;  %v3338_v59 = vsel %vm310_vm2, %v3139_v0, 0.0  ;;  %v2949_v29 = vsel %vm310_vm2, %v5358_v61, 0.0  ;;  %v5543_v53 = vld [vmem:[#allocation2 + $0x2e0] sm:$0xff] }
 0x179   : > { %2761 = vst.msk [vmem:[%s4810_s30 + $0x154] sm:$0xf] %vm2675_vm4, %v3981_v31  ;;  %v3986_v12 = vpack.c.bf16 %v5487_v9, %v5487_v9  ;;  %v2953_v62 = vsel %vm310_vm2, %v5283_v50, 0.0  ;;  %v3984_v51 = vpack.c.bf16 %v5499_v4, %v5499_v4  ;;  %v3344_v61 = vsel %vm310_vm2, %v3142_v20, 0.0  ;;  %v5533_v50 = vld [vmem:[#allocation2 + $0x2f0] sm:$0xff]  ;;  %v5569_v20 = vld [vmem:[#allocation2 + $0x2e8] sm:$0xff] }
 0x17a   : > { %v2948_v57 = vadd.f32 %v2947_v37, %v2946_v8  ;;  %v3337_v60 = vadd.f32 %v3336_v15, %v3335_v38  ;;  %v3340_v44 = vsel %vm310_vm2, %v3140_v34, 0.0  ;;  %v3143_v19 = vmul.f32 %v5389_v6, %v5389_v6  ;;  %v5558_v8 = vld [vmem:[#allocation2 + $0x2f8] sm:$0xff]  ;;  %v5571_v34 = vpop.f32.mrf.mxu1 }
 0x17b   : > { %2766 = vst.msk [vmem:[%s4810_s30 + $0x168] sm:$0xf] %vm2675_vm4, %v3986_v12  ;;  %v3987_v49 = vpack.c.bf16 %v5508_v45, %v5508_v45  ;;  %v2959_v52 = vsel %vm310_vm2, %v5375_v14, 0.0  ;;  %v3146_v23 = vmul.f32 %v5391_v25, %v5391_v25  ;;  %2764 = vst.msk [vmem:[%s4810_s30 + $0x160] sm:$0xf] %vm2675_vm4, %v3984_v51  ;;  %v3350_v42 = vsel %vm310_vm2, %v3145_v63, 0.0 }
 0x17c   : > { %v3339_v32 = vadd.f32 %v3338_v59, %v3337_v60  ;;  %v2950_v16 = vadd.f32 %v2949_v29, %v2948_v57  ;;  %v2955_v21 = vsel %vm310_vm2, %v5389_v6, 0.0  ;;  %v2961_v24 = vsel %vm310_vm2, %v5391_v25, 0.0  ;;  %v538_v51 = vld [vmem:[#allocation2 + $0x318] sm:$0xff] }
 0x17d   : > { %2767 = vst.msk [vmem:[%s4810_s30 + $0x16c] sm:$0xf] %vm2675_vm4, %v3987_v49  ;;  %v3985_v14 = vpack.c.bf16 %v5523_v22, %v5523_v22  ;;  %v3144_v15 = vmul.f32 %v5403_v28, %v5403_v28  ;;  %v3990_v38 = vpack.c.bf16 %v5533_v50, %v5533_v50  ;;  %v3346_v6 = vsel %vm310_vm2, %v3143_v19, 0.0 }
 0x17e   : > { %v2952_v13 = vadd.f32 %v2951_v33, %v2950_v16  ;;  %v3341_v46 = vadd.f32 %v3340_v44, %v3339_v32  ;;  %v2957_v25 = vsel %vm310_vm2, %v5403_v28, 0.0  ;;  %v3149_v26 = vmul.f32 %v5405_v47, %v5405_v47  ;;  %v5578_v28 = vld [vmem:[#allocation2 + $0x310] sm:$0xff]  ;;  %v535_v16 = vld [vmem:[#allocation2 + $0x300] sm:$0xff] }
 0x17f   : > { %2765 = vst.msk [vmem:[%s4810_s30 + $0x164] sm:$0xf] %vm2675_vm4, %v3985_v14  ;;  %v3988_v37 = vpack.c.bf16 %v5543_v53, %v5543_v53  ;;  %v3147_v57 = vmul.f32 %v5411_v55, %v5411_v55  ;;  %2770 = vst.msk [vmem:[%s4810_s30 + $0x178] sm:$0xf] %vm2675_vm4, %v3990_v38  ;;  %v5582_v60 = vsel %vm310_vm2, %v5405_v47, 0.0  ;;  %v3150_v59 = vmul.f32 %v5427_v58, %v5427_v58 }
 0x180   : > { %v3343_v0 = vadd.f32 %v3342_v27, %v3341_v46  ;;  %v2954_v54 = vadd.f32 %v2953_v62, %v2952_v13  ;;  %v3352_v27 = vsel %vm310_vm2, %v3146_v23, 0.0  ;;  %v3148_v29 = vmul.f32 %v5438_v36, %v5438_v36  ;;  %v536_v13 = vld [vmem:[#allocation2 + $0x308] sm:$0xff]  ;;  %v541_v46 = vld [vmem:[#allocation2 + $0x330] sm:$0xff]  ;;  %v5608_v23 = vpop.f32.mrf.mxu1 }
 0x181   : > { %2768 = vst.msk [vmem:[%s4810_s30 + $0x170] sm:$0xf] %vm2675_vm4, %v3988_v37  ;;  %v3991_v63 = vpack.c.bf16 %v5558_v8, %v5558_v8  ;;  %v3348_v62 = vsel %vm310_vm2, %v3144_v15, 0.0  ;;  %v3989_v47 = vpack.c.bf16 %v5569_v20, %v5569_v20  ;;  %v2963_v44 = vsel %vm310_vm2, %v5411_v55, 0.0  ;;  %v540_v15 = vld [vmem:[#allocation2 + $0x328] sm:$0xff]  ;;  %v543_v37 = vld [vmem:[#allocation2 + $0x340] sm:$0xff] }
 0x182   : > { %v2956_v31 = vadd.f32 %v2955_v21, %v2954_v54  ;;  %v3345_v33 = vadd.f32 %v3344_v61, %v3343_v0  ;;  %v5596_v61 = vsel %vm310_vm2, %v3149_v26, 0.0  ;;  %v5602_v19 = vsel %vm310_vm2, %v5427_v58, 0.0  ;;  %v539_v58 = vld [vmem:[#allocation2 + $0x320] sm:$0xff]  ;;  %v542_v54 = vld [vmem:[#allocation2 + $0x338] sm:$0xff]  ;;  %v545_v26 = vld [vmem:[#allocation2 + $0x350] sm:$0xff] }
 0x183   : > { %2771 = vst.msk [vmem:[%s4810_s30 + $0x17c] sm:$0xf] %vm2675_vm4, %v3991_v63  ;;  %v3994_v49 = vpack.c.bf16 %v5578_v28, %v5578_v28  ;;  %v3354_v0 = vsel %vm310_vm2, %v3147_v57, 0.0  ;;  %v2965_v55 = vsel %vm310_vm2, %v5438_v36, 0.0  ;;  %2769 = vst.msk [vmem:[%s4810_s30 + $0x174] sm:$0xf] %vm2675_vm4, %v3989_v47  ;;  %v1872_v57 = vadd.f32 %v5164_v48, %v536_v13  ;;  %v4217_v47 = vpop.f32.mrf.mxu1 }
 0x184   : > { %v3347_v12 = vadd.f32 %v3346_v6, %v3345_v33  ;;  %v2958_v32 = vadd.f32 %v2957_v25, %v2956_v31  ;;  %v5616_v38 = vsel %vm310_vm2, %v3150_v59, 0.0  ;;  %v5619_v6 = vsel %vm310_vm2, %v3148_v29, 0.0  ;;  %v546_v36 = vld [vmem:[#allocation2 + $0x358] sm:$0xff]  ;;  %v544_v59 = vld [vmem:[#allocation2 + $0x348] sm:$0xff] }
 0x185   : > { %2774 = vst.msk [vmem:[%s4810_s30 + $0x188] sm:$0xf] %vm2675_vm4, %v3994_v49  ;;  %v1874_v25 = vadd.f32 %v5152_v30, %v538_v51  ;;  %v1877_v63 = vadd.f32 %v5173_v1, %v541_v46  ;;  %v5629_v29 = vmul.f32 %v5457_v35, %v5457_v35  ;;  %v1878_v30 = vadd.f32 %v5193_v41, %v542_v54  ;;  %v550_v48 = vld [vmem:[#allocation2 + $0x378] sm:$0xff]  ;;  %v553_v1 = vld [vmem:[#allocation2 + $0x390] sm:$0xff]  ;;  %v6129_v49 = vld [vmem:[#allocation4_spill] sm:$0xff] }
 0x186   : > { %v2960_v21 = vadd.f32 %v2959_v52, %v2958_v32  ;;  %v3349_v14 = vadd.f32 %v3348_v62, %v3347_v12  ;;  %v1871_v52 = vadd.f32 %v5143_v11, %v535_v16  ;;  %v549_v12 = vld [vmem:[#allocation2 + $0x370] sm:$0xff]  ;;  %v547_v32 = vld [vmem:[#allocation2 + $0x360] sm:$0xff]  ;;  %v1875_v11 = vadd.f32 %v5182_v17, %v539_v58  ;;  %v548_v62 = vld [vmem:[#allocation2 + $0x368] sm:$0xff]  ;;  %2001 = vst.msk [vmem:[#allocation2 + $0x308] sm:$0xff] %vm310_vm2, %v1872_v57 }
 0x187   : > { %2003 = vst.msk [vmem:[#allocation2 + $0x318] sm:$0xff] %vm310_vm2, %v1874_v25  ;;  %2006 = vst.msk [vmem:[#allocation2 + $0x330] sm:$0xff] %vm310_vm2, %v1877_v63  ;;  %v1881_v13 = vadd.f32 %v6129_v49, %v545_v26  ;;  %v6130_v46 = vld [vmem:[#allocation5_spill] sm:$0xff]  ;;  %v554_v17 = vld [vmem:[#allocation2 + $0x398] sm:$0xff] }
 0x188   : > { %v3351_v31 = vadd.f32 %v3350_v42, %v3349_v14  ;;  %v2962_v33 = vadd.f32 %v2961_v24, %v2960_v21  ;;  %2000 = vst.msk [vmem:[#allocation2 + $0x300] sm:$0xff] %vm310_vm2, %v1871_v52  ;;  %v6128_v42 = vld [vmem:[#allocation3_spill] sm:$0xff]  ;;  %v1879_v21 = vadd.f32 %v6130_v46, %v543_v37  ;;  %v552_v58 = vld [vmem:[#allocation2 + $0x388] sm:$0xff]  ;;  %2004 = vst.msk [vmem:[#allocation2 + $0x320] sm:$0xff] %vm310_vm2, %v1875_v11 }
 0x189   : > { %v1876_v24 = vadd.f32 %v6128_v42, %v540_v15  ;;  %v551_v14 = vld [vmem:[#allocation2 + $0x380] sm:$0xff]  ;;  %2007 = vst.msk [vmem:[#allocation2 + $0x338] sm:$0xff] %vm310_vm2, %v1878_v30  ;;  %v6131_v41 = vld [vmem:[#allocation6_spill] sm:$0xff]  ;;  %v6133_v15 = vld [vmem:[#allocation8_spill] sm:$0xff] }
 0x18a   : > { %v2964_v16 = vadd.f32 %v2963_v44, %v2962_v33  ;;  %v3353_v51 = vadd.f32 %v3352_v27, %v3351_v31  ;;  %v1882_v44 = vadd.f32 %v6131_v41, %v546_v36  ;;  %v6132_v27 = vld [vmem:[#allocation7_spill] sm:$0xff]  ;;  %v1885_v52 = vadd.f32 %v6133_v15, %v549_v12  ;;  %v6134_v25 = vld [vmem:[#allocation9_spill] sm:$0xff]  ;;  %v558_v37 = vld [vmem:[#allocation2 + $0x3b8] sm:$0xff]  ;;  %2010 = vst.msk [vmem:[#allocation2 + $0x350] sm:$0xff] %vm310_vm2, %v1881_v13 }
 0x18b   : > { %2005 = vst.msk [vmem:[#allocation2 + $0x328] sm:$0xff] %vm310_vm2, %v1876_v24  ;;  %v1880_v54 = vadd.f32 %v6132_v27, %v544_v59  ;;  %v1883_v31 = vadd.f32 %v6134_v25, %v547_v32  ;;  %v557_v26 = vld [vmem:[#allocation2 + $0x3b0] sm:$0xff]  ;;  %v555_v33 = vld [vmem:[#allocation2 + $0x3a0] sm:$0xff]  ;;  %2008 = vst.msk [vmem:[#allocation2 + $0x340] sm:$0xff] %vm310_vm2, %v1879_v21  ;;  %v1887_v12 = vadd.f32 %v5345_v43, %v551_v14  ;;  %v3362_v27 = vsel %vm310_vm2, %v5629_v29, 0.0 }
 0x18c   : > { %v3355_v57 = vadd.f32 %v3354_v0, %v3353_v51  ;;  %v2966_v63 = vadd.f32 %v2965_v55, %v2964_v16  ;;  %v6135_v11 = vld [vmem:[#allocation10_spill] sm:$0xff]  ;;  %v6136_v42 = vld [vmem:[#allocation11_spill] sm:$0xff]  ;;  %v556_v36 = vld [vmem:[#allocation2 + $0x3a8] sm:$0xff]  ;;  %2011 = vst.msk [vmem:[#allocation2 + $0x358] sm:$0xff] %vm310_vm2, %v1882_v44  ;;  %v1890_v32 = vadd.f32 %v5372_v56, %v554_v17  ;;  %v1747_v51 = vpop.f32.mrf.mxu1  ;;  %v1893_v21 = vadd.f32 %v5440_v5, %v557_v26 }
 0x18d   : > { %v1886_v30 = vadd.f32 %v6135_v11, %v550_v48  ;;  %v1884_v24 = vadd.f32 %v6136_v42, %v548_v62  ;;  %v561_v49 = vld [vmem:[#allocation2 + $0x3d0] sm:$0xff]  ;;  %v559_v59 = vld [vmem:[#allocation2 + $0x3c0] sm:$0xff]  ;;  %2009 = vst.msk [vmem:[#allocation2 + $0x348] sm:$0xff] %vm310_vm2, %v1880_v54  ;;  %2014 = vst.msk [vmem:[#allocation2 + $0x370] sm:$0xff] %vm310_vm2, %v1885_v52  ;;  %v1888_v48 = vadd.f32 %v5407_v39, %v552_v58  ;;  %v2973_v54 = vsel %vm310_vm2, %v5473_v10, 0.0 }
 0x18e   : > { %2012 = vst.msk [vmem:[#allocation2 + $0x360] sm:$0xff] %vm310_vm2, %v1883_v31  ;;  %v6137_v0 = vld [vmem:[#allocation12_spill] sm:$0xff]  ;;  %v562_v62 = vld [vmem:[#allocation2 + $0x3d8] sm:$0xff]  ;;  %v2968_v13 = vadd.f32 %v5582_v60, %v2966_v63  ;;  %v3357_v46 = vadd.f32 %v5619_v6, %v3355_v57  ;;  %2016 = vst.msk [vmem:[#allocation2 + $0x380] sm:$0xff] %vm310_vm2, %v1887_v12  ;;  %v1894_v43 = vadd.f32 %v5501_v18, %v558_v37  ;;  %v2975_v29 = vsel %vm310_vm2, %v5444_v40, 0.0 }
 0x18f   : > { %v1889_v55 = vadd.f32 %v6137_v0, %v553_v1  ;;  %v560_v16 = vld [vmem:[#allocation2 + $0x3c8] sm:$0xff]  ;;  %2015 = vst.msk [vmem:[#allocation2 + $0x378] sm:$0xff] %vm310_vm2, %v1886_v30  ;;  %2013 = vst.msk [vmem:[#allocation2 + $0x368] sm:$0xff] %vm310_vm2, %v1884_v24  ;;  %v1891_v1 = vadd.f32 %v5467_v7, %v555_v33  ;;  %v1892_v56 = vadd.f32 %v5535_v2, %v556_v36  ;;  %v5675_v6 = vld [vmem:[#allocation2 + $0x300] sm:$0xff]  ;;  %v2971_v2 = vsel %vm310_vm2, %v5457_v35, 0.0 }
 0x190   : > { %2019 = vst.msk [vmem:[#allocation2 + $0x398] sm:$0xff] %vm310_vm2, %v1890_v32  ;;  %2017 = vst.msk [vmem:[#allocation2 + $0x388] sm:$0xff] %vm310_vm2, %v1888_v48  ;;  %v1897_v39 = vadd.f32 %v5571_v34, %v561_v49  ;;  %v1895_v60 = vadd.f32 %v5608_v23, %v559_v59  ;;  %v3359_v5 = vadd.f32 %v5596_v61, %v3357_v46  ;;  %v5677_v14 = vld [vmem:[#allocation2 + $0x318] sm:$0xff]  ;;  %v5689_v23 = vld [vmem:[#allocation2 + $0x308] sm:$0xff]  ;;  %v2977_v30 = vsel %vm310_vm2, %v5465_v3, 0.0 }
 0x191   : > { %2018 = vst.msk [vmem:[#allocation2 + $0x390] sm:$0xff] %vm310_vm2, %v1889_v55  ;;  %v2970_v7 = vadd.f32 %v5602_v19, %v2968_v13  ;;  %2022 = vst.msk [vmem:[#allocation2 + $0x3b0] sm:$0xff] %vm310_vm2, %v1893_v21  ;;  %v1898_v17 = vadd.f32 %v4217_v47, %v562_v62  ;;  %v1896_v18 = vadd.f32 %v1747_v51, %v560_v16  ;;  %v5691_v58 = vld [vmem:[#allocation2 + $0x330] sm:$0xff]  ;;  %v5698_v41 = vld [vmem:[#allocation2 + $0x320] sm:$0xff]  ;;  %v2981_v46 = vsel %vm310_vm2, %v5523_v22, 0.0 }
 0x192   : > { %2020 = vst.msk [vmem:[#allocation2 + $0x3a0] sm:$0xff] %vm310_vm2, %v1891_v1  ;;  %v3152_v34 = vmul.f32 %v5473_v10, %v5473_v10  ;;  %v3992_v61 = vpack.c.bf16 %v5675_v6, %v5675_v6  ;;  %v3995_v19 = vpack.c.bf16 %v5677_v14, %v5677_v14  ;;  %2023 = vst.msk [vmem:[#allocation2 + $0x3b8] sm:$0xff] %vm310_vm2, %v1894_v43  ;;  %v5716_v31 = vld [vmem:[#allocation2 + $0x338] sm:$0xff]  ;;  %v5727_v37 = vld [vmem:[#allocation2 + $0x328] sm:$0xff] }
 0x193   : > { %2021 = vst.msk [vmem:[#allocation2 + $0x3a8] sm:$0xff] %vm310_vm2, %v1892_v56  ;;  %2026 = vst.msk [vmem:[#allocation2 + $0x3d0] sm:$0xff] %vm310_vm2, %v1897_v39  ;;  %v2972_v35 = vadd.f32 %v2971_v2, %v2970_v7  ;;  %v3361_v47 = vadd.f32 %v5616_v38, %v3359_v5  ;;  %v3153_v44 = vmul.f32 %v5444_v40, %v5444_v40  ;;  %v5731_v11 = vld [vmem:[#allocation2 + $0x350] sm:$0xff]  ;;  %v5744_v0 = vld [vmem:[#allocation2 + $0x340] sm:$0xff] }
 0x194   : > { %2024 = vst.msk [vmem:[#allocation2 + $0x3c0] sm:$0xff] %vm310_vm2, %v1895_v60  ;;  %2027 = vst.msk [vmem:[#allocation2 + $0x3d8] sm:$0xff] %vm310_vm2, %v1898_v17  ;;  %v3993_v38 = vpack.c.bf16 %v5689_v23, %v5689_v23  ;;  %v3998_v25 = vpack.c.bf16 %v5691_v58, %v5691_v58  ;;  %v3154_v10 = vmul.f32 %v5465_v3, %v5465_v3  ;;  %v3364_v26 = vsel %vm310_vm2, %v3152_v34, 0.0  ;;  %v5755_v48 = vld [vmem:[#allocation2 + $0x358] sm:$0xff]  ;;  %v5759_v51 = vld [vmem:[#allocation2 + $0x348] sm:$0xff] }
 0x195   : > { %2025 = vst.msk [vmem:[#allocation2 + $0x3c8] sm:$0xff] %vm310_vm2, %v1896_v18  ;;  %v3363_v15 = vadd.f32 %v3362_v27, %v3361_v47  ;;  %v2974_v52 = vadd.f32 %v2973_v54, %v2972_v35  ;;  %v3996_v33 = vpack.c.bf16 %v5698_v41, %v5698_v41  ;;  %v3366_v40 = vsel %vm310_vm2, %v3153_v44, 0.0  ;;  %v5772_v39 = vld [vmem:[#allocation2 + $0x370] sm:$0xff]  ;;  %v5783_v17 = vld [vmem:[#allocation2 + $0x360] sm:$0xff] }
 0x196   : > { %2772 = vst.msk [vmem:[%s4810_s30 + $0x180] sm:$0xf] %vm2675_vm4, %v3992_v61  ;;  %2775 = vst.msk [vmem:[%s4810_s30 + $0x18c] sm:$0xf] %vm2675_vm4, %v3995_v19  ;;  %v3155_v42 = vmul.f32 %v5499_v4, %v5499_v4  ;;  %v3999_v24 = vpack.c.bf16 %v5716_v31, %v5716_v31  ;;  %v3997_v59 = vpack.c.bf16 %v5727_v37, %v5727_v37  ;;  %v3368_v55 = vsel %vm310_vm2, %v3154_v10, 0.0  ;;  %v5787_v34 = vld [vmem:[#allocation2 + $0x378] sm:$0xff] }
 0x197   : > { %2773 = vst.msk [vmem:[%s4810_s30 + $0x184] sm:$0xf] %vm2675_vm4, %v3993_v38  ;;  %v2976_v57 = vadd.f32 %v2975_v29, %v2974_v52  ;;  %v3365_v63 = vadd.f32 %v3364_v26, %v3363_v15  ;;  %2778 = vst.msk [vmem:[%s4810_s30 + $0x198] sm:$0xf] %vm2675_vm4, %v3998_v25  ;;  %v2979_v3 = vsel %vm310_vm2, %v5499_v4, 0.0  ;;  %v3156_v12 = vmul.f32 %v5523_v22, %v5523_v22  ;;  %v5800_v54 = vld [vmem:[#allocation2 + $0x368] sm:$0xff] }
 0x198   : > { %2776 = vst.msk [vmem:[%s4810_s30 + $0x190] sm:$0xf] %vm2675_vm4, %v3996_v33  ;;  %2779 = vst.msk [vmem:[%s4810_s30 + $0x19c] sm:$0xf] %vm2675_vm4, %v3999_v24  ;;  %v4002_v32 = vpack.c.bf16 %v5731_v11, %v5731_v11  ;;  %v3157_v4 = vmul.f32 %v5487_v9, %v5487_v9  ;;  %v3370_v13 = vsel %vm310_vm2, %v3155_v42, 0.0  ;;  %v4000_v21 = vpack.c.bf16 %v5744_v0, %v5744_v0  ;;  %v5811_v25 = vld [vmem:[#allocation2 + $0x390] sm:$0xff] }
 0x199   : > { %v3367_v36 = vadd.f32 %v3366_v40, %v3365_v63  ;;  %v2978_v49 = vadd.f32 %v2977_v30, %v2976_v57  ;;  %2777 = vst.msk [vmem:[%s4810_s30 + $0x194] sm:$0xf] %vm2675_vm4, %v3997_v59  ;;  %v4003_v56 = vpack.c.bf16 %v5755_v48, %v5755_v48  ;;  %v2983_v60 = vsel %vm310_vm2, %v5487_v9, 0.0  ;;  %v5815_v26 = vld [vmem:[#allocation2 + $0x380] sm:$0xff]  ;;  %v5828_v24 = vld [vmem:[#allocation2 + $0x398] sm:$0xff] }
 0x19a   : > { %2782 = vst.msk [vmem:[%s4810_s30 + $0x1a8] sm:$0xf] %vm2675_vm4, %v4002_v32  ;;  %v3158_v5 = vmul.f32 %v5508_v45, %v5508_v45  ;;  %v3372_v22 = vsel %vm310_vm2, %v3156_v12, 0.0  ;;  %2780 = vst.msk [vmem:[%s4810_s30 + $0x1a0] sm:$0xf] %vm2675_vm4, %v4000_v21  ;;  %v4001_v7 = vpack.c.bf16 %v5759_v51, %v5759_v51  ;;  %v3374_v9 = vsel %vm310_vm2, %v3157_v4, 0.0 }
 0x19b   : > { %v2980_v62 = vadd.f32 %v2979_v3, %v2978_v49  ;;  %v3369_v16 = vadd.f32 %v3368_v55, %v3367_v36  ;;  %2783 = vst.msk [vmem:[%s4810_s30 + $0x1ac] sm:$0xf] %vm2675_vm4, %v4003_v56  ;;  %v2985_v61 = vsel %vm310_vm2, %v5508_v45, 0.0  ;;  %v3159_v19 = vmul.f32 %v5543_v53, %v5543_v53  ;;  %v5839_v55 = vld [vmem:[#allocation2 + $0x388] sm:$0xff]  ;;  %v5843_v32 = vld [vmem:[#allocation2 + $0x3b0] sm:$0xff] }
 0x19c   : > { %2781 = vst.msk [vmem:[%s4810_s30 + $0x1a4] sm:$0xf] %vm2675_vm4, %v4001_v7  ;;  %v4006_v35 = vpack.c.bf16 %v5772_v39, %v5772_v39  ;;  %v4004_v27 = vpack.c.bf16 %v5783_v17, %v5783_v17  ;;  %v3376_v38 = vsel %vm310_vm2, %v3158_v5, 0.0  ;;  %v2987_v45 = vsel %vm310_vm2, %v5543_v53, 0.0 }
 0x19d   : > { %v3371_v1 = vadd.f32 %v3370_v13, %v3369_v16  ;;  %v2982_v43 = vadd.f32 %v2981_v46, %v2980_v62  ;;  %v3160_v15 = vmul.f32 %v5569_v20, %v5569_v20  ;;  %v4007_v52 = vpack.c.bf16 %v5787_v34, %v5787_v34 }
 0x19e   : > { %2786 = vst.msk [vmem:[%s4810_s30 + $0x1b8] sm:$0xf] %vm2675_vm4, %v4006_v35  ;;  %2784 = vst.msk [vmem:[%s4810_s30 + $0x1b0] sm:$0xf] %vm2675_vm4, %v4004_v27  ;;  %v3161_v53 = vmul.f32 %v5533_v50, %v5533_v50  ;;  %v3378_v33 = vsel %vm310_vm2, %v3159_v19, 0.0  ;;  %v2989_v57 = vsel %vm310_vm2, %v5569_v20, 0.0  ;;  %v4005_v63 = vpack.c.bf16 %v5800_v54, %v5800_v54 }
 0x19f   : > { %v2984_v18 = vadd.f32 %v2983_v60, %v2982_v43  ;;  %v3373_v2 = vadd.f32 %v3372_v22, %v3371_v1  ;;  %2787 = vst.msk [vmem:[%s4810_s30 + $0x1bc] sm:$0xf] %vm2675_vm4, %v4007_v52  ;;  %v4010_v42 = vpack.c.bf16 %v5811_v25, %v5811_v25  ;;  %v2991_v36 = vsel %vm310_vm2, %v5533_v50, 0.0  ;;  %v5845_v50 = vpop.f32.mrf.mxu1  ;;  %v5858_v43 = vld [vmem:[#allocation2 + $0x3a0] sm:$0xff]  ;;  %v5869_v22 = vld [vmem:[#allocation2 + $0x3b8] sm:$0xff] }
 0x1a0   : > { %v3162_v49 = vmul.f32 %v5558_v8, %v5558_v8  ;;  %v3380_v20 = vsel %vm310_vm2, %v3160_v15, 0.0  ;;  %2785 = vst.msk [vmem:[%s4810_s30 + $0x1b4] sm:$0xf] %vm2675_vm4, %v4005_v63  ;;  %v4008_v59 = vpack.c.bf16 %v5815_v26, %v5815_v26  ;;  %v3382_v62 = vsel %vm310_vm2, %v3161_v53, 0.0 }
 0x1a1   : > { %v3375_v47 = vadd.f32 %v3374_v9, %v3373_v2  ;;  %v2986_v44 = vadd.f32 %v2985_v61, %v2984_v18  ;;  %2790 = vst.msk [vmem:[%s4810_s30 + $0x1c8] sm:$0xf] %vm2675_vm4, %v4010_v42  ;;  %v2993_v16 = vsel %vm310_vm2, %v5558_v8, 0.0  ;;  %v3163_v4 = vmul.f32 %v5675_v6, %v5675_v6  ;;  %v5873_v2 = vld [vmem:[#allocation2 + $0x3a8] sm:$0xff]  ;;  %v1760_v9 = vpop.f32.mrf.mxu1 }
 0x1a2   : > { %2788 = vst.msk [vmem:[%s4810_s30 + $0x1c0] sm:$0xf] %vm2675_vm4, %v4008_v59  ;;  %v4011_v13 = vpack.c.bf16 %v5828_v24, %v5828_v24  ;;  %v4009_v1 = vpack.c.bf16 %v5839_v55, %v5839_v55  ;;  %v3384_v56 = vsel %vm310_vm2, %v3162_v49, 0.0  ;;  %v2995_v8 = vsel %vm310_vm2, %v5675_v6, 0.0 }
 0x1a3   : > { %v2988_v29 = vadd.f32 %v2987_v45, %v2986_v44  ;;  %v3377_v10 = vadd.f32 %v3376_v38, %v3375_v47  ;;  %v3164_v60 = vmul.f32 %v5689_v23, %v5689_v23  ;;  %v4014_v5 = vpack.c.bf16 %v5843_v32, %v5843_v32  ;;  %v5886_v38 = vld [vmem:[#allocation2 + $0x3d0] sm:$0xff] }
 0x1a4   : > { %2791 = vst.msk [vmem:[%s4810_s30 + $0x1cc] sm:$0xf] %vm2675_vm4, %v4011_v13  ;;  %2789 = vst.msk [vmem:[%s4810_s30 + $0x1c4] sm:$0xf] %vm2675_vm4, %v4009_v1  ;;  %v3165_v6 = vmul.f32 %v5578_v28, %v5578_v28  ;;  %v3386_v61 = vsel %vm310_vm2, %v3163_v4, 0.0  ;;  %v2997_v19 = vsel %vm310_vm2, %v5689_v23, 0.0  ;;  %v4012_v35 = vpack.c.bf16 %v5858_v43, %v5858_v43 }
 0x1a5   : > { %v3379_v40 = vadd.f32 %v3378_v33, %v3377_v10  ;;  %v2990_v30 = vadd.f32 %v2989_v57, %v2988_v29  ;;  %2794 = vst.msk [vmem:[%s4810_s30 + $0x1d8] sm:$0xf] %vm2675_vm4, %v4014_v5  ;;  %v4015_v27 = vpack.c.bf16 %v5869_v22, %v5869_v22  ;;  %v2999_v45 = vsel %vm310_vm2, %v5578_v28, 0.0  ;;  %v5897_v29 = vld [vmem:[#allocation2 + $0x3c0] sm:$0xff]  ;;  %v5901_v33 = vld [vmem:[#allocation2 + $0x3d8] sm:$0xff]  ;;  %v4221_v28 = vpop.f32.mrf.mxu1 }
 0x1a6   : > { %v3166_v15 = vmul.f32 %v5677_v14, %v5677_v14  ;;  %v3388_v23 = vsel %vm310_vm2, %v3164_v60, 0.0  ;;  %2792 = vst.msk [vmem:[%s4810_s30 + $0x1d0] sm:$0xf] %vm2675_vm4, %v4012_v35  ;;  %v4013_v52 = vpack.c.bf16 %v5873_v2, %v5873_v2  ;;  %v3390_v57 = vsel %vm310_vm2, %v3165_v6, 0.0 }
 0x1a7   : > { %v2992_v3 = vadd.f32 %v2991_v36, %v2990_v30  ;;  %v3381_v12 = vadd.f32 %v3380_v20, %v3379_v40  ;;  %2795 = vst.msk [vmem:[%s4810_s30 + $0x1dc] sm:$0xf] %vm2675_vm4, %v4015_v27  ;;  %v3001_v63 = vsel %vm310_vm2, %v5677_v14, 0.0  ;;  %v3167_v40 = vmul.f32 %v5698_v41, %v5698_v41  ;;  %v5914_v20 = vld [vmem:[#allocation2 + $0x3c8] sm:$0xff]  ;;  %v1763_v1 = vpop.f32.mrf.mxu1 }
 0x1a8   : > { %2793 = vst.msk [vmem:[%s4810_s30 + $0x1d4] sm:$0xf] %vm2675_vm4, %v4013_v52  ;;  %v4018_v30 = vpack.c.bf16 %v5886_v38, %v5886_v38  ;;  %v4016_v49 = vpack.c.bf16 %v5897_v29, %v5897_v29  ;;  %v3392_v59 = vsel %vm310_vm2, %v3166_v15, 0.0  ;;  %v3003_v14 = vsel %vm310_vm2, %v5698_v41, 0.0  ;;  %v566_v41 = vld [vmem:[#allocation2 + $0x3f8] sm:$0xff] }
 0x1a9   : > { %v3383_v46 = vadd.f32 %v3382_v62, %v3381_v12  ;;  %v2994_v21 = vadd.f32 %v2993_v16, %v2992_v3  ;;  %v3168_v3 = vmul.f32 %v5727_v37, %v5727_v37  ;;  %v4019_v12 = vpack.c.bf16 %v5901_v33, %v5901_v33  ;;  %v565_v62 = vld [vmem:[#allocation2 + $0x3f0] sm:$0xff] }
 0x1aa   : > { %2798 = vst.msk [vmem:[%s4810_s30 + $0x1e8] sm:$0xf] %vm2675_vm4, %v4018_v30  ;;  %v3007_v16 = vsel %vm310_vm2, %v5691_v58, 0.0  ;;  %2796 = vst.msk [vmem:[%s4810_s30 + $0x1e0] sm:$0xf] %vm2675_vm4, %v4016_v49  ;;  %v3005_v60 = vsel %vm310_vm2, %v5727_v37, 0.0  ;;  %v4017_v5 = vpack.c.bf16 %v5914_v20, %v5914_v20  ;;  %v1902_v35 = vadd.f32 %v4221_v28, %v566_v41 }
 0x1ab   : > { %v2996_v7 = vadd.f32 %v2995_v8, %v2994_v21  ;;  %v3385_v18 = vadd.f32 %v3384_v56, %v3383_v46  ;;  %v563_v46 = vld [vmem:[#allocation2 + $0x3e0] sm:$0xff]  ;;  %v564_v21 = vld [vmem:[#allocation2 + $0x3e8] sm:$0xff]  ;;  %v3169_v56 = vmul.f32 %v5691_v58, %v5691_v58  ;;  %v3394_v8 = vsel %vm310_vm2, %v3167_v40, 0.0  ;;  %2799 = vst.msk [vmem:[%s4810_s30 + $0x1ec] sm:$0xf] %vm2675_vm4, %v4019_v12 }
 0x1ac   : > { %2797 = vst.msk [vmem:[%s4810_s30 + $0x1e4] sm:$0xf] %vm2675_vm4, %v4017_v5  ;;  %v1899_v58 = vadd.f32 %v1760_v9, %v563_v46  ;;  %v3171_v15 = vmul.f32 %v5744_v0, %v5744_v0  ;;  %v3011_v52 = vsel %vm310_vm2, %v5744_v0, 0.0  ;;  %v3173_v28 = vmul.f32 %v5731_v11, %v5731_v11 }
 0x1ad   : > { %v3387_v47 = vadd.f32 %v3386_v61, %v3385_v18  ;;  %v2998_v44 = vadd.f32 %v2997_v19, %v2996_v7  ;;  %v3170_v18 = vmul.f32 %v5716_v31, %v5716_v31  ;;  %v1901_v61 = vadd.f32 %v5845_v50, %v565_v62  ;;  %2031 = vst.msk [vmem:[#allocation2 + $0x3f8] sm:$0xff] %vm310_vm2, %v1902_v35 }
 0x1ae   : > { %v3396_v19 = vsel %vm310_vm2, %v3168_v3, 0.0  ;;  %v3398_v27 = vsel %vm310_vm2, %v3169_v56, 0.0  ;;  %2028 = vst.msk [vmem:[#allocation2 + $0x3e0] sm:$0xff] %vm310_vm2, %v1899_v58  ;;  %v3174_v0 = vmul.f32 %v5755_v48, %v5755_v48  ;;  %v3019_v56 = vsel %vm310_vm2, %v5783_v17, 0.0 }
 0x1af   : > { %v3000_v10 = vadd.f32 %v2999_v45, %v2998_v44  ;;  %v3389_v53 = vadd.f32 %v3388_v23, %v3387_v47  ;;  %v1900_v47 = vadd.f32 %v1763_v1, %v564_v21  ;;  %2030 = vst.msk [vmem:[#allocation2 + $0x3f0] sm:$0xff] %vm310_vm2, %v1901_v61  ;;  %v3009_v45 = vsel %vm310_vm2, %v5716_v31, 0.0 }
 0x1b0   : > { %v3400_v23 = vsel %vm310_vm2, %v3170_v18, 0.0  ;;  %v3408_v1 = vsel %vm310_vm2, %v3174_v0, 0.0  ;;  %v3178_v58 = vmul.f32 %v5787_v34, %v5787_v34  ;;  %v3033_v0 = vsel %vm310_vm2, %v5828_v24, 0.0 }
 0x1b1   : > { %v3391_v42 = vadd.f32 %v3390_v57, %v3389_v53  ;;  %v3002_v36 = vadd.f32 %v3001_v63, %v3000_v10  ;;  %2029 = vst.msk [vmem:[#allocation2 + $0x3e8] sm:$0xff] %vm310_vm2, %v1900_v47  ;;  %v3172_v10 = vmul.f32 %v5759_v51, %v5759_v51  ;;  %v3402_v57 = vsel %vm310_vm2, %v3171_v15, 0.0 }
 0x1b2   : > { %v3013_v63 = vsel %vm310_vm2, %v5759_v51, 0.0 }
 0x1b3   : > { %v3004_v4 = vadd.f32 %v3003_v14, %v3002_v36  ;;  %v3393_v13 = vadd.f32 %v3392_v59, %v3391_v42  ;;  %v3015_v42 = vsel %vm310_vm2, %v5731_v11, 0.0  ;;  %v3404_v36 = vsel %vm310_vm2, %v3172_v10, 0.0 }
 0x1b4   : > { %v5974_v12 = vld [vmem:[#allocation2 + $0x3f8] sm:$0xff]  ;;  %v3406_v11 = vsel %vm310_vm2, %v3173_v28, 0.0  ;;  %v3181_v10 = vmul.f32 %v5811_v25, %v5811_v25 }
 0x1b5   : > { %v3395_v7 = vadd.f32 %v3394_v8, %v3393_v13  ;;  %v3006_v6 = vadd.f32 %v3005_v60, %v3004_v4  ;;  %v5972_v51 = vld [vmem:[#allocation2 + $0x3e0] sm:$0xff]  ;;  %v3175_v4 = vmul.f32 %v5783_v17, %v5783_v17  ;;  %v4023_v21 = vpack.c.bf16 %v5974_v12, %v5974_v12 }
 0x1b6   : > { %v5968_v49 = vld [vmem:[#allocation2 + $0x3f0] sm:$0xff]  ;;  %v4020_v13 = vpack.c.bf16 %v5972_v51, %v5972_v51  ;;  %v3021_v17 = vsel %vm310_vm2, %v5800_v54, 0.0 }
 0x1b7   : > { %v3008_v37 = vadd.f32 %v3007_v16, %v3006_v6  ;;  %v3397_v44 = vadd.f32 %v3396_v19, %v3395_v7  ;;  %v4022_v3 = vpack.c.bf16 %v5968_v49, %v5968_v49  ;;  %v3017_v16 = vsel %vm310_vm2, %v5755_v48, 0.0  ;;  %2803 = vst.msk [vmem:[%s4810_s30 + $0x1fc] sm:$0xf] %vm2675_vm4, %v4023_v21 }
 0x1b8   : > { %v5976_v62 = vld [vmem:[#allocation2 + $0x3e8] sm:$0xff]  ;;  %v3176_v48 = vmul.f32 %v5800_v54, %v5800_v54  ;;  %2800 = vst.msk [vmem:[%s4810_s30 + $0x1f0] sm:$0xf] %vm2675_vm4, %v4020_v13  ;;  %v3177_v7 = vmul.f32 %v5772_v39, %v5772_v39  ;;  %v3410_v18 = vsel %vm310_vm2, %v3175_v4, 0.0  ;;  %v3023_v19 = vsel %vm310_vm2, %v5772_v39, 0.0 }
 0x1b9   : > { %v3399_v50 = vadd.f32 %v3398_v27, %v3397_v44  ;;  %v3010_v9 = vadd.f32 %v3009_v45, %v3008_v37  ;;  %2802 = vst.msk [vmem:[%s4810_s30 + $0x1f8] sm:$0xf] %vm2675_vm4, %v4022_v3  ;;  %v4021_v8 = vpack.c.bf16 %v5976_v62, %v5976_v62  ;;  %v3025_v27 = vsel %vm310_vm2, %v5787_v34, 0.0 }
 0x1ba   : > { %v3412_v35 = vsel %vm310_vm2, %v3176_v48, 0.0  ;;  %v3414_v44 = vsel %vm310_vm2, %v3177_v7, 0.0  ;;  %v3179_v54 = vmul.f32 %v5815_v26, %v5815_v26  ;;  %v3027_v39 = vsel %vm310_vm2, %v5815_v26, 0.0 }
 0x1bb   : > { %v3012_v31 = vadd.f32 %v3011_v52, %v3010_v9  ;;  %v3401_v53 = vadd.f32 %v3400_v23, %v3399_v50  ;;  %2801 = vst.msk [vmem:[%s4810_s30 + $0x1f4] sm:$0xf] %vm2675_vm4, %v4021_v8  ;;  %v3416_v50 = vsel %vm310_vm2, %v3178_v58, 0.0  ;;  %v3180_v9 = vmul.f32 %v5839_v55, %v5839_v55 }
 0x1bc   : > { %v3418_v34 = vsel %vm310_vm2, %v3179_v54, 0.0  ;;  %v3182_v26 = vmul.f32 %v5828_v24, %v5828_v24  ;;  %v3184_v3 = vmul.f32 %v5873_v2, %v5873_v2  ;;  %v3185_v4 = vmul.f32 %v5843_v32, %v5843_v32 }
 0x1bd   : > { %v3403_v40 = vadd.f32 %v3402_v57, %v3401_v53  ;;  %v3014_v30 = vadd.f32 %v3013_v63, %v3012_v31  ;;  %v3029_v31 = vsel %vm310_vm2, %v5839_v55, 0.0  ;;  %v3031_v57 = vsel %vm310_vm2, %v5811_v25, 0.0 }
 0x1be   : > { %v3420_v63 = vsel %vm310_vm2, %v3180_v9, 0.0  ;;  %v3183_v55 = vmul.f32 %v5858_v43, %v5858_v43  ;;  %v3035_v25 = vsel %vm310_vm2, %v5858_v43, 0.0  ;;  %v3037_v13 = vsel %vm310_vm2, %v5873_v2, 0.0 }
 0x1bf   : > { %v3016_v59 = vadd.f32 %v3015_v42, %v3014_v30  ;;  %v3405_v14 = vadd.f32 %v3404_v36, %v3403_v40  ;;  %v3422_v42 = vsel %vm310_vm2, %v3181_v10, 0.0  ;;  %v3039_v21 = vsel %vm310_vm2, %v5843_v32, 0.0 }
 0x1c0   : > { %v3426_v24 = vsel %vm310_vm2, %v3183_v55, 0.0  ;;  %v3186_v43 = vmul.f32 %v5869_v22, %v5869_v22  ;;  %v3430_v8 = vsel %vm310_vm2, %v3185_v4, 0.0  ;;  %v3187_v2 = vmul.f32 %v5897_v29, %v5897_v29 }
 0x1c1   : > { %v3407_v46 = vadd.f32 %v3406_v11, %v3405_v14  ;;  %v3018_v41 = vadd.f32 %v3017_v16, %v3016_v59  ;;  %v3424_v14 = vsel %vm310_vm2, %v3182_v26, 0.0  ;;  %v3043_v32 = vsel %vm310_vm2, %v5897_v29, 0.0 }
 0x1c2   : > { %v3045_v58 = vsel %vm310_vm2, %v5914_v20, 0.0  ;;  %v3190_v29 = vmul.f32 %v5901_v33, %v5901_v33 }
 0x1c3   : > { %v3020_v60 = vadd.f32 %v3019_v56, %v3018_v41  ;;  %v3409_v5 = vadd.f32 %v3408_v1, %v3407_v46  ;;  %v3428_v1 = vsel %vm310_vm2, %v3184_v3, 0.0 }
 0x1c4   : > { %v3440_v9 = vsel %vm310_vm2, %v3190_v29, 0.0 }
 0x1c5   : > { %v3411_v6 = vadd.f32 %v3410_v18, %v3409_v5  ;;  %v3022_v61 = vadd.f32 %v3021_v17, %v3020_v60  ;;  %v3041_v60 = vsel %vm310_vm2, %v5869_v22, 0.0  ;;  %v3432_v18 = vsel %vm310_vm2, %v3186_v43, 0.0 }
 0x1c6   : > { %v3188_v17 = vmul.f32 %v5914_v20, %v5914_v20  ;;  %v3434_v22 = vsel %vm310_vm2, %v3187_v2, 0.0  ;;  %v3191_v20 = vmul.f32 %v5972_v51, %v5972_v51 }
 0x1c7   : > { %v3024_v47 = vadd.f32 %v3023_v19, %v3022_v61  ;;  %v3413_v37 = vadd.f32 %v3412_v35, %v3411_v6  ;;  %v3189_v19 = vmul.f32 %v5886_v38, %v5886_v38 }
 0x1c9   : > { %v3415_v45 = vadd.f32 %v3414_v44, %v3413_v37  ;;  %v3026_v15 = vadd.f32 %v3025_v27, %v3024_v47  ;;  %v3047_v37 = vsel %vm310_vm2, %v5886_v38, 0.0  ;;  %v3436_v44 = vsel %vm310_vm2, %v3188_v17, 0.0 }
 0x1ca   : > { %v3051_v38 = vsel %vm310_vm2, %v5972_v51, 0.0  ;;  %v3194_v51 = vmul.f32 %v5974_v12, %v5974_v12 }
 0x1cb   : > { %v3028_v23 = vadd.f32 %v3027_v39, %v3026_v15  ;;  %v3417_v52 = vadd.f32 %v3416_v50, %v3415_v45  ;;  %v3438_v45 = vsel %vm310_vm2, %v3189_v19, 0.0  ;;  %v3049_v15 = vsel %vm310_vm2, %v5901_v33, 0.0 }
 0x1cc   : > { %v3442_v33 = vsel %vm310_vm2, %v3191_v20, 0.0  ;;  %v3448_v55 = vsel %vm310_vm2, %v3194_v51, 0.0 }
 0x1cd   : > { %v3419_v53 = vadd.f32 %v3418_v34, %v3417_v52  ;;  %v3030_v28 = vadd.f32 %v3029_v31, %v3028_v23  ;;  %v3192_v23 = vmul.f32 %v5976_v62, %v5976_v62  ;;  %v3193_v34 = vmul.f32 %v5968_v49, %v5968_v49 }
 0x1ce   : > { %v3053_v31 = vsel %vm310_vm2, %v5976_v62, 0.0 }
 0x1cf   : > { %v3032_v40 = vadd.f32 %v3031_v57, %v3030_v28  ;;  %v3421_v30 = vadd.f32 %v3420_v63, %v3419_v53  ;;  %v3055_v57 = vsel %vm310_vm2, %v5968_v49, 0.0  ;;  %v3444_v26 = vsel %vm310_vm2, %v3192_v23, 0.0 }
 0x1d1   : > { %v3423_v36 = vadd.f32 %v3422_v42, %v3421_v30  ;;  %v3034_v59 = vadd.f32 %v3033_v0, %v3032_v40  ;;  %v3446_v30 = vsel %vm310_vm2, %v3193_v34, 0.0  ;;  %v3057_v42 = vsel %vm310_vm2, %v5974_v12, 0.0 }
 0x1d3   : > { %v3036_v11 = vadd.f32 %v3035_v25, %v3034_v59  ;;  %v3425_v16 = vadd.f32 %v3424_v14, %v3423_v36 }
 0x1d5   : > { %v3427_v46 = vadd.f32 %v3426_v24, %v3425_v16  ;;  %v3038_v41 = vadd.f32 %v3037_v13, %v3036_v11 }
 0x1d7   : > { %v3040_v56 = vadd.f32 %v3039_v21, %v3038_v41  ;;  %v3429_v48 = vadd.f32 %v3428_v1, %v3427_v46 }
 0x1d9   : > { %v3431_v5 = vadd.f32 %v3430_v8, %v3429_v48  ;;  %v3042_v7 = vadd.f32 %v3041_v60, %v3040_v56 }
 0x1db   : > { %v3044_v6 = vadd.f32 %v3043_v32, %v3042_v7  ;;  %v3433_v61 = vadd.f32 %v3432_v18, %v3431_v5 }
 0x1dd   : > { %v3435_v35 = vadd.f32 %v3434_v22, %v3433_v61  ;;  %v3046_v47 = vadd.f32 %v3045_v58, %v3044_v6 }
 0x1df   : > { %v3048_v27 = vadd.f32 %v3047_v37, %v3046_v47  ;;  %v3437_v54 = vadd.f32 %v3436_v44, %v3435_v35 }
 0x1e1   : > { %v3439_v50 = vadd.f32 %v3438_v45, %v3437_v54  ;;  %v3050_v39 = vadd.f32 %v3049_v15, %v3048_v27 }
 0x1e3   : > { %v3052_v52 = vadd.f32 %v3051_v38, %v3050_v39  ;;  %v3441_v10 = vadd.f32 %v3440_v9, %v3439_v50 }
 0x1e5   : > { %v3443_v53 = vadd.f32 %v3442_v33, %v3441_v10  ;;  %v3054_v28 = vadd.f32 %v3053_v31, %v3052_v52 }
 0x1e7   : > { %v3056_v63 = vadd.f32 %v3055_v57, %v3054_v28  ;;  %v3445_v40 = vadd.f32 %v3444_v26, %v3443_v53 }
 0x1e9   : > { %v3058_v0 = vadd.f32 %v3057_v42, %v3056_v63  ;;  %v3447_v62 = vadd.f32 %v3446_v30, %v3445_v40 }
 0x1eb   : > { %v3059_v36 = vrot.slane %v3058_v0, 4  ;;  %v3449_v59 = vadd.f32 %v3448_v55, %v3447_v62 }
 0x1ed   : > { %v3060_v49 = vadd.f32 %v3059_v36, %v3058_v0  ;;  %v3450_v14 = vrot.slane %v3449_v59, 4 }
 0x1ef   : > { %v3061_v25 = vrot.slane %v3060_v49, 2  ;;  %v3451_v3 = vadd.f32 %v3450_v14, %v3449_v59 }
 0x1f1   : > { %v3062_v11 = vadd.f32 %v3061_v25, %v3060_v49  ;;  %v3452_v16 = vrot.slane %v3451_v3, 2 }
 0x1f3   : > { %v3063_v4 = vrot.slane %v3062_v11, 1  ;;  %v3453_v24 = vadd.f32 %v3452_v16, %v3451_v3 }
 0x1f5   : > { %v3064_v12 = vadd.f32 %v3063_v4, %v3062_v11  ;;  %v3454_v13 = vrot.slane %v3453_v24, 1 }
 0x1f7   : > { %3066 = vst.msk [vmem:[%s298_s7] sm:$0x1] %vm3065_vm5, %v3064_v12  ;;  %v3455_v46 = vadd.f32 %v3454_v13, %v3453_v24 }
 0x1f9   : > { %3456 = vst.msk [vmem:[%s304_s10] sm:$0x1] %vm3065_vm5, %v3455_v46 }
 0x1fa PF: > { %s15_s17 = sadd.s32 1, %s4345_s17   ;;  %s6138_s15 = smov %s4341_s16 }
 0x1fb   : > { %p12_p6 = scmp.ge.s32.totalorder %s15_s17, 10   ;;  %s6139_s16 = smov %s6141_s18 }
 0x1fd   :  { %14 = sbr.rel (!%p12_p6) target bundleno = 2 (0x2), region = 93 }

</bundles_post_ra>
